<compile_context>
chip_gen: v6e
topology: v6e:2x2x1
jax: 0.10.0
libtpu: 0.0.40
codegen_flags: <defaults>
</compile_context>

<pallas_src>
import math
import functools

import jax
import jax.numpy as jnp
from jax import lax
from jax.experimental import pallas as pl
from jax.experimental.pallas import tpu as pltpu


# ----------------------------- Pallas kernel -------------------------------

def granite_block_kernel(
    x_ref, lnw_ref, fflnw_ref,
    wqkv_ref, wot_ref, wgu_ref, w2t_ref,
    cos_ref, sin_ref,
    out_ref,
    *, nheads, head_dim, hidden, eps, residual_multiplier, causal,
):
    f32, bf16 = jnp.float32, jnp.bfloat16
    x = x_ref[...].astype(f32)                          # (S, D), batch dim squeezed
    S, D = x.shape
    half = head_dim // 2

    # --- attention sub-layer RMSNorm (use_mean=False, scale only, f32) ---
    xn = x * lax.rsqrt(jnp.mean(x * x, axis=-1, keepdims=True) + eps) * lnw_ref[...]

    # --- fused qkv projection: bf16 operands, f32 MXU accumulation ---
    qkv = jnp.dot(xn.astype(bf16), wqkv_ref[...],
                  preferred_element_type=f32)           # (S, 3D) f32

    # --- head split: lane-boundary reshape + major-dim transpose (no Python
    #     per-head slice/stack) ---
    def split_heads(t):                                 # (S, D) -> (H, S, hd)
        return jnp.swapaxes(t.reshape(S, nheads, head_dim), 0, 1)

    qh = split_heads(qkv[:, :D])
    kh = split_heads(qkv[:, D:2 * D])
    vh = split_heads(qkv[:, 2 * D:]).astype(bf16)

    # --- RoPE in the half-split basis: rotate-half = one XLU lane roll on a
    #     2-D (H*S, hd) view; rotation sign pre-folded into the sin table ---
    cos = cos_ref[...][None]                            # (1, S, hd) f32
    sin = sin_ref[...][None]                            # (1, S, hd), first half negated

    def rope(t):                                        # (H, S, hd) f32
        t2 = t.reshape(nheads * S, head_dim)
        t_rot = pltpu.roll(t2, shift=half, axis=1).reshape(nheads, S, head_dim)
        return t * cos + t_rot * sin

    qh = rope(qh).astype(bf16)
    kh = rope(kh).astype(bf16)

    # --- batched SDPA over all heads (attention_multiplier folded into Wq) ---
    # TODO(synk): flash-style KV tiling required at production S (see header).
    s = jnp.einsum("hqd,hkd->hqk", qh, kh,
                   preferred_element_type=f32)          # (H, S, S) f32
    if causal:                                          # per-kernel mask; disappears
        row = lax.broadcasted_iota(jnp.int32, (S, S), 0)   # naturally with flash tiling
        col = lax.broadcasted_iota(jnp.int32, (S, S), 1)
        s = jnp.where((col <= row)[None], s, jnp.finfo(f32).min)
    m = jnp.max(s, axis=-1, keepdims=True)
    e = jnp.exp(s - m)
    p = (e * pl.reciprocal(jnp.sum(e, axis=-1, keepdims=True), approx=True)).astype(bf16)
    oh = jnp.einsum("hqk,hkd->hqd", p, vh,
                    preferred_element_type=f32)         # (H, S, hd) f32

    # --- head merge (inverse transpose + 128-lane-boundary reshape) feeding a
    #     single K=D output projection (single contracting dim on the MXU) ---
    o = jnp.swapaxes(oh.astype(bf16), 0, 1).reshape(S, D)
    attn_out = jnp.dot(o, wot_ref[...], preferred_element_type=f32)

    x1 = attn_out * residual_multiplier + x

    # --- feed-forward sub-layer: RMSNorm + fused gate|up GLU (swish) ---
    xn2 = x1 * lax.rsqrt(jnp.mean(x1 * x1, axis=-1, keepdims=True) + eps) * fflnw_ref[...]
    gu = jnp.dot(xn2.astype(bf16), wgu_ref[...], preferred_element_type=f32)   # (S, 2*hidden)
    g, u = gu[:, :hidden], gu[:, hidden:]
    ff = jnp.dot((g * jax.nn.sigmoid(g) * u).astype(bf16), w2t_ref[...],
                 preferred_element_type=f32)

    out_ref[...] = (ff * residual_multiplier + x1).astype(out_ref.dtype)


# ------------------------------ JAX wrapper ---------------------------------

def granite_block(x, params, *, nheads, eps, attn_scale, residual_multiplier,
                  rope_theta, causal=False):
    B, S, D = x.shape
    head_dim = D // nheads
    hidden = params["w1"].shape[0]
    bf16 = jnp.bfloat16

    # Per-head [evens | odds] (half-split) output-row permutation for Wq / Wk;
    # attention scale folded into Wq (one-time setup cost).
    perm_head = jnp.concatenate(
        [jnp.arange(0, head_dim, 2), jnp.arange(1, head_dim, 2)])
    perm = (perm_head[None, :] + head_dim * jnp.arange(nheads)[:, None]).reshape(-1)
    wq_p = params["wq"][perm, :] * attn_scale
    wk_p = params["wk"][perm, :]

    # Fused / transposed weights shipped in bf16 (f32 accumulation in-kernel).
    wqkv_t = jnp.concatenate([wq_p.T, wk_p.T, params["wv"].T], axis=1).astype(bf16)  # (D, 3D)
    wot = params["wo"].T.astype(bf16)                                                # (D, D)
    wgu_t = jnp.concatenate([params["wg"].T, params["w1"].T], axis=1).astype(bf16)   # (D, 2*hidden)
    w2t = params["w2"].T.astype(bf16)                                                # (hidden, D)

    # cos / sin tables in the half-split basis (S, hd), f32; rotate-half sign
    # folded into the first half of the sin table.
    pos = jnp.arange(S, dtype=jnp.float32)
    inv_freq = rope_theta ** (-jnp.arange(0, head_dim, 2, dtype=jnp.float32) / head_dim)
    ang = pos[:, None] * inv_freq[None, :]                                           # (S, hd/2)
    cos_h = jnp.concatenate([jnp.cos(ang), jnp.cos(ang)], axis=-1)
    sin_h = jnp.concatenate([-jnp.sin(ang), jnp.sin(ang)], axis=-1)

    kernel = functools.partial(
        granite_block_kernel,
        nheads=nheads, head_dim=head_dim, hidden=hidden, eps=eps,
        residual_multiplier=residual_multiplier, causal=causal)

    const = lambda b: (0, 0)
    in_specs = [
        pl.BlockSpec((pl.Squeezed(), S, D), lambda b: (b, 0, 0)),   # x (per-batch slab)
        pl.BlockSpec((1, D), const),                                # ln weight (f32)
        pl.BlockSpec((1, D), const),                                # ff_ln weight (f32)
        pl.BlockSpec((D, 3 * D), const),                            # [Wq|Wk|Wv]^T bf16
        pl.BlockSpec((D, D), const),                                # Wo^T bf16
        pl.BlockSpec((D, 2 * hidden), const),                       # [Wg|W1]^T bf16
        pl.BlockSpec((hidden, D), const),                           # W2^T bf16
        pl.BlockSpec((S, head_dim), const),                         # cos table (f32)
        pl.BlockSpec((S, head_dim), const),                         # sin table (f32, sign folded)
    ]
    out_specs = pl.BlockSpec((pl.Squeezed(), S, D), lambda b: (b, 0, 0))

    # TODO(synk): at production Granite sizes the weights must be streamed in
    # D / hidden blocks (extra grid axes + f32 accumulator) — this all-resident
    # layout targets the test shapes, batch axis sharded across TensorCores.
    return pl.pallas_call(
        kernel,
        out_shape=jax.ShapeDtypeStruct((B, S, D), x.dtype),
        grid=(B,),
        in_specs=in_specs,
        out_specs=out_specs,
        compiler_params=pltpu.CompilerParams(
            dimension_semantics=("parallel",),
            vmem_limit_bytes=48 * 1024 * 1024),
    )(x,
      params["ln_w"][None, :], params["ff_ln_w"][None, :],
      wqkv_t, wot, wgu_t, w2t,
      cos_h, sin_h)


# ------------------------- plain-JAX reference ------------------------------

def granite_block_reference(x, p, *, nheads, eps, attn_scale,
                            residual_multiplier, rope_theta, causal=False):
    B, S, D = x.shape
    hd = D // nheads

    def rms(v, w):
        return v * lax.rsqrt(jnp.mean(v * v, -1, keepdims=True) + eps) * w

    xn = rms(x, p["ln_w"])
    q = (xn @ p["wq"].T).reshape(B, S, nheads, hd)
    k = (xn @ p["wk"].T).reshape(B, S, nheads, hd)
    v = (xn @ p["wv"].T).reshape(B, S, nheads, hd)

    # interleaved (complex-pair) rotary, as in FMS RotaryEmbedding
    pos = jnp.arange(S, dtype=jnp.float32)
    inv = rope_theta ** (-jnp.arange(0, hd, 2, dtype=jnp.float32) / hd)
    ang = pos[:, None] * inv[None, :]
    cos = jnp.cos(ang)[None, :, None, :]
    sin = jnp.sin(ang)[None, :, None, :]

    def rope(t):
        t0, t1 = t[..., 0::2], t[..., 1::2]
        r0 = t0 * cos - t1 * sin
        r1 = t0 * sin + t1 * cos
        return jnp.stack([r0, r1], axis=-1).reshape(t.shape)

    q, k = rope(q), rope(k)
    s = jnp.einsum("bqhd,bkhd->bhqk", q, k) * attn_scale
    if causal:
        s = jnp.where(jnp.tril(jnp.ones((S, S), bool)), s, -1e30)
    a = jax.nn.softmax(s, axis=-1)
    o = jnp.einsum("bhqk,bkhd->bqhd", a, v).reshape(B, S, D) @ p["wo"].T

    x1 = o * residual_multiplier + x
    xn2 = rms(x1, p["ff_ln_w"])
    g = xn2 @ p["wg"].T
    u = xn2 @ p["w1"].T
    ff = (g * jax.nn.sigmoid(g) * u) @ p["w2"].T
    return ff * residual_multiplier + x1


# --------------------------------- main --------------------------------------

if __name__ == "__main__":
    # Small GraniteConfig-consistent, TPU-native shapes: D multiple of 128
    # (lane-dense outputs), head_dim = 128, hidden rounded to multiple_of=256.
    B, S = 2, 16
    emb_dim = 256
    nheads = 2
    head_dim = emb_dim // nheads                 # 128 (emb_kq = emb_v = emb_dim // nheads)
    hidden_grow_factor = 8 / 3
    multiple_of = 256
    hidden = int(hidden_grow_factor * emb_dim)
    hidden = multiple_of * ((hidden + multiple_of - 1) // multiple_of)   # 768
    norm_eps = 1e-5
    rope_theta = 10000.0
    residual_multiplier = 0.5
    # GraniteConfig.attention_multiplier is passed verbatim as the SDPA scale.
    attention_multiplier = 1.0 / math.sqrt(head_dim)

    key = jax.random.PRNGKey(0)
    ks = jax.random.split(key, 10)
    std = 0.05
    # Matmul weights are shipped to the kernel in bf16; round-trip them here so
    # the f32 reference uses numerically identical weights.
    bfr = lambda w: w.astype(jnp.bfloat16).astype(jnp.float32)
    params = {
        "ln_w":    1.0 + 0.02 * jax.random.normal(ks[0], (emb_dim,), jnp.float32),
        "ff_ln_w": 1.0 + 0.02 * jax.random.normal(ks[1], (emb_dim,), jnp.float32),
        "wq": bfr(std * jax.random.normal(ks[2], (emb_dim, emb_dim), jnp.float32)),
        "wk": bfr(std * jax.random.normal(ks[3], (emb_dim, emb_dim), jnp.float32)),
        "wv": bfr(std * jax.random.normal(ks[4], (emb_dim, emb_dim), jnp.float32)),
        "wo": bfr(std * jax.random.normal(ks[5], (emb_dim, emb_dim), jnp.float32)),
        "wg": bfr(std * jax.random.normal(ks[6], (hidden, emb_dim), jnp.float32)),
        "w1": bfr(std * jax.random.normal(ks[7], (hidden, emb_dim), jnp.float32)),
        "w2": bfr(std * jax.random.normal(ks[8], (emb_dim, hidden), jnp.float32)),
    }
    x = jax.random.normal(ks[9], (B, S, emb_dim), jnp.float32)

    # TODO(synk): use_cache / past_key_value_state (KV-cache plumbing) and
    # p_dropout>0 paths are not exercised (defaults: no cache, dropout=0).

    for causal in (False, True):
        out = granite_block(
            x, params, nheads=nheads, eps=norm_eps, attn_scale=attention_multiplier,
            residual_multiplier=residual_multiplier, rope_theta=rope_theta,
            causal=causal)
        out = jax.block_until_ready(out)

        ref = granite_block_reference(
            x, params, nheads=nheads, eps=norm_eps, attn_scale=attention_multiplier,
            residual_multiplier=residual_multiplier, rope_theta=rope_theta,
            causal=causal)

        assert out.shape == (B, S, emb_dim)
        # bf16 MXU operands + approx reciprocal in the kernel vs f32 reference:
        # tolerance loosened per the review (structural bugs are O(0.1+)).
        err = float(jnp.max(jnp.abs(out - ref)))
        assert jnp.allclose(out, ref, atol=3e-2, rtol=3e-2), (causal, err)

    print("KERNEL_OK")
</pallas_src>

<mosaic_0001>
module attributes {stable_mosaic.version = 11 : i64} {
  func.func @granite_block_kernel(%arg0: i32, %arg1: memref<1x16x256xf32, #tpu.memory_space<vmem>>, %arg2: memref<1x256xf32, #tpu.memory_space<vmem>>, %arg3: memref<1x256xf32, #tpu.memory_space<vmem>>, %arg4: memref<256x768xbf16, #tpu.memory_space<vmem>>, %arg5: memref<256x256xbf16, #tpu.memory_space<vmem>>, %arg6: memref<256x1536xbf16, #tpu.memory_space<vmem>>, %arg7: memref<768x256xbf16, #tpu.memory_space<vmem>>, %arg8: memref<16x128xf32, #tpu.memory_space<vmem>>, %arg9: memref<16x128xf32, #tpu.memory_space<vmem>>, %arg10: memref<1x16x256xf32, #tpu.memory_space<vmem>>) attributes {dimension_semantics = [#tpu.dimension_semantics<parallel>], iteration_bounds = array<i64: 2>, scalar_prefetch = 0 : i64, scratch_operands = 0 : i64, tpu.core_type = #tpu.core_type<tc>, window_params = [{transform_indices = @transform_0, window_bounds = array<i64: 1, 16, 256>}, {pipeline_mode = #tpu.pipeline_mode<synchronous>, transform_indices = @transform_1, window_bounds = array<i64: 1, 256>}, {pipeline_mode = #tpu.pipeline_mode<synchronous>, transform_indices = @transform_2, window_bounds = array<i64: 1, 256>}, {pipeline_mode = #tpu.pipeline_mode<synchronous>, transform_indices = @transform_3, window_bounds = array<i64: 256, 768>}, {pipeline_mode = #tpu.pipeline_mode<synchronous>, transform_indices = @transform_4, window_bounds = array<i64: 256, 256>}, {pipeline_mode = #tpu.pipeline_mode<synchronous>, transform_indices = @transform_5, window_bounds = array<i64: 256, 1536>}, {pipeline_mode = #tpu.pipeline_mode<synchronous>, transform_indices = @transform_6, window_bounds = array<i64: 768, 256>}, {pipeline_mode = #tpu.pipeline_mode<synchronous>, transform_indices = @transform_7, window_bounds = array<i64: 16, 128>}, {pipeline_mode = #tpu.pipeline_mode<synchronous>, transform_indices = @transform_8, window_bounds = array<i64: 16, 128>}, {transform_indices = @transform_9, window_bounds = array<i64: 1, 16, 256>}]} {
    %c0 = arith.constant 0 : index
    %c0_0 = arith.constant 0 : index
    %c0_1 = arith.constant 0 : index
    %0 = vector.load %arg1[%c0, %c0_0, %c0_1] : memref<1x16x256xf32, #tpu.memory_space<vmem>>, vector<1x16x256xf32>
    %1 = vector.shape_cast %0 : vector<1x16x256xf32> to vector<16x256xf32>
    %2 = arith.mulf %1, %1 : vector<16x256xf32>
    %cst = arith.constant dense<0.000000e+00> : vector<16xf32>
    %3 = vector.multi_reduction <add>, %2, %cst [1] : vector<16x256xf32> to vector<16xf32>
    %4 = vector.shape_cast %3 : vector<16xf32> to vector<16x1xf32>
    %cst_2 = arith.constant 2.560000e+02 : f32
    %5 = vector.broadcast %cst_2 : f32 to vector<16x1xf32>
    %6 = arith.divf %4, %5 : vector<16x1xf32>
    %cst_3 = arith.constant 9.99999974E-6 : f32
    %7 = vector.broadcast %cst_3 : f32 to vector<16x1xf32>
    %8 = arith.addf %6, %7 : vector<16x1xf32>
    %9 = math.rsqrt %8 : vector<16x1xf32>
    %10 = vector.broadcast %9 : vector<16x1xf32> to vector<16x256xf32>
    %11 = arith.mulf %1, %10 : vector<16x256xf32>
    %c0_4 = arith.constant 0 : index
    %c0_5 = arith.constant 0 : index
    %12 = vector.load %arg2[%c0_4, %c0_5] : memref<1x256xf32, #tpu.memory_space<vmem>>, vector<1x256xf32>
    %13 = vector.broadcast %12 : vector<1x256xf32> to vector<16x256xf32>
    %14 = arith.mulf %11, %13 : vector<16x256xf32>
    %15 = arith.truncf %14 : vector<16x256xf32> to vector<16x256xbf16>
    %c0_6 = arith.constant 0 : index
    %c0_7 = arith.constant 0 : index
    %16 = vector.load %arg4[%c0_6, %c0_7] : memref<256x768xbf16, #tpu.memory_space<vmem>>, vector<256x768xbf16>
    %cst_8 = arith.constant dense<0.000000e+00> : vector<16x768xf32>
    %17 = tpu.matmul %15, %16, %cst_8 {dimension_numbers = #tpu.dot_dimension_numbers<[1], [0], [0], [1], [0, 0, 1, 1], [], []>} : vector<16x256xbf16>, vector<256x768xbf16>, vector<16x768xf32> -> vector<16x768xf32>
    %18 = vector.extract_strided_slice %17 {offsets = [0, 0], sizes = [16, 256], strides = [1, 1]} : vector<16x768xf32> to vector<16x256xf32>
    %19 = vector.shape_cast %18 : vector<16x256xf32> to vector<16x2x128xf32>
    %20 = tpu.transpose %19, [1, 0, 2] : vector<16x2x128xf32> -> vector<2x16x128xf32>
    %21 = vector.extract_strided_slice %17 {offsets = [0, 256], sizes = [16, 256], strides = [1, 1]} : vector<16x768xf32> to vector<16x256xf32>
    %22 = vector.shape_cast %21 : vector<16x256xf32> to vector<16x2x128xf32>
    %23 = tpu.transpose %22, [1, 0, 2] : vector<16x2x128xf32> -> vector<2x16x128xf32>
    %24 = vector.extract_strided_slice %17 {offsets = [0, 512], sizes = [16, 256], strides = [1, 1]} : vector<16x768xf32> to vector<16x256xf32>
    %25 = vector.shape_cast %24 : vector<16x256xf32> to vector<16x2x128xf32>
    %26 = tpu.transpose %25, [1, 0, 2] : vector<16x2x128xf32> -> vector<2x16x128xf32>
    %27 = arith.truncf %26 : vector<2x16x128xf32> to vector<2x16x128xbf16>
    %c0_9 = arith.constant 0 : index
    %c0_10 = arith.constant 0 : index
    %28 = vector.load %arg8[%c0_9, %c0_10] : memref<16x128xf32, #tpu.memory_space<vmem>>, vector<16x128xf32>
    %29 = vector.shape_cast %28 : vector<16x128xf32> to vector<1x16x128xf32>
    %c0_11 = arith.constant 0 : index
    %c0_12 = arith.constant 0 : index
    %30 = vector.load %arg9[%c0_11, %c0_12] : memref<16x128xf32, #tpu.memory_space<vmem>>, vector<16x128xf32>
    %31 = vector.shape_cast %30 : vector<16x128xf32> to vector<1x16x128xf32>
    %32 = vector.shape_cast %20 : vector<2x16x128xf32> to vector<32x128xf32>
    %c64_i32 = arith.constant 64 : i32
    %33 = tpu.dynamic_rotate %32 by %c64_i32 dim 1 : vector<32x128xf32>, i32 -> vector<32x128xf32>
    %34 = vector.shape_cast %33 : vector<32x128xf32> to vector<2x16x128xf32>
    %35 = vector.broadcast %29 : vector<1x16x128xf32> to vector<2x16x128xf32>
    %36 = arith.mulf %20, %35 : vector<2x16x128xf32>
    %37 = vector.broadcast %31 : vector<1x16x128xf32> to vector<2x16x128xf32>
    %38 = arith.mulf %34, %37 : vector<2x16x128xf32>
    %39 = arith.addf %36, %38 : vector<2x16x128xf32>
    %40 = arith.truncf %39 : vector<2x16x128xf32> to vector<2x16x128xbf16>
    %41 = vector.shape_cast %23 : vector<2x16x128xf32> to vector<32x128xf32>
    %c64_i32_13 = arith.constant 64 : i32
    %42 = tpu.dynamic_rotate %41 by %c64_i32_13 dim 1 : vector<32x128xf32>, i32 -> vector<32x128xf32>
    %43 = vector.shape_cast %42 : vector<32x128xf32> to vector<2x16x128xf32>
    %44 = vector.broadcast %29 : vector<1x16x128xf32> to vector<2x16x128xf32>
    %45 = arith.mulf %23, %44 : vector<2x16x128xf32>
    %46 = vector.broadcast %31 : vector<1x16x128xf32> to vector<2x16x128xf32>
    %47 = arith.mulf %43, %46 : vector<2x16x128xf32>
    %48 = arith.addf %45, %47 : vector<2x16x128xf32>
    %49 = arith.truncf %48 : vector<2x16x128xf32> to vector<2x16x128xbf16>
    "tpu.trace_start"() <{level = 10 : i32, message = "hqd,hkd->hqk"}> : () -> ()
    %cst_14 = arith.constant dense<0.000000e+00> : vector<2x16x16xf32>
    %50 = tpu.matmul %40, %49, %cst_14 {dimension_numbers = #tpu.dot_dimension_numbers<[2], [2], [1], [1], [0, 0, 0, 1, 1, 1], [0], [0]>} : vector<2x16x128xbf16>, vector<2x16x128xbf16>, vector<2x16x16xf32> -> vector<2x16x16xf32>
    "tpu.trace_stop"() : () -> ()
    %cst_15 = arith.constant dense<0xFF800000> : vector<2x16xf32>
    %51 = vector.multi_reduction <maximumf>, %50, %cst_15 [2] : vector<2x16x16xf32> to vector<2x16xf32>
    %52 = vector.shape_cast %51 : vector<2x16xf32> to vector<2x16x1xf32>
    %53 = vector.broadcast %52 : vector<2x16x1xf32> to vector<2x16x16xf32>
    %54 = arith.subf %50, %53 : vector<2x16x16xf32>
    %55 = math.exp %54 : vector<2x16x16xf32>
    %cst_16 = arith.constant dense<0.000000e+00> : vector<2x16xf32>
    %56 = vector.multi_reduction <add>, %55, %cst_16 [2] : vector<2x16x16xf32> to vector<2x16xf32>
    %57 = vector.shape_cast %56 : vector<2x16xf32> to vector<2x16x1xf32>
    %58 = tpu.reciprocal %57 {approx = true} : vector<2x16x1xf32> -> vector<2x16x1xf32>
    %59 = vector.broadcast %58 : vector<2x16x1xf32> to vector<2x16x16xf32>
    %60 = arith.mulf %55, %59 : vector<2x16x16xf32>
    %61 = arith.truncf %60 : vector<2x16x16xf32> to vector<2x16x16xbf16>
    "tpu.trace_start"() <{level = 10 : i32, message = "hqk,hkd->hqd"}> : () -> ()
    %cst_17 = arith.constant dense<0.000000e+00> : vector<2x16x128xf32>
    %62 = tpu.matmul %61, %27, %cst_17 {dimension_numbers = #tpu.dot_dimension_numbers<[2], [1], [1], [2], [0, 0, 0, 1, 1, 2], [0], [0]>} : vector<2x16x16xbf16>, vector<2x16x128xbf16>, vector<2x16x128xf32> -> vector<2x16x128xf32>
    "tpu.trace_stop"() : () -> ()
    %63 = arith.truncf %62 : vector<2x16x128xf32> to vector<2x16x128xbf16>
    %64 = tpu.transpose %63, [1, 0, 2] : vector<2x16x128xbf16> -> vector<16x2x128xbf16>
    %65 = vector.shape_cast %64 : vector<16x2x128xbf16> to vector<16x256xbf16>
    %c0_18 = arith.constant 0 : index
    %c0_19 = arith.constant 0 : index
    %66 = vector.load %arg5[%c0_18, %c0_19] : memref<256x256xbf16, #tpu.memory_space<vmem>>, vector<256x256xbf16>
    %cst_20 = arith.constant dense<0.000000e+00> : vector<16x256xf32>
    %67 = tpu.matmul %65, %66, %cst_20 {dimension_numbers = #tpu.dot_dimension_numbers<[1], [0], [0], [1], [0, 0, 1, 1], [], []>} : vector<16x256xbf16>, vector<256x256xbf16>, vector<16x256xf32> -> vector<16x256xf32>
    %cst_21 = arith.constant 5.000000e-01 : f32
    %68 = vector.broadcast %cst_21 : f32 to vector<16x256xf32>
    %69 = arith.mulf %67, %68 : vector<16x256xf32>
    %70 = arith.addf %69, %1 : vector<16x256xf32>
    %71 = arith.mulf %70, %70 : vector<16x256xf32>
    %cst_22 = arith.constant dense<0.000000e+00> : vector<16xf32>
    %72 = vector.multi_reduction <add>, %71, %cst_22 [1] : vector<16x256xf32> to vector<16xf32>
    %73 = vector.shape_cast %72 : vector<16xf32> to vector<16x1xf32>
    %cst_23 = arith.constant 2.560000e+02 : f32
    %74 = vector.broadcast %cst_23 : f32 to vector<16x1xf32>
    %75 = arith.divf %73, %74 : vector<16x1xf32>
    %cst_24 = arith.constant 9.99999974E-6 : f32
    %76 = vector.broadcast %cst_24 : f32 to vector<16x1xf32>
    %77 = arith.addf %75, %76 : vector<16x1xf32>
    %78 = math.rsqrt %77 : vector<16x1xf32>
    %79 = vector.broadcast %78 : vector<16x1xf32> to vector<16x256xf32>
    %80 = arith.mulf %70, %79 : vector<16x256xf32>
    %c0_25 = arith.constant 0 : index
    %c0_26 = arith.constant 0 : index
    %81 = vector.load %arg3[%c0_25, %c0_26] : memref<1x256xf32, #tpu.memory_space<vmem>>, vector<1x256xf32>
    %82 = vector.broadcast %81 : vector<1x256xf32> to vector<16x256xf32>
    %83 = arith.mulf %80, %82 : vector<16x256xf32>
    %84 = arith.truncf %83 : vector<16x256xf32> to vector<16x256xbf16>
    %c0_27 = arith.constant 0 : index
    %c0_28 = arith.constant 0 : index
    %85 = vector.load %arg6[%c0_27, %c0_28] : memref<256x1536xbf16, #tpu.memory_space<vmem>>, vector<256x1536xbf16>
    %cst_29 = arith.constant dense<0.000000e+00> : vector<16x1536xf32>
    %86 = tpu.matmul %84, %85, %cst_29 {dimension_numbers = #tpu.dot_dimension_numbers<[1], [0], [0], [1], [0, 0, 1, 1], [], []>} : vector<16x256xbf16>, vector<256x1536xbf16>, vector<16x1536xf32> -> vector<16x1536xf32>
    %87 = vector.extract_strided_slice %86 {offsets = [0, 0], sizes = [16, 768], strides = [1, 1]} : vector<16x1536xf32> to vector<16x768xf32>
    %88 = vector.extract_strided_slice %86 {offsets = [0, 768], sizes = [16, 768], strides = [1, 1]} : vector<16x1536xf32> to vector<16x768xf32>
    %89 = arith.negf %87 : vector<16x768xf32>
    %90 = math.exp %89 : vector<16x768xf32>
    %cst_30 = arith.constant 1.000000e+00 : f32
    %91 = vector.broadcast %cst_30 : f32 to vector<16x768xf32>
    %92 = arith.addf %91, %90 : vector<16x768xf32>
    %93 = arith.divf %91, %92 : vector<16x768xf32>
    %94 = arith.mulf %87, %93 : vector<16x768xf32>
    %95 = arith.mulf %94, %88 : vector<16x768xf32>
    %96 = arith.truncf %95 : vector<16x768xf32> to vector<16x768xbf16>
    %c0_31 = arith.constant 0 : index
    %c0_32 = arith.constant 0 : index
    %97 = vector.load %arg7[%c0_31, %c0_32] : memref<768x256xbf16, #tpu.memory_space<vmem>>, vector<768x256xbf16>
    %cst_33 = arith.constant dense<0.000000e+00> : vector<16x256xf32>
    %98 = tpu.matmul %96, %97, %cst_33 {dimension_numbers = #tpu.dot_dimension_numbers<[1], [0], [0], [1], [0, 0, 1, 1], [], []>} : vector<16x768xbf16>, vector<768x256xbf16>, vector<16x256xf32> -> vector<16x256xf32>
    %cst_34 = arith.constant 5.000000e-01 : f32
    %99 = vector.broadcast %cst_34 : f32 to vector<16x256xf32>
    %100 = arith.mulf %98, %99 : vector<16x256xf32>
    %101 = arith.addf %100, %70 : vector<16x256xf32>
    %c0_35 = arith.constant 0 : index
    %c0_36 = arith.constant 0 : index
    %c0_37 = arith.constant 0 : index
    %102 = vector.load %arg10[%c0_35, %c0_36, %c0_37] : memref<1x16x256xf32, #tpu.memory_space<vmem>>, vector<1x16x256xf32>
    %103 = vector.shape_cast %102 : vector<1x16x256xf32> to vector<16x256xf32>
    %104 = vector.shape_cast %101 : vector<16x256xf32> to vector<1x16x256xf32>
    tpu.vector_store %arg10[%c0_35, %c0_36, %c0_37], %104 {strides = array<i32>} : memref<1x16x256xf32, #tpu.memory_space<vmem>>, vector<1x16x256xf32>,
    return
  }
  func.func @transform_0(%arg0: i32) -> (i32, i32, i32) {
    %c0_i32 = arith.constant 0 : i32
    %c0_i32_0 = arith.constant 0 : i32
    %c0_i32_1 = arith.constant 0 : i32
    return %arg0, %c0_i32, %c0_i32_0 : i32, i32, i32
  }
  func.func @transform_1(%arg0: i32) -> (i32, i32) {
    %c0_i32 = arith.constant 0 : i32
    %c0_i32_0 = arith.constant 0 : i32
    %c0_i32_1 = arith.constant 0 : i32
    return %c0_i32, %c0_i32_0 : i32, i32
  }
  func.func @transform_2(%arg0: i32) -> (i32, i32) {
    %c0_i32 = arith.constant 0 : i32
    %c0_i32_0 = arith.constant 0 : i32
    %c0_i32_1 = arith.constant 0 : i32
    return %c0_i32, %c0_i32_0 : i32, i32
  }
  func.func @transform_3(%arg0: i32) -> (i32, i32) {
    %c0_i32 = arith.constant 0 : i32
    %c0_i32_0 = arith.constant 0 : i32
    %c0_i32_1 = arith.constant 0 : i32
    return %c0_i32, %c0_i32_0 : i32, i32
  }
  func.func @transform_4(%arg0: i32) -> (i32, i32) {
    %c0_i32 = arith.constant 0 : i32
    %c0_i32_0 = arith.constant 0 : i32
    %c0_i32_1 = arith.constant 0 : i32
    return %c0_i32, %c0_i32_0 : i32, i32
  }
  func.func @transform_5(%arg0: i32) -> (i32, i32) {
    %c0_i32 = arith.constant 0 : i32
    %c0_i32_0 = arith.constant 0 : i32
    %c0_i32_1 = arith.constant 0 : i32
    return %c0_i32, %c0_i32_0 : i32, i32
  }
  func.func @transform_6(%arg0: i32) -> (i32, i32) {
    %c0_i32 = arith.constant 0 : i32
    %c0_i32_0 = arith.constant 0 : i32
    %c0_i32_1 = arith.constant 0 : i32
    return %c0_i32, %c0_i32_0 : i32, i32
  }
  func.func @transform_7(%arg0: i32) -> (i32, i32) {
    %c0_i32 = arith.constant 0 : i32
    %c0_i32_0 = arith.constant 0 : i32
    %c0_i32_1 = arith.constant 0 : i32
    return %c0_i32, %c0_i32_0 : i32, i32
  }
  func.func @transform_8(%arg0: i32) -> (i32, i32) {
    %c0_i32 = arith.constant 0 : i32
    %c0_i32_0 = arith.constant 0 : i32
    %c0_i32_1 = arith.constant 0 : i32
    return %c0_i32, %c0_i32_0 : i32, i32
  }
  func.func @transform_9(%arg0: i32) -> (i32, i32, i32) {
    %c0_i32 = arith.constant 0 : i32
    %c0_i32_0 = arith.constant 0 : i32
    %c0_i32_1 = arith.constant 0 : i32
    return %arg0, %c0_i32, %c0_i32_0 : i32, i32, i32
  }
}

</mosaic_0001>

<bundles_post_ra>
// kernel: tpu_custom_call.1
= control target key start
LH: loop header
LB: loop body
LE: loop exit
PB: predicated region body
PF: predicated region fallthrough
CT: control target
= control target key end

     0   :  { %s7313_s0 = inlined_call_operand.hbm [shape: f32[2,16,256], index: 0, kind: input, shape index: {}]   ;;  %s7314_s1 = inlined_call_operand.hbm [shape: f32[1,256], index: 1, kind: input, shape index: {}]   ;;  %s7315_s2 = inlined_call_operand.vmem [shape: f32[1,256], index: 2, kind: input, shape index: {}]   ;;  %s7316_s3 = inlined_call_operand.hbm [shape: bf16[256,768], index: 3, kind: input, shape index: {}]   ;;  %s7317_s4 = inlined_call_operand.hbm [shape: bf16[256,256], index: 4, kind: input, shape index: {}]   ;;  %s7318_s5 = inlined_call_operand.hbm [shape: bf16[256,1536], index: 5, kind: input, shape index: {}]   ;;  %s7319_s6 = inlined_call_operand.hbm [shape: bf16[768,256], index: 6, kind: input, shape index: {}]   ;;  %s7320_s7 = inlined_call_operand.hbm [shape: f32[16,128], index: 7, kind: input, shape index: {}]   ;;  %s7321_s8 = inlined_call_operand.hbm [shape: f32[16,128], index: 8, kind: input, shape index: {}]   ;;  %s7322_s9 = inlined_call_operand.hbm [shape: f32[2,16,256], index: 9, kind: output, shape index: {}]  }
   0x1   :  { %7327 = sst [smem:[#allocation23_spill]] %s7314_s1 }
   0x2   :  { %7328 = sst [smem:[#allocation24_spill]] %s7316_s3 }
   0x3   :  { %7329 = sst [smem:[#allocation25_spill]] %s7317_s4 }
   0x4   :  { %14 = vsyncpa [#allocation3], 0 }
   0x5   :  { %16 = vsyncpa [#allocation3 + $0x1], 0 }
   0x6   :  { %17 = vsyncpa [#allocation6], 0 }
   0x7   :  { %18 = vsyncpa [#allocation9], 0 }
   0x8   :  { %19 = vsyncpa [#allocation12], 0 }
   0x9   :  { %20 = vsyncpa [#allocation15], 0 }
   0xa   :  { %21 = vsyncpa [#allocation4], 0 }
   0xb   :  { %23 = vsyncpa [#allocation4 + $0x1], 0  ;;  %s6759_s30 = smov 0   ;;  %s6761_s10 = smov 0  }
   0xc   :  { %s6763_s11 = smov 0   ;;  %s6765_s12 = smov 0  }
   0xd LB: > { %s6684_s13 = smov [#allocation5]   ;;  %s6780_s15 = sadd.s32 4294967295, %s6682_s12   ;;  %s6682_s12 = sphi %s6765_s12, %s7356_s12   ;;  %s6678_s11 = sphi %s6763_s11, %s7355_s11   ;;  %s6674_s10 = sphi %s6761_s10, %s7354_s10   ;;  %s6670_s30 = sphi %s6759_s30, %s7353_s30  }
   0xe   : > { %s267_s14 = sshll.u32 %s6684_s13, 4  ;;  %p5048_p0 = scmp.ge.s32.totalorder %s6682_s12, 1  ;;  %s268_s14 = int_to_ptr.vmem [resolvable:$true] %s267_s14 }
   0xf   : > { %p7323_p1 = scmp.eq.s32.totalorder %s6780_s15, 0  ;;  %p254_p2 = scmp.lt.s32.totalorder %s6682_s12, 3 }
  0x10   : > { %s6685_s17 = smov [#allocation8]   ;;  %s6686_s20 = smov [#allocation11]  }
  0x11   : > { %p6785_p3 = pnand %p5048_p0, %p254_p2  ;;  %s293_s18 = sshll.u32 %s6685_s17, 4  ;;  %s6792_s18 = int_to_ptr.vmem [resolvable:$true] %s293_s18 }
  0x12   : > { %s319_s21 = sshll.u32 %s6686_s20, 4  ;;  %s6403_s23 = scalar_lea.vmem %s268_s14, 32  ;;  %s6800_s21 = int_to_ptr.vmem [resolvable:$true] %s319_s21 }
  0x13   : > { %s7330_s16 = scalar_select %p6785_p3, 1, 0 }
  0x14   : > { %p5587_p5 = pneg %p6785_p3  ;;  %p6404_p8 = scmp.ne.s32.totalorder %s268_s14, %s6403_s23 }
  0x15   : > { %p6411_p11 = scmp.lt.s32.totalorder %s268_s14, %s268_s14  ;;  %p6412_p12 = scmp.lt.s32.totalorder %s6403_s23, %s6403_s23 }
  0x16   : > { %p6796_p6 = pnand %p5587_p5, %p7323_p1 }
  0x17   : > { %p6413_p13 = por %p6412_p12, %p6411_p11 }
  0x18   : > { %p6804_p7 = pneg %p6796_p6 }
  0x1a   : > { %p6406_p9 = pnand %p6404_p8, %p6804_p7 }
  0x1c   : > { %p6407_p10 = pneg %p6406_p9 }
  0x1e   : > { %p6414_p0 = pnand %p6413_p13, %p6407_p10 }
  0x20   : > { %6417 = shalt.err (!%p6414_p0)
}
  0x21   : > { %s7333_s1 = sld [smem:[#allocation23_spill]]  ;;  %s6429_s26 = scalar_lea.vmem %s6792_s18, 4096 }
  0x22   : > { %p6430_p2 = scmp.ne.s32.totalorder %s6792_s18, %s6429_s26  ;;  %p6437_p9 = scmp.lt.s32.totalorder %s6792_s18, %s6792_s18 }
  0x23   : > { %p6438_p11 = scmp.lt.s32.totalorder %s6429_s26, %s6429_s26 }
  0x24   : > { %p6432_p5 = pnand %p6430_p2, %p6804_p7 }
  0x25   : > { %p6439_p10 = por %p6438_p11, %p6437_p9 }
  0x26   : > { %p6433_p8 = pneg %p6432_p5 }
  0x27   : > { %5590 = dma.hbm_to_vmem [thread:$0]  (!%p6796_p6), %s7333_s1, 32, %s268_s14, [#allocation6]  }
  0x28   : > { %p6440_p12 = pnand %p6439_p10, %p6433_p8 }
  0x2a   : > { %6443 = shalt.err (!%p6440_p12)
}
  0x2b   : > { %s6687_s27 = smov 128   ;;  %s6688_s28 = smov 8  }
  0x2c   : > { %s7334_s4 = sld [smem:[#allocation25_spill]]  ;;  %s6455_s14 = scalar_lea.vmem %s6800_s21, 12288 }
  0x2d   : > { %p6456_p13 = scmp.ne.s32.totalorder %s6800_s21, %s6455_s14  ;;  %p6463_p5 = scmp.lt.s32.totalorder %s6800_s21, %s6800_s21 }
  0x2e   : > { %p6464_p8 = scmp.lt.s32.totalorder %s6455_s14, %s6455_s14 }
  0x2f   : > { %p6458_p0 = pnand %p6456_p13, %p6804_p7 }
  0x30   : > { %p6465_p9 = por %p6464_p8, %p6463_p5 }
  0x31   : > { %p6459_p2 = pneg %p6458_p0 }
  0x32   : > { %5596 = dma.hbm_to_vmem [thread:$0]  (!%p6796_p6), %s7334_s4, 4096, %s6792_s18, [#allocation9], %s6687_s27, %s6687_s27, %s6688_s28  }
  0x33   : > { %p6466_p11 = pnand %p6465_p9, %p6459_p2 }
  0x35   : > { %6469 = shalt.err (!%p6466_p11)
}
  0x36   : > { %5602 = dma.hbm_to_vmem [thread:$0]  (!%p6796_p6), %s7319_s6, 12288, %s6800_s21, [#allocation12], %s6687_s27, %s6687_s27, %s6688_s28  }
  0x37   : > { %s6689_s18 = smov [#allocation7]  }
  0x38   : > { %s280_s23 = sshll.u32 %s6689_s18, 4  ;;  %s281_s23 = int_to_ptr.vmem [resolvable:$true] %s280_s23 }
  0x39   : > { %s6481_s24 = scalar_lea.vmem %s281_s23, 12288  ;;  %p6489_p0 = scmp.lt.s32.totalorder %s281_s23, %s281_s23 }
  0x3a   : > { %p6482_p10 = scmp.ne.s32.totalorder %s281_s23, %s6481_s24  ;;  %p6490_p2 = scmp.lt.s32.totalorder %s6481_s24, %s6481_s24 }
  0x3c   : > { %p6484_p12 = pnand %p6482_p10, %p6804_p7  ;;  %p6491_p5 = por %p6490_p2, %p6489_p0 }
  0x3e   : > { %p6485_p13 = pneg %p6484_p12 }
  0x40   : > { %p6492_p8 = pnand %p6491_p5, %p6485_p13 }
  0x42   : > { %6495 = shalt.err (!%p6492_p8)
}
  0x43   : > { %s6690_s25 = smov 384   ;;  %s6691_s26 = smov 24  }
  0x44   : > { %s7335_s3 = sld [smem:[#allocation24_spill]]  ;;  %s6692_s13 = smov [#allocation10]  }
  0x45   : > { %s306_s14 = sshll.u32 %s6692_s13, 4  ;;  %s307_s14 = int_to_ptr.vmem [resolvable:$true] %s306_s14 }
  0x46   : > { %s6507_s17 = scalar_lea.vmem %s307_s14, 24576  ;;  %p6515_p12 = scmp.lt.s32.totalorder %s307_s14, %s307_s14 }
  0x47   : > { %p6508_p9 = scmp.ne.s32.totalorder %s307_s14, %s6507_s17  ;;  %p6516_p13 = scmp.lt.s32.totalorder %s6507_s17, %s6507_s17 }
  0x49   : > { %p6510_p11 = pnand %p6508_p9, %p6804_p7  ;;  %p6517_p0 = por %p6516_p13, %p6515_p12 }
  0x4a   : > { %5593 = dma.hbm_to_vmem [thread:$0]  (!%p6796_p6), %s7335_s3, 12288, %s281_s23, [#allocation6], %s6690_s25, %s6690_s25, %s6691_s26  }
  0x4b   : > { %p6511_p10 = pneg %p6510_p11 }
  0x4d   : > { %p6518_p2 = pnand %p6517_p0, %p6511_p10 }
  0x4f   : > { %6521 = shalt.err (!%p6518_p2)
}
  0x50   : > { %s6693_s20 = smov 768   ;;  %s6694_s18 = smov 48  }
  0x51   : > { %5599 = dma.hbm_to_vmem [thread:$0]  (!%p6796_p6), %s7318_s5, 24576, %s307_s14, [#allocation9], %s6693_s20, %s6693_s20, %s6694_s18  }
  0x52   : > { %s6695_s25 = smov [#allocation13]   ;;  %s6696_s29 = smov [#allocation14]  }
  0x53   : > { %s332_s26 = sshll.u32 %s6695_s25, 4  ;;  %s345_s21 = sshll.u32 %s6696_s29, 4  ;;  %s333_s26 = int_to_ptr.vmem [resolvable:$true] %s332_s26  ;;  %s346_s21 = int_to_ptr.vmem [resolvable:$true] %s345_s21 }
  0x54   : > { %s6533_s13 = scalar_lea.vmem %s333_s26, 256  ;;  %p6541_p11 = scmp.lt.s32.totalorder %s333_s26, %s333_s26 }
  0x55   : > { %p6534_p5 = scmp.ne.s32.totalorder %s333_s26, %s6533_s13  ;;  %p6542_p10 = scmp.lt.s32.totalorder %s6533_s13, %s6533_s13 }
  0x57   : > { %p6536_p8 = pnand %p6534_p5, %p6804_p7  ;;  %p6543_p12 = por %p6542_p10, %p6541_p11 }
  0x59   : > { %p6537_p9 = pneg %p6536_p8 }
  0x5b   : > { %p6544_p13 = pnand %p6543_p12, %p6537_p9 }
  0x5d   : > { %6547 = shalt.err (!%p6544_p13)
}
  0x5e   : > { %5605 = dma.hbm_to_vmem [thread:$0]  (!%p6796_p6), %s7320_s7, 256, %s333_s26, [#allocation12], %s6687_s27, %s6687_s27, %s6688_s28  }
  0x5f   : > { %s6559_s20 = scalar_lea.vmem %s346_s21, 256  ;;  %p6567_p8 = scmp.lt.s32.totalorder %s346_s21, %s346_s21 }
  0x60   : > { %p6560_p0 = scmp.ne.s32.totalorder %s346_s21, %s6559_s20  ;;  %p6568_p11 = scmp.lt.s32.totalorder %s6559_s20, %s6559_s20 }
  0x62   : > { %p6562_p2 = pnand %p6560_p0, %p6804_p7  ;;  %p6569_p9 = por %p6568_p11, %p6567_p8 }
  0x64   : > { %p6563_p5 = pneg %p6562_p2 }
  0x66   : > { %p6570_p10 = pnand %p6569_p9, %p6563_p5 }
  0x68   : > { %6573 = shalt.err (!%p6570_p10)
}
  0x69   : > { %5608 = dma.hbm_to_vmem [thread:$0]  (!%p6796_p6), %s7321_s8, 256, %s346_s21, [#allocation15], %s6687_s27, %s6687_s27, %s6688_s28  }
  0x6a   : > { %s5047_s19 = sadd.s32 4294967294, %s6682_s12   ;;  %s6881_s22 = sadd.s32 1, %s6682_s12  }
  0x6b   : > { %s36_s23 = sadd.s32 1, %s6678_s11  ;;  %s33_s25 = ssub.s32 %s6682_s12, %s6881_s22 }
  0x6c   : > { %p43_p7 = scmp.ne.s32.totalorder %s6678_s11, %s6674_s10  ;;  %p34_p12 = scmp.eq.s32.totalorder %s33_s25, 0 }
  0x6d   : > { %p44_p13 = scmp.eq.s32.totalorder %s6682_s12, 0  ;;  %p49_p0 = scmp.ne.s32.totalorder %s6674_s10, %s6670_s30 }
  0x6e   : > { %p241_p2 = scmp.eq.s32.totalorder %s6780_s15, 1  ;;  %p247_p11 = scmp.eq.s32.totalorder %s5047_s19, 1 }
  0x6f   : > { %s6893_s26 = scalar_select %p34_p12, %s6678_s11, %s36_s23  }
  0x70   : > { %p45_p5 = por %p44_p13, %p43_p7  ;;  %p6897_p8 = por %p7323_p1, %p49_p0 }
  0x71   : > { %p6901_p6 = por %p241_p2, %p43_p7  ;;  %p5624_p9 = scmp.lt.s32.totalorder %s6682_s12, 2 }
  0x72   : > { %s7336_s29 = scalar_select %p6897_p8, 1, 0 }
  0x73   : > { %s7337_s27 = scalar_select %p6901_p6, 1, 0 }
  0x74   : > { %s359_s28 = sand.u32 1, %s6678_s11   ;;  %p6907_p10 = por %p247_p11, %p49_p0 }
  0x75   : > { %s5057_s13 = sshll.u32 %s359_s28, 5  ;;  %s5521_s14 = sshll.u32 %s6682_s12, 9 }
  0x76   : > { %s7338_s21 = scalar_select %p6907_p10, 1, 0 }
  0x77   : > { %s6915_s18 = scalar_lea.hbm %s7313_s0, %s5521_s14  ;;  %s363_s24 = scalar_lea.vmem [#allocation2], %s5057_s13 }
  0x78   : > { %s370_s23 = sshll.u32 %s363_s24, 4  ;;  %p6917_p7 = pnand %p5624_p9, %p45_p5  ;;  %s6921_s23 = int_to_ptr.vmem [resolvable:$true] %s370_s23 }
  0x79   : > { %s6923_s25 = scalar_lea.sflag [#allocation3], %s359_s28  ;;  %s6574_s1 = scalar_lea.hbm %s6915_s18, 512 }
  0x7a   : > { %p6575_p12 = scmp.ne.s32.totalorder %s6915_s18, %s6574_s1  ;;  %p6576_p13 = pneg %p6917_p7 }
  0x7b   : > { %s6579_s13 = scalar_lea.hbm %s7313_s0, 1024  ;;  %p6580_p5 = scmp.lt.s32.totalorder %s6915_s18, %s7313_s0 }
  0x7c   : > { %p6577_p0 = pnand %p6576_p13, %p6575_p12  ;;  %p6581_p11 = scmp.lt.s32.totalorder %s6579_s13, %s6574_s1 }
  0x7e   : > { %p6578_p2 = pneg %p6577_p0  ;;  %p6582_p9 = por %p6581_p11, %p6580_p5 }
  0x80   : > { %p6583_p4 = pnand %p6582_p9, %p6578_p2 }
  0x82   : > { %6586 = shalt.err (!%p6583_p4)
}
  0x83   : > { %s6587_s28 = scalar_lea.vmem %s6921_s23, 512  ;;  %s6697_s3 = smov [#allocation2]  }
  0x84   : > { %p6588_p1 = scmp.ne.s32.totalorder %s6921_s23, %s6587_s28  ;;  %s6592_s4 = sshll.u32 %s6697_s3, 4  ;;  %s6593_s4 = int_to_ptr.vmem [resolvable:$false] %s6592_s4 }
  0x85   : > { %s6594_s14 = scalar_lea.vmem %s6593_s4, 1024  ;;  %p6595_p0 = scmp.lt.s32.totalorder %s6921_s23, %s6593_s4 }
  0x86   : > { %p6590_p10 = pnand %p6588_p1, %p6576_p13  ;;  %p6596_p6 = scmp.lt.s32.totalorder %s6594_s14, %s6587_s28 }
  0x88   : > { %p6591_p12 = pneg %p6590_p10  ;;  %p6597_p8 = por %p6596_p6, %p6595_p0 }
  0x8a   : > { %p6598_p3 = pnand %p6597_p8, %p6591_p12 }
  0x8c   : > { %6601 = shalt.err (!%p6598_p3)
}
  0x8d   : > { %s6698_s1 = smov 256   ;;  %s6699_s17 = smov 16  }
  0x8e   : > { %5612 = dma.hbm_to_vmem [thread:$0]  (!%p6917_p7), %s6915_s18, 512, %s6921_s23, %s6923_s25, %s6698_s1, %s6698_s1, %s6699_s17  }
  0x8f   : > { %p7340_p1 = scmp.ne.s32.totalorder %s7330_s16, 0 }
  0x90   : > { %s6947_s3 = sand.u32 (!%p7340_p1), 1, %s6674_s10   ;;  %p7341_p3 = scmp.ne.s32.totalorder (!%p7340_p1), %s7336_s29, 0 }
  0x91   : > { %382 = sbr.rel (%p7340_p1) target bundleno = 2360 (0x938), region = 56  ;;  %s5061_s4 = sshll.u32 (!%p7340_p1), %s6947_s3, 5 }
  0x92   : > { %s385_s13 = scalar_lea.sflag (!%p7340_p1), [#allocation3], %s6947_s3  ;;  %s6953_s20 = scalar_lea.vmem (!%p7340_p1), [#allocation2], %s5061_s4 }
  0x96   : > { %6645 = dma.done.wait (%p7341_p3), %s385_s13, 512  }
  0x97   : > { %6647 = vsyncadd (%p7341_p3), %s385_s13, 4294966784  ;;  %p7342_p4 = scmp.eq.s32.totalorder %s6780_s15, 0 }
  0x99   : > { %6649 = dma.done.wait (%p7342_p4), [#allocation6], 12320   ;;  %p7343_p8 = pmov %p7342_p4 }
  0x9a   : > { %p7344_p6 = pmov %p7342_p4 }
  0x9b   : > { %6651 = vsyncadd (%p7343_p8), [#allocation6], 4294954976 }
  0x9c   : > { %6653 = dma.done.wait (%p7344_p6), [#allocation9], 28672   ;;  %p7345_p10 = pmov %p7342_p4 }
  0x9d   : > { %p7346_p7 = pmov %p7342_p4 }
  0x9e   : > { %6655 = vsyncadd (%p7345_p10), [#allocation9], 4294938624 }
  0x9f   : > { %6657 = dma.done.wait (%p7346_p7), [#allocation12], 12544   ;;  %p7347_p13 = pmov %p7342_p4 }
  0xa0   : > { %p7348_p2 = pmov %p7342_p4 }
  0xa1   : > { %6659 = vsyncadd (%p7347_p13), [#allocation12], 4294954752 }
  0xa2   : > { %6661 = dma.done.wait (%p7348_p2), [#allocation15], 256   ;;  %p7349_p5 = pmov %p7348_p2 }
  0xa3   : > { %v452_v0 = vld [vmem:[%s6953_s20] sm:$0xff]  ;;  %v453_v1 = vld [vmem:[%s6953_s20 + $0x8] sm:$0xff]  ;;  %v454_v2 = vld [vmem:[%s6953_s20 + $0x10] sm:$0xff]  ;;  %s6703_s16 = smov 64   ;;  %vm6704_vm0 = vmmov 0   ;;  %vm2028_vm1 = vcmask 130048  }
  0xa4   : > { %6663 = vsyncadd (%p7349_p5), [#allocation15], 4294967040  ;;  %v456_v3 = vmul.f32 %v452_v0, %v452_v0  ;;  %v457_v4 = vmul.f32 %v453_v1, %v453_v1  ;;  %v455_v5 = vld [vmem:[%s6953_s20 + $0x18] sm:$0xff]  ;;  %v458_v6 = vmul.f32 %v454_v2, %v454_v2  ;;  %v5690_v9 = vld [vmem:[#allocation7 + $0x150] ss:$24 sps:$4 sm:$0xff]   ;;  %s450_s23 = scalar_lea.vmem [#allocation16], %s5061_s4 }
  0xa5   : > { %v459_v7 = vmul.f32 %v455_v5, %v455_v5  ;;  %v5688_v8 = vld [vmem:[#allocation7 + $0x154] ss:$24 sps:$4 sm:$0xff]   ;;  %v5693_v12 = vld [vmem:[#allocation7 + $0x158] ss:$24 sps:$4 sm:$0xff]   ;;  %v5694_v13 = vld [vmem:[#allocation7 + $0x124] ss:$24 sps:$4 sm:$0xff]  }
  0xa6   : > { %v460_v10 = vadd.f32 %v457_v4, %v456_v3  ;;  %v5691_v11 = vld [vmem:[#allocation7 + $0x15c] ss:$24 sps:$4 sm:$0xff]   ;;  %1071 = vmatprep.subr.bf16.mxu0 %v5688_v8  ;;  %v5696_v15 = vld [vmem:[#allocation7 + $0x120] ss:$24 sps:$4 sm:$0xff]   ;;  %v5697_v16 = vld [vmem:[#allocation7 + $0x12c] ss:$24 sps:$4 sm:$0xff]  }
  0xa7   : > { %v463_v14 = vadd.f32 %v459_v7, %v458_v6  ;;  %1072 = vmatpush1.bf16.msra.mxu0 %v5690_v9  ;;  %1114 = vmatprep.subr.bf16.mxu1 %v5691_v11  ;;  %v5699_v17 = vld [vmem:[#allocation7 + $0x128] ss:$24 sps:$4 sm:$0xff]   ;;  %v5700_v18 = vld [vmem:[#allocation7 + $0xf4] ss:$24 sps:$4 sm:$0xff]   ;;  %v5706_v21 = vld [vmem:[#allocation7 + $0xc4] ss:$24 sps:$4 sm:$0xff]  }
  0xa8   : > { %461 = vadd.xlane.f32.xlu0 %v460_v10  ;;  %1073 = vmatprep.subr.bf16.mxu0 %v5694_v13  ;;  %v5703_v19 = vld [vmem:[#allocation7 + $0xfc] ss:$24 sps:$4 sm:$0xff]   ;;  %v5702_v20 = vld [vmem:[#allocation7 + $0xf0] ss:$24 sps:$4 sm:$0xff]   ;;  %v5709_v23 = vld [vmem:[#allocation7 + $0xcc] ss:$24 sps:$4 sm:$0xff]  }
  0xa9   : > { %1115 = vmatpush1.bf16.msra.mxu1 %v5693_v12  ;;  %v5705_v22 = vld [vmem:[#allocation7 + $0xf8] ss:$24 sps:$4 sm:$0xff]   ;;  %v5712_v25 = vld [vmem:[#allocation7 + $0x94] ss:$24 sps:$4 sm:$0xff]   ;;  %v5711_v26 = vld [vmem:[#allocation7 + $0xc8] ss:$24 sps:$4 sm:$0xff]  }
  0xaa   : > { %1116 = vmatprep.subr.bf16.mxu1 %v5697_v16  ;;  %v5708_v24 = vld [vmem:[#allocation7 + $0xc0] ss:$24 sps:$4 sm:$0xff]   ;;  %v5715_v27 = vld [vmem:[#allocation7 + $0x9c] ss:$24 sps:$4 sm:$0xff]   ;;  %v5714_v28 = vld [vmem:[#allocation7 + $0x90] ss:$24 sps:$4 sm:$0xff]  }
  0xab   : > { %1074 = vmatpush1.bf16.msra.mxu0 %v5696_v15  ;;  %v5718_v29 = vld [vmem:[#allocation7 + $0x64] ss:$24 sps:$4 sm:$0xff]   ;;  %v5717_v30 = vld [vmem:[#allocation7 + $0x98] ss:$24 sps:$4 sm:$0xff]   ;;  %v5724_v33 = vld [vmem:[#allocation7 + $0x34] ss:$24 sps:$4 sm:$0xff]  }
  0xac   : > { %464 = vadd.xlane.f32.xlu0 %v463_v14  ;;  %1075 = vmatprep.subr.bf16.mxu0 %v5700_v18  ;;  %v5721_v31 = vld [vmem:[#allocation7 + $0x6c] ss:$24 sps:$4 sm:$0xff]   ;;  %v5720_v32 = vld [vmem:[#allocation7 + $0x60] ss:$24 sps:$4 sm:$0xff]   ;;  %v5727_v35 = vld [vmem:[#allocation7 + $0x3c] ss:$24 sps:$4 sm:$0xff]  }
  0xad   : > { %1117 = vmatpush1.bf16.msra.mxu1 %v5699_v17  ;;  %v5723_v34 = vld [vmem:[#allocation7 + $0x68] ss:$24 sps:$4 sm:$0xff]   ;;  %v5730_v37 = vld [vmem:[#allocation7 + $0x4] ss:$24 sps:$4 sm:$0xff]   ;;  %v5729_v38 = vld [vmem:[#allocation7 + $0x38] ss:$24 sps:$4 sm:$0xff]   ;;  %v479_v17 = vlaneseq }
  0xae   : > { %1118 = vmatprep.subr.bf16.mxu1 %v5703_v19  ;;  %v5726_v36 = vld [vmem:[#allocation7 + $0x30] ss:$24 sps:$4 sm:$0xff]   ;;  %v5733_v39 = vld [vmem:[#allocation7 + $0xc] ss:$24 sps:$4 sm:$0xff]   ;;  %v5732_v40 = vld [vmem:[#allocation7] ss:$24 sps:$4 sm:$0xff]  }
  0xaf   : > { %1076 = vmatpush1.bf16.msra.mxu0 %v5702_v20  ;;  %v5736_v41 = vld [vmem:[#allocation7 + $0x2d4] ss:$24 sps:$4 sm:$0xff]   ;;  %v5735_v42 = vld [vmem:[#allocation7 + $0x8] ss:$24 sps:$4 sm:$0xff]   ;;  %v5742_v45 = vld [vmem:[#allocation7 + $0x2a4] ss:$24 sps:$4 sm:$0xff]  }
  0xb0   : > { %1077 = vmatprep.subr.bf16.mxu0 %v5706_v21  ;;  %v5739_v43 = vld [vmem:[#allocation7 + $0x2dc] ss:$24 sps:$4 sm:$0xff]   ;;  %v5738_v44 = vld [vmem:[#allocation7 + $0x2d0] ss:$24 sps:$4 sm:$0xff]   ;;  %v5745_v47 = vld [vmem:[#allocation7 + $0x2ac] ss:$24 sps:$4 sm:$0xff]  }
  0xb1   : > { %1119 = vmatpush1.bf16.msra.mxu1 %v5705_v22  ;;  %v5741_v46 = vld [vmem:[#allocation7 + $0x2d8] ss:$24 sps:$4 sm:$0xff]   ;;  %v5748_v49 = vld [vmem:[#allocation7 + $0x274] ss:$24 sps:$4 sm:$0xff]   ;;  %v5747_v50 = vld [vmem:[#allocation7 + $0x2a8] ss:$24 sps:$4 sm:$0xff]  }
  0xb2   : > { %1120 = vmatprep.subr.bf16.mxu1 %v5709_v23  ;;  %v5744_v48 = vld [vmem:[#allocation7 + $0x2a0] ss:$24 sps:$4 sm:$0xff]   ;;  %v5751_v51 = vld [vmem:[#allocation7 + $0x27c] ss:$24 sps:$4 sm:$0xff]   ;;  %v5750_v52 = vld [vmem:[#allocation7 + $0x270] ss:$24 sps:$4 sm:$0xff]  }
  0xb3   : > { %1078 = vmatpush1.bf16.msra.mxu0 %v5708_v24  ;;  %v5754_v53 = vld [vmem:[#allocation7 + $0x244] ss:$24 sps:$4 sm:$0xff]   ;;  %v5753_v54 = vld [vmem:[#allocation7 + $0x278] ss:$24 sps:$4 sm:$0xff]   ;;  %v5759_v57 = vld [vmem:[#allocation7 + $0x248] ss:$24 sps:$4 sm:$0xff]  }
  0xb4   : > { %1079 = vmatprep.subr.bf16.mxu0 %v5712_v25  ;;  %v5757_v55 = vld [vmem:[#allocation7 + $0x24c] ss:$24 sps:$4 sm:$0xff]   ;;  %v5756_v56 = vld [vmem:[#allocation7 + $0x240] ss:$24 sps:$4 sm:$0xff]   ;;  %v5762_v59 = vld [vmem:[#allocation7 + $0x210] ss:$24 sps:$4 sm:$0xff]  }
  0xb5   : > { %1121 = vmatpush1.bf16.msra.mxu1 %v5711_v26  ;;  %v5760_v58 = vld [vmem:[#allocation7 + $0x214] ss:$24 sps:$4 sm:$0xff]   ;;  %v5765_v61 = vld [vmem:[#allocation7 + $0x218] ss:$24 sps:$4 sm:$0xff]   ;;  %v5766_v62 = vld [vmem:[#allocation7 + $0x1e4] ss:$24 sps:$4 sm:$0xff]  }
  0xb6   : > { %1122 = vmatprep.subr.bf16.mxu1 %v5715_v27  ;;  %v5763_v60 = vld [vmem:[#allocation7 + $0x21c] ss:$24 sps:$4 sm:$0xff]   ;;  %v5769_v63 = vld [vmem:[#allocation7 + $0x1ec] ss:$24 sps:$4 sm:$0xff]   ;;  %v5768_v0 = vld [vmem:[#allocation7 + $0x1e0] ss:$24 sps:$4 sm:$0xff]  }
  0xb7   : > { %1080 = vmatpush1.bf16.msra.mxu0 %v5714_v28  ;;  %v5771_v1 = vld [vmem:[#allocation7 + $0x1e8] ss:$24 sps:$4 sm:$0xff]   ;;  %v5772_v2 = vld [vmem:[#allocation7 + $0x1b4] ss:$24 sps:$4 sm:$0xff]   ;;  %v5777_v5 = vld [vmem:[#allocation7 + $0x1b8] ss:$24 sps:$4 sm:$0xff]  }
  0xb8   : > { %1081 = vmatprep.subr.bf16.mxu0 %v5718_v29  ;;  %v5775_v3 = vld [vmem:[#allocation7 + $0x1bc] ss:$24 sps:$4 sm:$0xff]   ;;  %v5774_v4 = vld [vmem:[#allocation7 + $0x1b0] ss:$24 sps:$4 sm:$0xff]   ;;  %v5781_v7 = vld [vmem:[#allocation7 + $0x18c] ss:$24 sps:$4 sm:$0xff]  }
  0xb9   : > { %1123 = vmatpush1.bf16.msra.mxu1 %v5717_v30  ;;  %v5778_v6 = vld [vmem:[#allocation7 + $0x184] ss:$24 sps:$4 sm:$0xff]   ;;  %v5780_v8 = vld [vmem:[#allocation7 + $0x180] ss:$24 sps:$4 sm:$0xff]   ;;  %v6979_v18 = vshrl.u32 %v479_v17, 7  ;;  %s4907_s19 = sshll.u32 %s450_s23, 4  ;;  %s7263_s19 = int_to_ptr.vmem [resolvable:$true] %s4907_s19 }
  0xba   : > { %1124 = vmatprep.subr.bf16.mxu1 %v5721_v31  ;;  %v5783_v9 = vld [vmem:[#allocation7 + $0x188] ss:$24 sps:$4 sm:$0xff]   ;;  %v5786_v10 = vld [vmem:[#allocation7 + $0x164] ss:$24 sps:$4 sm:$0xff]   ;;  %s5522_s25 = sshll.u32 %s6780_s15, 9  ;;  %s4894_s1 = scalar_lea.sflag [#allocation4], %s6947_s3 }
  0xbb   : > { %1082 = vmatpush1.bf16.msra.mxu0 %v5720_v32  ;;  %v477_v19 = vld [vmem:[#allocation5] sm:$0x3]  ;;  %v485_v20 = vsub.s32 1, %v6979_v18  ;;  %v481_v21 = vsub.s32 0, %v6979_v18  ;;  %v6384_v23 = vld [vmem:[%s6953_s20 + $0x8] sm:$0xff]  ;;  %v6386_v30 = vld [vmem:[%s6953_s20 + $0x18] sm:$0xff]  ;;  %s7269_s14 = scalar_lea.hbm %s7322_s9, %s5522_s25 }
  0xbc   : > { %1083 = vmatprep.subr.bf16.mxu0 %v5724_v33  ;;  %v6385_v26 = vld [vmem:[%s6953_s20] sm:$0xff]  ;;  %v6387_v32 = vld [vmem:[%s6953_s20 + $0x10] sm:$0xff]  ;;  %s6602_s15 = scalar_lea.vmem %s7263_s19, 512  ;;  %p7350_p9 = scmp.ne.s32.totalorder %s7337_s27, 0 }
  0xbd   : > { %1125 = vmatpush1.bf16.msra.mxu1 %v5723_v34  ;;  %v486_v25 = vrot.slane %v477_v19, %v485_v20  ;;  %v482_v28 = vrot.slane %v477_v19, %v481_v21  ;;  %p6603_p11 = scmp.ne.s32.totalorder %s7263_s19, %s6602_s15  ;;  %s6706_s17 = smov [#allocation16]  }
  0xbe   : > { %1126 = vmatprep.subr.bf16.mxu1 %v5727_v35  ;;  %s6606_s4 = sshll.u32 %s6706_s17, 4  ;;  %s6607_s4 = int_to_ptr.vmem [resolvable:$false] %s6606_s4 }
  0xbf   : > { %1084 = vmatpush1.bf16.msra.mxu0 %v5726_v36  ;;  %v5784_v36 = vld [vmem:[#allocation7 + $0x160] ss:$24 sps:$4 sm:$0xff]   ;;  %p6604_p12 = pnand %p6603_p11, %p7350_p9  ;;  %s6608_s13 = scalar_lea.vmem %s6607_s4, 1024 }
  0xc0   : > { %1085 = vmatprep.subr.bf16.mxu0 %v5730_v37  ;;  %p6609_p1 = scmp.lt.s32.totalorder %s7263_s19, %s6607_s4  ;;  %p6610_p3 = scmp.lt.s32.totalorder %s6608_s13, %s6602_s15 }
  0xc1   : > { %1127 = vmatpush1.bf16.msra.mxu1 %v5729_v38  ;;  %p6605_p0 = pneg %p6604_p12 }
  0xc2   : > { %1128 = vmatprep.subr.bf16.mxu1 %v5733_v39  ;;  %v5789_v39 = vld [vmem:[#allocation7 + $0x134] ss:$24 sps:$4 sm:$0xff]   ;;  %p6611_p4 = por %p6610_p3, %p6609_p1 }
  0xc3   : > { %1086 = vmatpush1.bf16.msra.mxu0 %v5732_v40 }
  0xc4   : > { %1087 = vmatprep.subr.bf16.mxu0 %v5736_v41  ;;  %p6612_p8 = pnand %p6611_p4, %p6605_p0 }
  0xc5   : > { %1129 = vmatpush1.bf16.msra.mxu1 %v5735_v42  ;;  %v5787_v42 = vld [vmem:[#allocation7 + $0x130] ss:$24 sps:$4 sm:$0xff]  }
  0xc6   : > { %1130 = vmatprep.subr.bf16.mxu1 %v5739_v43  ;;  %v5792_v43 = vld [vmem:[#allocation7 + $0x104] ss:$24 sps:$4 sm:$0xff]  }
  0xc7   : > { %1088 = vmatpush2.bf16.msra.mxu0 %v5738_v44  ;;  %v5790_v44 = vld [vmem:[#allocation7 + $0x100] ss:$24 sps:$4 sm:$0xff]  }
  0xc8   : > { %1089 = vmatprep.subr.bf16.mxu0 %v5742_v45  ;;  %v5795_v45 = vld [vmem:[#allocation7 + $0xd4] ss:$24 sps:$4 sm:$0xff]  }
  0xc9   : > { %1131 = vmatpush2.bf16.msra.mxu1 %v5741_v46  ;;  %v5793_v46 = vld [vmem:[#allocation7 + $0xd0] ss:$24 sps:$4 sm:$0xff]  }
  0xca   : > { %1132 = vmatprep.subr.bf16.mxu1 %v5745_v47  ;;  %v5798_v47 = vld [vmem:[#allocation7 + $0xa4] ss:$24 sps:$4 sm:$0xff]  }
  0xcb   : > { %1090 = vmatpush2.bf16.msra.mxu0 %v5744_v48  ;;  %v5796_v48 = vld [vmem:[#allocation7 + $0xa0] ss:$24 sps:$4 sm:$0xff]  }
  0xcc   : > { %1091 = vmatprep.subr.bf16.mxu0 %v5748_v49  ;;  %v5801_v49 = vld [vmem:[#allocation7 + $0x74] ss:$24 sps:$4 sm:$0xff]  }
  0xcd   : > { %1133 = vmatpush2.bf16.msra.mxu1 %v5747_v50  ;;  %v5799_v50 = vld [vmem:[#allocation7 + $0x70] ss:$24 sps:$4 sm:$0xff]  }
  0xce   : > { %1134 = vmatprep.subr.bf16.mxu1 %v5751_v51  ;;  %v5804_v51 = vld [vmem:[#allocation7 + $0x44] ss:$24 sps:$4 sm:$0xff]  }
  0xcf   : > { %1092 = vmatpush2.bf16.msra.mxu0 %v5750_v52  ;;  %v5802_v52 = vld [vmem:[#allocation7 + $0x40] ss:$24 sps:$4 sm:$0xff]  }
  0xd0   : > { %1093 = vmatprep.subr.bf16.mxu0 %v5754_v53  ;;  %v5807_v53 = vld [vmem:[#allocation7 + $0x14] ss:$24 sps:$4 sm:$0xff]  }
  0xd1   : > { %1135 = vmatpush2.bf16.msra.mxu1 %v5753_v54  ;;  %v5805_v54 = vld [vmem:[#allocation7 + $0x10] ss:$24 sps:$4 sm:$0xff]  }
  0xd2   : > { %1136 = vmatprep.subr.bf16.mxu1 %v5757_v55  ;;  %v5810_v55 = vld [vmem:[#allocation7 + $0x2e4] ss:$24 sps:$4 sm:$0xff]  }
  0xd3   : > { %1094 = vmatpush2.bf16.msra.mxu0 %v5756_v56  ;;  %v5808_v56 = vld [vmem:[#allocation7 + $0x2e0] ss:$24 sps:$4 sm:$0xff]  }
  0xd4   : > { %1095 = vmatprep.subr.bf16.mxu0 %v5760_v58  ;;  %v5811_v58 = vld [vmem:[#allocation7 + $0x2b0] ss:$24 sps:$4 sm:$0xff]  }
  0xd5   : > { %1137 = vmatpush2.bf16.msra.mxu1 %v5759_v57  ;;  %v5813_v57 = vld [vmem:[#allocation7 + $0x2b4] ss:$24 sps:$4 sm:$0xff]  }
  0xd6   : > { %1138 = vmatprep.subr.bf16.mxu1 %v5763_v60  ;;  %v5814_v60 = vld [vmem:[#allocation7 + $0x280] ss:$24 sps:$4 sm:$0xff]  }
  0xd7   : > { %1096 = vmatpush2.bf16.msra.mxu0 %v5762_v59  ;;  %v5816_v59 = vld [vmem:[#allocation7 + $0x284] ss:$24 sps:$4 sm:$0xff]  }
  0xd8   : > { %1097 = vmatprep.subr.bf16.mxu0 %v5766_v62  ;;  %v5817_v62 = vld [vmem:[#allocation7 + $0x250] ss:$24 sps:$4 sm:$0xff]  }
  0xd9   : > { %1139 = vmatpush2.bf16.msra.mxu1 %v5765_v61  ;;  %v5819_v61 = vld [vmem:[#allocation7 + $0x254] ss:$24 sps:$4 sm:$0xff]  }
  0xda   : > { %1140 = vmatprep.subr.bf16.mxu1 %v5769_v63  ;;  %v5822_v63 = vld [vmem:[#allocation7 + $0x224] ss:$24 sps:$4 sm:$0xff]  }
  0xdb   : > { %1098 = vmatpush2.bf16.msra.mxu0 %v5768_v0  ;;  %v5820_v0 = vld [vmem:[#allocation7 + $0x220] ss:$24 sps:$4 sm:$0xff]  }
  0xdc   : > { %1099 = vmatprep.subr.bf16.mxu0 %v5772_v2  ;;  %v5823_v2 = vld [vmem:[#allocation7 + $0x1f0] ss:$24 sps:$4 sm:$0xff]  }
  0xdd   : > { %1141 = vmatpush2.bf16.msra.mxu1 %v5771_v1  ;;  %v5825_v1 = vld [vmem:[#allocation7 + $0x1f4] ss:$24 sps:$4 sm:$0xff]  }
  0xde   : > { %1142 = vmatprep.subr.bf16.mxu1 %v5775_v3  ;;  %v5828_v3 = vld [vmem:[#allocation7 + $0x1c4] ss:$24 sps:$4 sm:$0xff]  }
  0xdf   : > { %1100 = vmatpush2.bf16.msra.mxu0 %v5774_v4  ;;  %v5826_v4 = vld [vmem:[#allocation7 + $0x1c0] ss:$24 sps:$4 sm:$0xff]  }
  0xe0   : > { %1101 = vmatprep.subr.bf16.mxu0 %v5778_v6  ;;  %v5829_v6 = vld [vmem:[#allocation7 + $0x190] ss:$24 sps:$4 sm:$0xff]  }
  0xe1   : > { %1143 = vmatpush2.bf16.msra.mxu1 %v5777_v5  ;;  %v5831_v5 = vld [vmem:[#allocation7 + $0x194] ss:$24 sps:$4 sm:$0xff]  }
  0xe2   : > { %1144 = vmatprep.subr.bf16.mxu1 %v5781_v7  ;;  %v6700_v7 = vmov 0.0  }
  0xe3   : > { %1102 = vmatpush2.bf16.msra.mxu0 %v5780_v8  ;;  %v6701_v8 = vmov 1983009808  }
  0xe4   : > { %1157 = vmatprep.subr.bf16.mxu0 %v5786_v10 }
  0xe5   : > { %1145 = vmatpush2.bf16.msra.mxu1 %v5783_v9  ;;  %v1202_v9 = vunpack.c.l.s4 %v6701_v8 }
  0xe6   : > { %5531 = vmatprep.subr.bf16.mxu1 %v6700_v7 }
  0xe7   : > { %v1203_v10 = vunpack.c.0.s8 %v1202_v9 }
 0x131   : > { %v462_v11 = vpop.xlane.xlu0 %461 }
 0x132   : > { %v467_v12 = vmul.f32 0.00390625, %v462_v11  ;;  %v6702_v11 = vmov 1934713408  }
 0x134   : > { %v469_v13 = vadd.f32 1e-05, %v467_v12  ;;  %v1233_v12 = vunpack.c.l.s4 %v6702_v11 }
 0x135   : > { %v465_v14 = vpop.xlane.xlu0 %464 }
 0x136   : > { %6312 = vrsqrt.f32 %v469_v13  ;;  %v468_v15 = vmul.f32 0.00390625, %v465_v14  ;;  %v6998_v13 = vsub.s32 %v1203_v10, %v6979_v18  ;;  %v1234_v14 = vunpack.c.0.s8 %v1233_v12 }
 0x138   : > { %v470_v16 = vadd.f32 1e-05, %v468_v15 }
 0x13a   : > { %6314 = vrsqrt.f32 %v470_v16 }
 0x143   : > { %v6313_v22 = vpop.eup %6312 }
 0x144   : > { %v474_v24 = vmul.f32 %v6384_v23, %v6313_v22  ;;  %v473_v27 = vmul.f32 %v6385_v26, %v6313_v22 }
 0x146   : > { %v490_v34 = vmul.f32 %v486_v25, %v474_v24  ;;  %v489_v37 = vmul.f32 %v482_v28, %v473_v27  ;;  %v7003_v24 = vsub.s32 %v1234_v14, %v6979_v18  ;;  %v5984_v18 = vld [vmem:[#allocation10 + $0x254] ss:$48 sps:$4 sm:$0xff]  }
 0x147   : > { %v6315_v29 = vpop.eup %6314 }
 0x148   : > { %v476_v31 = vmul.f32 %v6386_v30, %v6315_v29  ;;  %v475_v33 = vmul.f32 %v6387_v32, %v6315_v29 }
 0x14a   : > { %v492_v35 = vmul.f32 %v486_v25, %v476_v31  ;;  %v491_v38 = vmul.f32 %v482_v28, %v475_v33 }
 0x14c   : > { %v494_v40 = vpack.c.bf16 %v492_v35, %v490_v34  ;;  %v6991_v41 = vpack.c.bf16 %v491_v38, %v489_v37 }
 0x14e   : > { %1103 = vmatprep.mubr.bf16.mxu0 %v494_v40  ;;  %1146 = vmatprep.mubr.bf16.mxu1 %v494_v40 }
 0x14f   : > { %1104 = vmatmul.mubr.bf16.vlgmr.msra.gmra.mxu0 %v6991_v41  ;;  %1147 = vmatmul.mubr.bf16.vlgmr.msra.gmra.mxu1 %v6991_v41 }
 0x150   : > { %1158 = vmatpush1.bf16.msra.mxu0 %v5784_v36  ;;  %1189 = vmatprep.mubr.bf16.mxu0 %v494_v40 }
 0x151   : > { %1159 = vmatprep.subr.bf16.mxu0 %v5789_v39  ;;  %5533 = vmatprep.mubr.msk.bf16.mxu1 %vm6704_vm0, %v6700_v7 }
 0x154   : > { %1160 = vmatpush1.bf16.msra.mxu0 %v5787_v42 }
 0x155   : > { %1161 = vmatprep.subr.bf16.mxu0 %v5792_v43 }
 0x158   : > { %1162 = vmatpush1.bf16.msra.mxu0 %v5790_v44 }
 0x159   : > { %1163 = vmatprep.subr.bf16.mxu0 %v5795_v45 }
 0x15c   : > { %1164 = vmatpush1.bf16.msra.mxu0 %v5793_v46 }
 0x15d   : > { %1165 = vmatprep.subr.bf16.mxu0 %v5798_v47 }
 0x160   : > { %1166 = vmatpush1.bf16.msra.mxu0 %v5796_v48 }
 0x161   : > { %1167 = vmatprep.subr.bf16.mxu0 %v5801_v49 }
 0x164   : > { %1168 = vmatpush1.bf16.msra.mxu0 %v5799_v50 }
 0x165   : > { %1169 = vmatprep.subr.bf16.mxu0 %v5804_v51 }
 0x168   : > { %1170 = vmatpush1.bf16.msra.mxu0 %v5802_v52 }
 0x169   : > { %1171 = vmatprep.subr.bf16.mxu0 %v5807_v53 }
 0x16c   : > { %1172 = vmatpush1.bf16.msra.mxu0 %v5805_v54 }
 0x16d   : > { %1173 = vmatprep.subr.bf16.mxu0 %v5810_v55 }
 0x170   : > { %1174 = vmatpush2.bf16.msra.mxu0 %v5808_v56 }
 0x171   : > { %1175 = vmatprep.subr.bf16.mxu0 %v5813_v57 }
 0x174   : > { %1176 = vmatpush2.bf16.msra.mxu0 %v5811_v58 }
 0x175   : > { %1177 = vmatprep.subr.bf16.mxu0 %v5816_v59 }
 0x178   : > { %1178 = vmatpush2.bf16.msra.mxu0 %v5814_v60 }
 0x179   : > { %1179 = vmatprep.subr.bf16.mxu0 %v5819_v61 }
 0x17c   : > { %1180 = vmatpush2.bf16.msra.mxu0 %v5817_v62 }
 0x17d   : > { %1181 = vmatprep.subr.bf16.mxu0 %v5822_v63 }
 0x180   : > { %1182 = vmatpush2.bf16.msra.mxu0 %v5820_v0 }
 0x181   : > { %1183 = vmatprep.subr.bf16.mxu0 %v5825_v1 }
 0x184   : > { %1184 = vmatpush2.bf16.msra.mxu0 %v5823_v2 }
 0x185   : > { %1185 = vmatprep.subr.bf16.mxu0 %v5828_v3 }
 0x188   : > { %1186 = vmatpush2.bf16.msra.mxu0 %v5826_v4 }
 0x189   : > { %1187 = vmatprep.subr.bf16.mxu0 %v5831_v5 }
 0x18c   : > { %1188 = vmatpush2.bf16.msra.mxu0 %v5829_v6 }
 0x18f   : > { %1190 = vmatmul.mubr.bf16.vlgmr.msra.gmra.mxu0 %v6991_v41 }
 0x20f   : > { %v1105_v15 = vpop.f32.mrf.mxu0  ;;  %v1148_v16 = vpop.f32.mrf.mxu1 }
 0x210   : > { %v1200_v17 = vcombine.high %v1105_v15, %v6700_v7  ;;  %v1432_v19 = vcombine.high %v1148_v16, %v6700_v7  ;;  %v1207_v25 = vrot.slane %v1105_v15, %v6998_v13  ;;  %v1439_v29 = vrot.slane %v1148_v16, %v6998_v13 }
 0x211   : > { %v1107_v22 = vpop.f32.mrf.mxu0  ;;  %v1150_v23 = vpop.f32.mrf.mxu1 }
 0x212   : > { %v1215_v26 = vcombine.high %v1107_v22, %v6700_v7  ;;  %v1222_v27 = vrot.slane %v1107_v22, %v6998_v13  ;;  %v1214_v28 = vrot.slane %v1200_v17, %v6998_v13  ;;  %v1447_v30 = vcombine.high %v1150_v23, %v6700_v7 }
 0x213   : > { %v1454_v31 = vrot.slane %v1150_v23, %v6998_v13  ;;  %v1109_v32 = vpop.f32.mrf.mxu0  ;;  %v1446_v33 = vrot.slane %v1432_v19, %v6998_v13  ;;  %v1152_v41 = vpop.f32.mrf.mxu1 }
 0x214   : > { %v1229_v34 = vrot.slane %v1215_v26, %v6998_v13  ;;  %v1230_v35 = vcombine.low %v1207_v25, %v1222_v27  ;;  %v1231_v36 = vcombine.high %v1207_v25, %v1222_v27  ;;  %v1461_v37 = vrot.slane %v1447_v30, %v6998_v13 }
 0x215   : > { %v1462_v38 = vcombine.low %v1439_v29, %v1454_v31  ;;  %v1463_v39 = vcombine.high %v1439_v29, %v1454_v31  ;;  %v1266_v40 = vcombine.high %v1109_v32, %v6700_v7  ;;  %v1111_v52 = vpop.f32.mrf.mxu0  ;;  %v1154_v56 = vpop.f32.mrf.mxu1  ;;  %v1273_v60 = vrot.slane %v1109_v32, %v6998_v13 }
 0x216   : > { %v1238_v42 = vrot.slane %v1230_v35, %v7003_v24  ;;  %v1245_v43 = vrot.slane %v1231_v36, %v7003_v24  ;;  %v1246_v44 = vcombine.low %v1214_v28, %v1229_v34  ;;  %v1247_v45 = vcombine.high %v1214_v28, %v1229_v34 }
 0x217   : > { %v1470_v46 = vrot.slane %v1462_v38, %v7003_v24  ;;  %v1477_v47 = vrot.slane %v1463_v39, %v7003_v24  ;;  %v1478_v48 = vcombine.low %v1446_v33, %v1461_v37  ;;  %v1479_v49 = vcombine.high %v1446_v33, %v1461_v37 }
 0x218   : > { %v1254_v50 = vrot.slane %v1246_v44, %v7003_v24  ;;  %v1261_v51 = vrot.slane %v1247_v45, %v7003_v24  ;;  %v1332_v57 = vcombine.low %v1238_v42, %v1245_v43  ;;  %v5166_v58 = vcombine.high %v1238_v42, %v1245_v43 }
 0x219   : > { %v1486_v53 = vrot.slane %v1478_v48, %v7003_v24  ;;  %v1493_v54 = vrot.slane %v1479_v49, %v7003_v24  ;;  %v1564_v55 = vcombine.low %v1470_v46, %v1477_v47  ;;  %v5170_v59 = vcombine.high %v1470_v46, %v1477_v47 }
 0x21a   : > { %v1348_v61 = vcombine.low %v1254_v50, %v1261_v51  ;;  %v1280_v62 = vrot.slane %v1266_v40, %v6998_v13  ;;  %v1498_v63 = vcombine.high %v1152_v41, %v6700_v7  ;;  %v1281_v0 = vcombine.high %v1111_v52, %v6700_v7 }
 0x21b   : > { %v1505_v1 = vrot.slane %v1152_v41, %v6998_v13  ;;  %v1288_v2 = vrot.slane %v1111_v52, %v6998_v13  ;;  %v1513_v3 = vcombine.high %v1154_v56, %v6700_v7  ;;  %v1520_v4 = vrot.slane %v1154_v56, %v6998_v13 }
 0x21c   : > { %v1512_v5 = vrot.slane %v1498_v63, %v6998_v13  ;;  %v1295_v6 = vrot.slane %v1281_v0, %v6998_v13  ;;  %v1571_v8 = vrot.slane %v1564_v55, %v6998_v13  ;;  %v1580_v9 = vcombine.low %v1486_v53, %v1493_v54 }
 0x21d   : > { %v1296_v10 = vcombine.low %v1273_v60, %v1288_v2  ;;  %v1297_v11 = vcombine.high %v1273_v60, %v1288_v2  ;;  %v1527_v12 = vrot.slane %v1513_v3, %v6998_v13  ;;  %v1528_v14 = vcombine.low %v1505_v1, %v1520_v4 }
 0x21e   : > { %v1312_v15 = vcombine.low %v1280_v62, %v1295_v6  ;;  %v1313_v16 = vcombine.high %v1280_v62, %v1295_v6  ;;  %v1529_v17 = vcombine.high %v1505_v1, %v1520_v4  ;;  %v1579_v19 = vrot.slane %v5170_v59, %v6998_v13 }
 0x21f   : > { %v1304_v22 = vrot.slane %v1296_v10, %v7003_v24  ;;  %v1311_v23 = vrot.slane %v1297_v11, %v7003_v24  ;;  %v1536_v25 = vrot.slane %v1528_v14, %v7003_v24  ;;  %v1544_v26 = vcombine.low %v1512_v5, %v1527_v12 }
 0x220   : > { %v1320_v27 = vrot.slane %v1312_v15, %v7003_v24  ;;  %v1327_v28 = vrot.slane %v1313_v16, %v7003_v24  ;;  %v1543_v29 = vrot.slane %v1529_v17, %v7003_v24  ;;  %v1545_v30 = vcombine.high %v1512_v5, %v1527_v12 }
 0x221   : > { %v5167_v31 = vcombine.high %v1254_v50, %v1261_v51  ;;  %v1552_v32 = vrot.slane %v1544_v26, %v7003_v24  ;;  %v1587_v33 = vrot.slane %v1580_v9, %v6998_v13  ;;  %v5171_v34 = vcombine.high %v1486_v53, %v1493_v54 }
 0x222   : > { %v1339_v35 = vrot.slane %v1332_v57, %v6998_v13  ;;  %v1347_v36 = vrot.slane %v5166_v58, %v6998_v13  ;;  %v1559_v37 = vrot.slane %v1545_v30, %v7003_v24  ;;  %v1614_v38 = vcombine.low %v1536_v25, %v1543_v29 }
 0x223   : > { %v1382_v39 = vcombine.low %v1304_v22, %v1311_v23  ;;  %v5168_v40 = vcombine.high %v1304_v22, %v1311_v23  ;;  %v5172_v41 = vcombine.high %v1536_v25, %v1543_v29  ;;  %v1595_v42 = vrot.slane %v5171_v34, %v6998_v13 }
 0x224   : > { %v1398_v43 = vcombine.low %v1320_v27, %v1327_v28  ;;  %v1630_v44 = vcombine.low %v1552_v32, %v1559_v37  ;;  %v5173_v45 = vcombine.high %v1552_v32, %v1559_v37  ;;  %v1596_v46 = vcombine.low %v1571_v8, %v1579_v19 }
 0x225   : > { %v5169_v47 = vcombine.high %v1320_v27, %v1327_v28  ;;  %v1604_v48 = vcombine.low %v1587_v33, %v1595_v42  ;;  %v1355_v49 = vrot.slane %v1348_v61, %v6998_v13  ;;  %v1363_v50 = vrot.slane %v5167_v31, %v6998_v13 }
 0x226   : > { %v1621_v51 = vrot.slane %v1614_v38, %v6998_v13  ;;  %v1364_v52 = vcombine.low %v1339_v35, %v1347_v36  ;;  %v1637_v53 = vrot.slane %v1630_v44, %v6998_v13  ;;  %v1645_v54 = vrot.slane %v5173_v45, %v6998_v13 }
 0x227   : > { %v1629_v55 = vrot.slane %v5172_v41, %v6998_v13  ;;  %v1603_v56 = vrot.slane %v1596_v46, %v7003_v24  ;;  %v1611_v57 = vrot.slane %v1604_v48, %v7003_v24  ;;  %v1372_v58 = vcombine.low %v1355_v49, %v1363_v50 }
 0x228   : > { %v1371_v59 = vrot.slane %v1364_v52, %v7003_v24  ;;  %v1405_v60 = vrot.slane %v1398_v43, %v6998_v13  ;;  %v1654_v63 = vcombine.low %v1637_v53, %v1645_v54  ;;  %v1413_v0 = vrot.slane %v5169_v47, %v6998_v13 }
 0x229   : > { %v7059_v61 = vcombine.low %v1603_v56, %v1611_v57  ;;  %v1379_v62 = vrot.slane %v1372_v58, %v7003_v24  ;;  %v1389_v1 = vrot.slane %v1382_v39, %v6998_v13  ;;  %v1397_v2 = vrot.slane %v5168_v40, %v6998_v13 }
 0x22a   : > { %v1646_v4 = vcombine.low %v1621_v51, %v1629_v55  ;;  %v7069_v5 = vcombine.high %v1603_v56, %v1611_v57  ;;  %v1661_v6 = vrot.slane %v1654_v63, %v7003_v24  ;;  %v1422_v8 = vcombine.low %v1405_v60, %v1413_v0 }
 0x22b   : > { %1924 = vrot.lane.b32.xlu1 %v7059_v61, %s6703_s16  ;;  %v7066_v3 = vcombine.low %v1371_v59, %v1379_v62  ;;  %v1414_v10 = vcombine.low %v1389_v1, %v1397_v2  ;;  %v7087_v17 = vcombine.high %v1371_v59, %v1379_v62 }
 0x22c   : > { %v1653_v9 = vrot.slane %v1646_v4, %v7003_v24  ;;  %v1429_v12 = vrot.slane %v1422_v8, %v7003_v24 }
 0x22d   : > { %1902 = vrot.lane.b32.xlu0 %v7066_v3, %s6703_s16  ;;  %v1421_v14 = vrot.slane %v1414_v10, %v7003_v24 }
 0x22e   : > { %v7074_v11 = vcombine.low %v1653_v9, %v1661_v6  ;;  %v7084_v16 = vcombine.high %v1653_v9, %v1661_v6 }
 0x22f   : > { %1928 = vrot.lane.b32.xlu1 %v7069_v5, %s6703_s16  ;;  %v7079_v15 = vcombine.low %v1421_v14, %v1429_v12  ;;  %v7090_v19 = vcombine.high %v1421_v14, %v1429_v12 }
 0x233   : > { %1926 = vrot.lane.b32.xlu1 %v7074_v11, %s6703_s16 }
 0x237   : > { %1904 = vrot.lane.b32.xlu1 %v7079_v15, %s6703_s16 }
 0x23b   : > { %1930 = vrot.lane.b32.xlu1 %v7084_v16, %s6703_s16 }
 0x23f   : > { %1906 = vrot.lane.b32.xlu1 %v7087_v17, %s6703_s16 }
 0x243   : > { %1908 = vrot.lane.b32.xlu1 %v7090_v19, %s6703_s16 }
 0x24f   : > { %v1191_v22 = vpop.f32.mrf.mxu0 }
 0x250   : > { %v1664_v23 = vcombine.high %v1191_v22, %v6700_v7  ;;  %v1671_v26 = vrot.slane %v1191_v22, %v6998_v13 }
 0x251   : > { %v1193_v25 = vpop.f32.mrf.mxu0 }
 0x252   : > { %v1679_v27 = vcombine.high %v1193_v25, %v6700_v7  ;;  %v1686_v28 = vrot.slane %v1193_v25, %v6998_v13  ;;  %v1678_v30 = vrot.slane %v1664_v23, %v6998_v13 }
 0x253   : > { %v1195_v29 = vpop.f32.mrf.mxu0 }
 0x254   : > { %v1693_v31 = vrot.slane %v1679_v27, %v6998_v13  ;;  %v1694_v32 = vcombine.low %v1671_v26, %v1686_v28  ;;  %v1695_v33 = vcombine.high %v1671_v26, %v1686_v28  ;;  %v1730_v34 = vcombine.high %v1195_v29, %v6700_v7 }
 0x255   : > { %v1197_v35 = vpop.f32.mrf.mxu0  ;;  %v1737_v40 = vrot.slane %v1195_v29, %v6998_v13 }
 0x256   : > { %v1702_v36 = vrot.slane %v1694_v32, %v7003_v24  ;;  %v1709_v37 = vrot.slane %v1695_v33, %v7003_v24  ;;  %v1710_v38 = vcombine.low %v1678_v30, %v1693_v31  ;;  %v1711_v39 = vcombine.high %v1678_v30, %v1693_v31  ;;  %v1900_v33 = vld [vmem:[#allocation14] sm:$0xff] }
 0x257   : > { %v1745_v41 = vcombine.high %v1197_v35, %v6700_v7  ;;  %v1752_v42 = vrot.slane %v1197_v35, %v6998_v13  ;;  %v1744_v47 = vrot.slane %v1730_v34, %v6998_v13  ;;  %v1898_v35 = vld [vmem:[#allocation13] sm:$0xff] }
 0x258   : > { %v1718_v43 = vrot.slane %v1710_v38, %v7003_v24  ;;  %v1725_v44 = vrot.slane %v1711_v39, %v7003_v24  ;;  %v1796_v45 = vcombine.low %v1702_v36, %v1709_v37  ;;  %v5174_v46 = vcombine.high %v1702_v36, %v1709_v37  ;;  %v1899_v36 = vld [vmem:[#allocation13 + $0x8] sm:$0xff]  ;;  %v1901_v37 = vld [vmem:[#allocation14 + $0x8] sm:$0xff] }
 0x259   : > { %v1759_v48 = vrot.slane %v1745_v41, %v6998_v13  ;;  %v1760_v49 = vcombine.low %v1737_v40, %v1752_v42  ;;  %v1761_v50 = vcombine.high %v1737_v40, %v1752_v42  ;;  %v1932_v41 = vmul.f32 %v1898_v35, %v7059_v61 }
 0x25a   : > { %v1803_v51 = vrot.slane %v1796_v45, %v6998_v13  ;;  %v1811_v52 = vrot.slane %v5174_v46, %v6998_v13  ;;  %v1812_v53 = vcombine.low %v1718_v43, %v1725_v44  ;;  %v5175_v54 = vcombine.high %v1718_v43, %v1725_v44 }
 0x25b   : > { %v1768_v55 = vrot.slane %v1760_v49, %v7003_v24  ;;  %v1775_v56 = vrot.slane %v1761_v50, %v7003_v24  ;;  %v1776_v57 = vcombine.low %v1744_v47, %v1759_v48  ;;  %v1777_v58 = vcombine.high %v1744_v47, %v1759_v48 }
 0x25c   : > { %v1819_v59 = vrot.slane %v1812_v53, %v6998_v13  ;;  %v1827_v60 = vrot.slane %v5175_v54, %v6998_v13  ;;  %v1828_v62 = vcombine.low %v1803_v51, %v1811_v52  ;;  %v1933_v42 = vmul.f32 %v1899_v36, %v7074_v11 }
 0x25d   : > { %v1784_v63 = vrot.slane %v1776_v57, %v7003_v24  ;;  %v1791_v0 = vrot.slane %v1777_v58, %v7003_v24  ;;  %v1846_v1 = vcombine.low %v1768_v55, %v1775_v56  ;;  %v5176_v2 = vcombine.high %v1768_v55, %v1775_v56 }
 0x25e   : > { %v1836_v4 = vcombine.low %v1819_v59, %v1827_v60  ;;  %v1835_v12 = vrot.slane %v1828_v62, %v7003_v24  ;;  %v1910_v48 = vmul.f32 %v1898_v35, %v7066_v3  ;;  %v1911_v50 = vmul.f32 %v1899_v36, %v7079_v15 }
 0x25f   : > { %v1853_v6 = vrot.slane %v1846_v1, %v6998_v13  ;;  %v1861_v8 = vrot.slane %v5176_v2, %v6998_v13  ;;  %v1862_v9 = vcombine.low %v1784_v63, %v1791_v0  ;;  %v5177_v10 = vcombine.high %v1784_v63, %v1791_v0 }
 0x260   : > { %v1843_v14 = vrot.slane %v1836_v4, %v7003_v24  ;;  %v1934_v61 = vmul.f32 %v1898_v35, %v7069_v5  ;;  %v1935_v56 = vmul.f32 %v1899_v36, %v7084_v16  ;;  %v1912_v63 = vmul.f32 %v1898_v35, %v7087_v17 }
 0x261   : > { %v1869_v22 = vrot.slane %v1862_v9, %v6998_v13  ;;  %v1877_v23 = vrot.slane %v5177_v10, %v6998_v13  ;;  %v1878_v25 = vcombine.low %v1853_v6, %v1861_v8  ;;  %v1913_v5 = vmul.f32 %v1899_v36, %v7090_v19 }
 0x262   : > { %v1845_v26 = vcombine.high %v1835_v12, %v1843_v14  ;;  %v1844_v4 = vcombine.low %v1835_v12, %v1843_v14 }
 0x263   : > { %v1886_v27 = vcombine.low %v1869_v22, %v1877_v23  ;;  %v1885_v28 = vrot.slane %v1878_v25, %v7003_v24 }
 0x265   : > { %v1893_v29 = vrot.slane %v1886_v27, %v7003_v24 }
 0x267   : > { %v1895_v30 = vcombine.high %v1885_v28, %v1893_v29  ;;  %v1894_v16 = vcombine.low %v1885_v28, %v1893_v29 }
 0x269   : > { %v7125_v31 = vpack.c.bf16 %v1895_v30, %v1845_v26  ;;  %v1896_v8 = vpack.c.bf16 %v1894_v16, %v1844_v4  ;;  %v5838_v16 = vld [vmem:[#allocation8 + $0x50] ss:$8 sps:$4 sm:$0xff]   ;;  %v5849_v4 = vld [vmem:[#allocation8 + $0x24] ss:$8 sps:$4 sm:$0xff]  }
 0x29d   : > { %v1925_v32 = vpop.permute.xlu1 %1924 }
 0x29e   : > { %v1936_v38 = vmul.f32 %v1925_v32, %v1900_v33 }
 0x29f   : > { %v1903_v39 = vpop.permute.xlu0 %1902 }
 0x2a0   : > { %v1940_v44 = vadd.f32 %v1936_v38, %v1932_v41  ;;  %v1914_v45 = vmul.f32 %v1903_v39, %v1900_v33 }
 0x2a1   : > { %v1929_v34 = vpop.permute.xlu1 %1928 }
 0x2a2   : > { %v1918_v52 = vadd.f32 %v1914_v45, %v1910_v48  ;;  %v1938_v53 = vmul.f32 %v1929_v34, %v1900_v33 }
 0x2a4   : > { %v1942_v58 = vadd.f32 %v1938_v53, %v1934_v61 }
 0x2a5   : > { %v1927_v40 = vpop.permute.xlu1 %1926 }
 0x2a6   : > { %v1937_v43 = vmul.f32 %v1927_v40, %v1901_v37 }
 0x2a8   : > { %v1941_v46 = vadd.f32 %v1937_v43, %v1933_v42 }
 0x2a9   : > { %v1905_v47 = vpop.permute.xlu1 %1904 }
 0x2aa   : > { %v1944_v49 = vpack.c.bf16 %v1941_v46, %v1940_v44  ;;  %v1915_v51 = vmul.f32 %v1905_v47, %v1901_v37 }
 0x2ac   : > { %v1919_v54 = vadd.f32 %v1915_v51, %v1911_v50  ;;  %5532 = vmatpush3.bf16.xpose.msra.mxu1 %v1944_v49 }
 0x2ad   : > { %v1931_v55 = vpop.permute.xlu1 %1930  ;;  %5537 = vmatprep.subr.bf16.mxu1 %v6700_v7 }
 0x2ae   : > { %v1922_v11 = vpack.c.bf16 %v1919_v54, %v1918_v52  ;;  %v1939_v57 = vmul.f32 %v1931_v55, %v1901_v37 }
 0x2b0   : > { %v1943_v59 = vadd.f32 %v1939_v57, %v1935_v56  ;;  %v5834_v57 = vld [vmem:[#allocation8 + $0x74] ss:$8 sps:$4 sm:$0xff]  }
 0x2b1   : > { %v1907_v3 = vpop.permute.xlu1 %1906 }
 0x2b2   : > { %v1945_v60 = vpack.c.bf16 %v1943_v59, %v1942_v58  ;;  %v1916_v15 = vmul.f32 %v1907_v3, %v1900_v33 }
 0x2b3   : > { %5534 = vmatmul.mubr.bf16.vlgmr.msra.gmra.mxu1 %v1922_v11 }
 0x2b4   : > { %5538 = vmatpush3.bf16.xpose.msra.mxu1 %v1945_v60  ;;  %5539 = vmatprep.mubr.msk.bf16.mxu1 %vm6704_vm0, %v6700_v7  ;;  %v1920_v1 = vadd.f32 %v1916_v15, %v1912_v63  ;;  %v5832_v15 = vld [vmem:[#allocation8 + $0x70] ss:$8 sps:$4 sm:$0xff]   ;;  %v5837_v63 = vld [vmem:[#allocation8 + $0x64] ss:$8 sps:$4 sm:$0xff]  }
 0x2b5   : > { %v1909_v62 = vpop.permute.xlu1 %1908  ;;  %5543 = vmatprep.subr.bf16.mxu1 %v6700_v7 }
 0x2b6   : > { %v1917_v0 = vmul.f32 %v1909_v62, %v1901_v37 }
 0x2b8   : > { %v1921_v2 = vadd.f32 %v1917_v0, %v1913_v5  ;;  %v5835_v5 = vld [vmem:[#allocation8 + $0x60] ss:$8 sps:$4 sm:$0xff]   ;;  %v5840_v0 = vld [vmem:[#allocation8 + $0x54] ss:$8 sps:$4 sm:$0xff]  }
 0x2ba   : > { %v1923_v6 = vpack.c.bf16 %v1921_v2, %v1920_v1  ;;  %v5846_v1 = vld [vmem:[#allocation8 + $0x34] ss:$8 sps:$4 sm:$0xff]   ;;  %v5844_v2 = vld [vmem:[#allocation8 + $0x30] ss:$8 sps:$4 sm:$0xff]  }
 0x2bc   : > { %5540 = vmatmul.mubr.bf16.vlgmr.msra.gmra.mxu1 %v1923_v6  ;;  %v5847_v6 = vld [vmem:[#allocation8 + $0x20] ss:$8 sps:$4 sm:$0xff]  }
 0x2bd   : > { %5544 = vmatpush3.bf16.msra.mxu1 %v1896_v8  ;;  %5545 = vmatprep.mubr.msk.bf16.mxu1 %vm6704_vm0, %v6700_v7  ;;  %v5850_v8 = vld [vmem:[#allocation8 + $0x10] ss:$8 sps:$4 sm:$0xff]  }
 0x2be   : > { %5549 = vmatprep.subr.bf16.mxu1 %v6700_v7 }
 0x373   : > { %v1980_v9 = vpop.f32.mrf.mxu1 }
 0x374   : > { %v2029_v17 = vsel %vm2028_vm1, %v1980_v9, -inf }
 0x375   : > { %2030 = vmax.xlane.f32.xlu1 %v2029_v17  ;;  %v5535_v19 = vpop.f32.mrf.mxu1  ;;  %v5853_v17 = vld [vmem:[#allocation8] ss:$8 sps:$4 sm:$0xff]  }
 0x376   : > { %v5855_v19 = vld [vmem:[#allocation8 + $0x4] ss:$8 sps:$4 sm:$0xff]  }
 0x377   : > { %v1983_v10 = vpop.f32.mrf.mxu1 }
 0x378   : > { %v2032_v22 = vsel %vm2028_vm1, %v1983_v10, -inf }
 0x379   : > { %2033 = vmax.xlane.f32.xlu0 %v2032_v22  ;;  %v5536_v12 = vpop.f32.mrf.mxu1  ;;  %v5858_v22 = vld [vmem:[#allocation8 + $0xf4] ss:$8 sps:$4 sm:$0xff]  }
 0x37a   : > { %v5861_v12 = vld [vmem:[#allocation8 + $0xe4] ss:$8 sps:$4 sm:$0xff]  }
 0x37c   : > { %v2021_v14 = vpop.f32.mrf.mxu1 }
 0x37d   : > { %v2035_v23 = vsel %vm2028_vm1, %v2021_v14, -inf }
 0x37e   : > { %2036 = vmax.xlane.f32.xlu0 %v2035_v23  ;;  %v5541_v25 = vpop.f32.mrf.mxu1  ;;  %v5864_v23 = vld [vmem:[#allocation8 + $0xd4] ss:$8 sps:$4 sm:$0xff]  }
 0x37f   : > { %v5862_v25 = vld [vmem:[#allocation8 + $0xd0] ss:$8 sps:$4 sm:$0xff]  }
 0x380   : > { %v2024_v26 = vpop.f32.mrf.mxu1 }
 0x381   : > { %v2038_v27 = vsel %vm2028_vm1, %v2024_v26, -inf }
 0x382   : > { %2039 = vmax.xlane.f32.xlu1 %v2038_v27  ;;  %v5542_v28 = vpop.f32.mrf.mxu1  ;;  %v5865_v27 = vld [vmem:[#allocation8 + $0xc0] ss:$8 sps:$4 sm:$0xff]  }
 0x383   : > { %v5870_v28 = vld [vmem:[#allocation8 + $0xb4] ss:$8 sps:$4 sm:$0xff]  }
 0x3fe   : > { %v2031_v29 = vpop.xlane.xlu1 %2030 }
 0x3ff   : > { %v2041_v30 = vsub.f32 %v1980_v9, %v2031_v29  ;;  %v5852_v9 = vld [vmem:[#allocation8 + $0x14] ss:$8 sps:$4 sm:$0xff]   ;;  %v5868_v29 = vld [vmem:[#allocation8 + $0xb0] ss:$8 sps:$4 sm:$0xff]  }
 0x401   : > { %v2045_v32 = vmul.f32 1.442695, %v2041_v30  ;;  %v5873_v30 = vld [vmem:[#allocation8 + $0xa4] ss:$8 sps:$4 sm:$0xff]  }
 0x402   : > { %v2034_v33 = vpop.xlane.xlu0 %2033 }
 0x403   : > { %6316 = vpow2.f32 %v2045_v32  ;;  %v2042_v34 = vsub.f32 %v1983_v10, %v2034_v33  ;;  %v5856_v10 = vld [vmem:[#allocation8 + $0xf0] ss:$8 sps:$4 sm:$0xff]   ;;  %v5871_v32 = vld [vmem:[#allocation8 + $0xa0] ss:$8 sps:$4 sm:$0xff]   ;;  %v5876_v33 = vld [vmem:[#allocation8 + $0x94] ss:$8 sps:$4 sm:$0xff]  }
 0x405   : > { %v2047_v35 = vmul.f32 1.442695, %v2042_v34  ;;  %v5874_v34 = vld [vmem:[#allocation8 + $0x90] ss:$8 sps:$4 sm:$0xff]  }
 0x407   : > { %6318 = vpow2.f32 %v2047_v35  ;;  %v2037_v36 = vpop.xlane.xlu0 %2036  ;;  %v5879_v35 = vld [vmem:[#allocation8 + $0x84] ss:$8 sps:$4 sm:$0xff]  }
 0x408   : > { %v2043_v37 = vsub.f32 %v2021_v14, %v2037_v36  ;;  %v5859_v14 = vld [vmem:[#allocation8 + $0xe0] ss:$8 sps:$4 sm:$0xff]  }
 0x409   : > { %v5877_v36 = vld [vmem:[#allocation8 + $0x80] ss:$8 sps:$4 sm:$0xff]  }
 0x40a   : > { %v2049_v38 = vmul.f32 1.442695, %v2043_v37 }
 0x40b   : > { %v2040_v39 = vpop.xlane.xlu1 %2039 }
 0x40c   : > { %6320 = vpow2.f32 %v2049_v38  ;;  %v2044_v40 = vsub.f32 %v2024_v26, %v2040_v39  ;;  %v5867_v26 = vld [vmem:[#allocation8 + $0xc4] ss:$8 sps:$4 sm:$0xff]  }
 0x40e   : > { %v2051_v41 = vmul.f32 1.442695, %v2044_v40 }
 0x410   : > { %v6317_v42 = vpop.eup %6316  ;;  %6322 = vpow2.f32 %v2051_v41 }
 0x411   : > { %v2053_v43 = vsel %vm2028_vm1, %v6317_v42, 0.0 }
 0x412   : > { %2054 = vadd.xlane.f32.xlu0 %v2053_v43 }
 0x414   : > { %v6319_v44 = vpop.eup %6318 }
 0x415   : > { %v2056_v45 = vsel %vm2028_vm1, %v6319_v44, 0.0 }
 0x416   : > { %2057 = vadd.xlane.f32.xlu1 %v2056_v45 }
 0x419   : > { %v6321_v46 = vpop.eup %6320 }
 0x41a   : > { %v2059_v47 = vsel %vm2028_vm1, %v6321_v46, 0.0 }
 0x41b   : > { %2060 = vadd.xlane.f32.xlu0 %v2059_v47 }
 0x41d   : > { %v6323_v48 = vpop.eup %6322 }
 0x41e   : > { %v2062_v49 = vsel %vm2028_vm1, %v6323_v48, 0.0 }
 0x41f   : > { %2063 = vadd.xlane.f32.xlu1 %v2062_v49 }
 0x49b   : > { %v2055_v50 = vpop.xlane.xlu0 %2054 }
 0x49c   : > { %6324 = vrcp.f32 %v2055_v50 }
 0x49f   : > { %v2058_v51 = vpop.xlane.xlu1 %2057 }
 0x4a0   : > { %6326 = vrcp.f32 %v2058_v51 }
 0x4a4   : > { %v2061_v52 = vpop.xlane.xlu0 %2060 }
 0x4a5   : > { %6328 = vrcp.f32 %v2061_v52 }
 0x4a8   : > { %v2064_v53 = vpop.xlane.xlu1 %2063 }
 0x4a9   : > { %6330 = vrcp.f32 %v2064_v53  ;;  %v6325_v54 = vpop.eup %6324 }
 0x4aa   : > { %v2069_v61 = vmul.f32 %v6325_v54, %v6317_v42 }
 0x4ad   : > { %v6327_v55 = vpop.eup %6326 }
 0x4ae   : > { %v2070_v11 = vmul.f32 %v6327_v55, %v6319_v44 }
 0x4b0   : > { %v2073_v56 = vpack.c.bf16 %v2070_v11, %v2069_v61 }
 0x4b2   : > { %5546 = vmatmul.mubr.msk.bf16.vlgmr.msra.gmra.mxu1 %vm2028_vm1, %v2073_v56  ;;  %v6329_v58 = vpop.eup %6328 }
 0x4b3   : > { %5550 = vmatpush3.bf16.msra.mxu1 %v7125_v31  ;;  %5551 = vmatprep.mubr.msk.bf16.mxu1 %vm6704_vm0, %v6700_v7  ;;  %v2071_v3 = vmul.f32 %v6329_v58, %v6321_v46  ;;  %v5843_v31 = vld [vmem:[#allocation8 + $0x44] ss:$8 sps:$4 sm:$0xff]   ;;  %v5841_v7 = vld [vmem:[#allocation8 + $0x40] ss:$8 sps:$4 sm:$0xff]   ;;  %v6705_v46 = vmov 0  }
 0x4b4   : > { %2575 = vmatprep.subr.bf16.mxu1 %v5834_v57  ;;  %v2174_v47 = vpack.i.b16 %v6705_v46, %v6705_v46 }
 0x4b6   : > { %v6331_v59 = vpop.eup %6330 }
 0x4b7   : > { %v2072_v60 = vmul.f32 %v6331_v59, %v6323_v48 }
 0x4b9   : > { %v2074_v62 = vpack.c.bf16 %v2072_v60, %v2071_v3 }
 0x4bb   : > { %5552 = vmatmul.mubr.msk.bf16.vlgmr.msra.gmra.mxu1 %vm2028_vm1, %v2074_v62 }
 0x4bc   : > { %2576 = vmatpush1.bf16.msra.mxu1 %v5832_v15 }
 0x4bd   : > { %2577 = vmatprep.subr.bf16.mxu1 %v5837_v63 }
 0x4c0   : > { %2578 = vmatpush1.bf16.msra.mxu1 %v5835_v5 }
 0x4c1   : > { %2579 = vmatprep.subr.bf16.mxu1 %v5840_v0 }
 0x4c4   : > { %2580 = vmatpush1.bf16.msra.mxu1 %v5838_v16 }
 0x4c5   : > { %2581 = vmatprep.subr.bf16.mxu1 %v5843_v31 }
 0x4c8   : > { %2582 = vmatpush1.bf16.msra.mxu1 %v5841_v7 }
 0x4c9   : > { %2583 = vmatprep.subr.bf16.mxu1 %v5846_v1 }
 0x4cc   : > { %2584 = vmatpush1.bf16.msra.mxu1 %v5844_v2 }
 0x4cd   : > { %2585 = vmatprep.subr.bf16.mxu1 %v5849_v4 }
 0x4d0   : > { %2586 = vmatpush1.bf16.msra.mxu1 %v5847_v6 }
 0x4d1   : > { %2587 = vmatprep.subr.bf16.mxu1 %v5852_v9 }
 0x4d4   : > { %2588 = vmatpush1.bf16.msra.mxu1 %v5850_v8 }
 0x4d5   : > { %2589 = vmatprep.subr.bf16.mxu1 %v5855_v19 }
 0x4d8   : > { %2590 = vmatpush1.bf16.msra.mxu1 %v5853_v17 }
 0x4d9   : > { %2591 = vmatprep.subr.bf16.mxu1 %v5858_v22 }
 0x4dc   : > { %2592 = vmatpush2.bf16.msra.mxu1 %v5856_v10 }
 0x4dd   : > { %2593 = vmatprep.subr.bf16.mxu1 %v5861_v12 }
 0x4e0   : > { %2594 = vmatpush2.bf16.msra.mxu1 %v5859_v14 }
 0x4e1   : > { %2595 = vmatprep.subr.bf16.mxu1 %v5864_v23 }
 0x4e4   : > { %2596 = vmatpush2.bf16.msra.mxu1 %v5862_v25 }
 0x4e5   : > { %2597 = vmatprep.subr.bf16.mxu1 %v5867_v26 }
 0x4e8   : > { %2598 = vmatpush2.bf16.msra.mxu1 %v5865_v27 }
 0x4e9   : > { %2599 = vmatprep.subr.bf16.mxu1 %v5870_v28 }
 0x4ec   : > { %2600 = vmatpush2.bf16.msra.mxu1 %v5868_v29 }
 0x4ed   : > { %2601 = vmatprep.subr.bf16.mxu1 %v5873_v30 }
 0x4f0   : > { %2602 = vmatpush2.bf16.msra.mxu1 %v5871_v32 }
 0x4f1   : > { %2603 = vmatprep.subr.bf16.mxu1 %v5876_v33 }
 0x4f4   : > { %2604 = vmatpush2.bf16.msra.mxu1 %v5874_v34 }
 0x4f5   : > { %2605 = vmatprep.subr.bf16.mxu1 %v5879_v35 }
 0x4f8   : > { %2606 = vmatpush2.bf16.msra.mxu1 %v5877_v36 }
 0x572   : > { %v2112_v37 = vpop.f32.mrf.mxu1 }
 0x574   : > { %v5547_v38 = vpop.f32.mrf.mxu1 }
 0x576   : > { %v2115_v39 = vpop.f32.mrf.mxu1 }
 0x577   : > { %v2163_v43 = vpack.c.bf16 %v2115_v39, %v2112_v37 }
 0x578   : > { %v5548_v40 = vpop.f32.mrf.mxu1 }
 0x579   : > { %v2169_v49 = vshrl.u32 %v2163_v43, 16 }
 0x57b   : > { %v2156_v41 = vpop.f32.mrf.mxu1 }
 0x57d   : > { %v5553_v42 = vpop.f32.mrf.mxu1 }
 0x57e   : > { %v5880_v42 = vld [vmem:[#allocation10 + $0x2a0] ss:$48 sps:$4 sm:$0xff]  }
 0x57f   : > { %v2159_v44 = vpop.f32.mrf.mxu1 }
 0x580   : > { %v2164_v45 = vpack.c.bf16 %v2159_v44, %v2156_v41  ;;  %v5885_v44 = vld [vmem:[#allocation10 + $0x2ac] ss:$48 sps:$4 sm:$0xff]  }
 0x581   : > { %v5554_v48 = vpop.f32.mrf.mxu1  ;;  %3859 = vmatprep.subr.bf16.mxu1 %v5885_v44  ;;  %v5940_v44 = vld [vmem:[#allocation10 + $0x4e0] ss:$48 sps:$4 sm:$0xff]  }
 0x582   : > { %v2167_v50 = vpack.i.b16 %v2164_v45, %v2163_v43  ;;  %v2170_v51 = vshrl.u32 %v2164_v45, 16  ;;  %v5883_v43 = vld [vmem:[#allocation10 + $0x2a8] ss:$48 sps:$4 sm:$0xff]   ;;  %v5888_v45 = vld [vmem:[#allocation10 + $0x244] ss:$48 sps:$4 sm:$0xff]  }
 0x583   : > { %v5894_v48 = vld [vmem:[#allocation10 + $0x1e4] ss:$48 sps:$4 sm:$0xff]  }
 0x584   : > { %v2171_v52 = vpack.i.b16 %v2170_v51, %v2169_v49  ;;  %v2179_v53 = vcombine.high %v2167_v50, %v2174_v47  ;;  %v2186_v54 = vrot.slane %v2167_v50, %v6998_v13  ;;  %v5897_v49 = vld [vmem:[#allocation10 + $0x1ec] ss:$48 sps:$4 sm:$0xff]   ;;  %v5892_v50 = vld [vmem:[#allocation10 + $0x1e0] ss:$48 sps:$4 sm:$0xff]   ;;  %v5895_v51 = vld [vmem:[#allocation10 + $0x1e8] ss:$48 sps:$4 sm:$0xff]  }
 0x586   : > { %v2193_v55 = vrot.slane %v2179_v53, %v6998_v13  ;;  %v2194_v61 = vcombine.high %v2186_v54, %v6705_v46  ;;  %v2228_v11 = vcombine.high %v2171_v52, %v2174_v47  ;;  %v2235_v56 = vrot.slane %v2171_v52, %v6998_v13  ;;  %v5886_v47 = vld [vmem:[#allocation10 + $0x240] ss:$48 sps:$4 sm:$0xff]   ;;  %v5900_v52 = vld [vmem:[#allocation10 + $0x184] ss:$48 sps:$4 sm:$0xff]   ;;  %v5903_v53 = vld [vmem:[#allocation10 + $0x18c] ss:$48 sps:$4 sm:$0xff]  }
 0x587   : > { %v2201_v57 = vrot.slane %v2186_v54, %v7003_v24  ;;  %v5898_v54 = vld [vmem:[#allocation10 + $0x180] ss:$48 sps:$4 sm:$0xff]  }
 0x588   : > { %v2208_v58 = vrot.slane %v2194_v61, %v7003_v24  ;;  %v2209_v59 = vcombine.high %v2193_v55, %v6705_v46  ;;  %v2242_v3 = vrot.slane %v2228_v11, %v6998_v13  ;;  %v2243_v60 = vcombine.high %v2235_v56, %v6705_v46  ;;  %v5906_v61 = vld [vmem:[#allocation10 + $0x124] ss:$48 sps:$4 sm:$0xff]   ;;  %v5909_v11 = vld [vmem:[#allocation10 + $0x12c] ss:$48 sps:$4 sm:$0xff]  }
 0x589   : > { %v2216_v15 = vrot.slane %v2193_v55, %v7003_v24  ;;  %v2250_v0 = vrot.slane %v2235_v56, %v7003_v24  ;;  %v5901_v55 = vld [vmem:[#allocation10 + $0x188] ss:$48 sps:$4 sm:$0xff]   ;;  %v5904_v56 = vld [vmem:[#allocation10 + $0x120] ss:$48 sps:$4 sm:$0xff]  }
 0x58a   : > { %v2223_v62 = vrot.slane %v2209_v59, %v7003_v24  ;;  %v2258_v63 = vcombine.high %v2242_v3, %v6705_v46  ;;  %v2277_v5 = vcombine.low %v2201_v57, %v2208_v58  ;;  %v2257_v16 = vrot.slane %v2243_v60, %v7003_v24  ;;  %v5891_v46 = vld [vmem:[#allocation10 + $0x24c] ss:$48 sps:$4 sm:$0xff]   ;;  %v5913_v60 = vld [vmem:[#allocation10 + $0xc8] ss:$48 sps:$4 sm:$0xff]  }
 0x58b   : > { %v2265_v31 = vrot.slane %v2242_v3, %v7003_v24  ;;  %v5180_v7 = vcombine.high %v2201_v57, %v2208_v58  ;;  %v5907_v57 = vld [vmem:[#allocation10 + $0x128] ss:$48 sps:$4 sm:$0xff]   ;;  %v5912_v58 = vld [vmem:[#allocation10 + $0xc4] ss:$48 sps:$4 sm:$0xff]   ;;  %v5915_v59 = vld [vmem:[#allocation10 + $0xcc] ss:$48 sps:$4 sm:$0xff]  }
 0x58c   : > { %v2272_v1 = vrot.slane %v2258_v63, %v7003_v24  ;;  %v2284_v2 = vrot.slane %v2277_v5, %v6998_v13  ;;  %v2293_v4 = vcombine.low %v2216_v15, %v2223_v62  ;;  %v5181_v6 = vcombine.high %v2216_v15, %v2223_v62  ;;  %v5910_v3 = vld [vmem:[#allocation10 + $0xc0] ss:$48 sps:$4 sm:$0xff]   ;;  %v5918_v15 = vld [vmem:[#allocation10 + $0x64] ss:$48 sps:$4 sm:$0xff]   ;;  %v5921_v62 = vld [vmem:[#allocation10 + $0x6c] ss:$48 sps:$4 sm:$0xff]  }
 0x58d   : > { %v2292_v8 = vrot.slane %v5180_v7, %v6998_v13  ;;  %v2326_v9 = vcombine.low %v2250_v0, %v2257_v16  ;;  %v5182_v17 = vcombine.high %v2250_v0, %v2257_v16  ;;  %v5916_v63 = vld [vmem:[#allocation10 + $0x60] ss:$48 sps:$4 sm:$0xff]   ;;  %v5919_v5 = vld [vmem:[#allocation10 + $0x68] ss:$48 sps:$4 sm:$0xff]   ;;  %v5924_v0 = vld [vmem:[#allocation10 + $0x4] ss:$48 sps:$4 sm:$0xff]  }
 0x58e   : > { %v2300_v19 = vrot.slane %v2293_v4, %v6998_v13  ;;  %v2308_v10 = vrot.slane %v5181_v6, %v6998_v13  ;;  %v2342_v22 = vcombine.low %v2265_v31, %v2272_v1  ;;  %v5183_v12 = vcombine.high %v2265_v31, %v2272_v1  ;;  %v5927_v16 = vld [vmem:[#allocation10 + $0xc] ss:$48 sps:$4 sm:$0xff]   ;;  %v5922_v31 = vld [vmem:[#allocation10] ss:$48 sps:$4 sm:$0xff]   ;;  %v5925_v7 = vld [vmem:[#allocation10 + $0x8] ss:$48 sps:$4 sm:$0xff]  }
 0x58f   : > { %v2333_v14 = vrot.slane %v2326_v9, %v6998_v13  ;;  %v2341_v23 = vrot.slane %v5182_v17, %v6998_v13  ;;  %v2309_v25 = vcombine.low %v2284_v2, %v2292_v8  ;;  %v5930_v1 = vld [vmem:[#allocation10 + $0x5a4] ss:$48 sps:$4 sm:$0xff]   ;;  %v5933_v2 = vld [vmem:[#allocation10 + $0x5ac] ss:$48 sps:$4 sm:$0xff]   ;;  %v5928_v4 = vld [vmem:[#allocation10 + $0x5a0] ss:$48 sps:$4 sm:$0xff]  }
 0x590   : > { %v2317_v26 = vcombine.low %v2300_v19, %v2308_v10  ;;  %v2349_v27 = vrot.slane %v2342_v22, %v6998_v13  ;;  %v2357_v28 = vrot.slane %v5183_v12, %v6998_v13  ;;  %v5882_v13 = vld [vmem:[#allocation10 + $0x2a4] ss:$48 sps:$4 sm:$0xff]   ;;  %v5931_v6 = vld [vmem:[#allocation10 + $0x5a8] ss:$48 sps:$4 sm:$0xff]  }
 0x591   : > { %v2358_v29 = vcombine.low %v2333_v14, %v2341_v23  ;;  %v2316_v30 = vrot.slane %v2309_v25, %v7003_v24  ;;  %3816 = vmatprep.subr.bf16.mxu0 %v5882_v13  ;;  %v6388_v19 = vld [vmem:[%s6953_s20] sm:$0xff]  ;;  %v6389_v14 = vld [vmem:[%s6953_s20 + $0x8] sm:$0xff] }
 0x592   : > { %v2324_v32 = vrot.slane %v2317_v26, %v7003_v24  ;;  %v2366_v33 = vcombine.low %v2349_v27, %v2357_v28  ;;  %3817 = vmatpush1.bf16.msra.mxu0 %v5880_v42  ;;  %v6390_v27 = vld [vmem:[%s6953_s20 + $0x10] sm:$0xff]  ;;  %v5937_v42 = vld [vmem:[#allocation10 + $0x548] ss:$48 sps:$4 sm:$0xff]  }
 0x593   : > { %v2365_v35 = vrot.slane %v2358_v29, %v7003_v24  ;;  %3818 = vmatprep.subr.bf16.mxu0 %v5888_v45  ;;  %v5942_v13 = vld [vmem:[#allocation10 + $0x4e4] ss:$48 sps:$4 sm:$0xff]   ;;  %v5943_v45 = vld [vmem:[#allocation10 + $0x4e8] ss:$48 sps:$4 sm:$0xff]  }
 0x594   : > { %v2325_v34 = vcombine.low %v2316_v30, %v2324_v32  ;;  %v2373_v36 = vrot.slane %v2366_v33, %v7003_v24  ;;  %v5889_v24 = vld [vmem:[#allocation10 + $0x248] ss:$48 sps:$4 sm:$0xff]  }
 0x595   : > { %v6391_v33 = vld [vmem:[%s6953_s20 + $0x18] sm:$0xff] }
 0x596   : > { %v2374_v37 = vcombine.low %v2365_v35, %v2373_v36  ;;  %v2379_v38 = vshrl.u32 %v2325_v34, 16  ;;  %3819 = vmatpush1.bf16.msra.mxu0 %v5886_v47  ;;  %v5951_v47 = vld [vmem:[#allocation10 + $0x48c] ss:$48 sps:$4 sm:$0xff]  }
 0x597   : > { %3820 = vmatprep.subr.bf16.mxu0 %v5894_v48  ;;  %v5949_v48 = vld [vmem:[#allocation10 + $0x488] ss:$48 sps:$4 sm:$0xff]  }
 0x598   : > { %v2380_v39 = vshrl.u32 %v2374_v37, 16  ;;  %v2377_v41 = vpack.i.b16 %v2374_v37, %v2325_v34 }
 0x59a   : > { %v2381_v40 = vpack.i.b16 %v2380_v39, %v2379_v38  ;;  %3821 = vmatpush1.bf16.msra.mxu0 %v5892_v50  ;;  %v5936_v39 = vld [vmem:[#allocation10 + $0x544] ss:$48 sps:$4 sm:$0xff]   ;;  %v5957_v50 = vld [vmem:[#allocation10 + $0x42c] ss:$48 sps:$4 sm:$0xff]  }
 0x59b   : > { %3822 = vmatprep.subr.bf16.mxu0 %v5900_v52  ;;  %v5955_v52 = vld [vmem:[#allocation10 + $0x428] ss:$48 sps:$4 sm:$0xff]  }
 0x59c   : > { %2607 = vmatprep.mubr.bf16.mxu1 %v2381_v40  ;;  %v5939_v40 = vld [vmem:[#allocation10 + $0x54c] ss:$48 sps:$4 sm:$0xff]  }
 0x59d   : > { %2608 = vmatmul.mubr.bf16.vlgmr.msra.gmra.mxu1 %v2377_v41  ;;  %v5934_v41 = vld [vmem:[#allocation10 + $0x540] ss:$48 sps:$4 sm:$0xff]  }
 0x59e   : > { %3860 = vmatpush1.bf16.msra.mxu1 %v5883_v43  ;;  %3823 = vmatpush1.bf16.msra.mxu0 %v5898_v54  ;;  %v5945_v43 = vld [vmem:[#allocation10 + $0x4ec] ss:$48 sps:$4 sm:$0xff]  }
 0x59f   : > { %3861 = vmatprep.subr.bf16.mxu1 %v5891_v46  ;;  %3824 = vmatprep.subr.bf16.mxu0 %v5906_v61  ;;  %v5948_v46 = vld [vmem:[#allocation10 + $0x484] ss:$48 sps:$4 sm:$0xff]   ;;  %v5963_v54 = vld [vmem:[#allocation10 + $0x3cc] ss:$48 sps:$4 sm:$0xff]   ;;  %v5961_v61 = vld [vmem:[#allocation10 + $0x3c8] ss:$48 sps:$4 sm:$0xff]  }
 0x5a2   : > { %3862 = vmatpush1.bf16.msra.mxu1 %v5889_v24  ;;  %3825 = vmatpush1.bf16.msra.mxu0 %v5904_v56  ;;  %v5946_v24 = vld [vmem:[#allocation10 + $0x480] ss:$48 sps:$4 sm:$0xff]   ;;  %v5969_v56 = vld [vmem:[#allocation10 + $0x36c] ss:$48 sps:$4 sm:$0xff]  }
 0x5a3   : > { %3863 = vmatprep.subr.bf16.mxu1 %v5897_v49  ;;  %3826 = vmatprep.subr.bf16.mxu0 %v5912_v58  ;;  %v5954_v49 = vld [vmem:[#allocation10 + $0x424] ss:$48 sps:$4 sm:$0xff]   ;;  %v5967_v58 = vld [vmem:[#allocation10 + $0x368] ss:$48 sps:$4 sm:$0xff]  }
 0x5a6   : > { %3864 = vmatpush1.bf16.msra.mxu1 %v5895_v51  ;;  %3827 = vmatpush1.bf16.msra.mxu0 %v5910_v3  ;;  %v5952_v51 = vld [vmem:[#allocation10 + $0x420] ss:$48 sps:$4 sm:$0xff]   ;;  %v5972_v3 = vld [vmem:[#allocation10 + $0x304] ss:$48 sps:$4 sm:$0xff]  }
 0x5a7   : > { %3865 = vmatprep.subr.bf16.mxu1 %v5903_v53  ;;  %3828 = vmatprep.subr.bf16.mxu0 %v5918_v15  ;;  %v5960_v53 = vld [vmem:[#allocation10 + $0x3c4] ss:$48 sps:$4 sm:$0xff]   ;;  %v5975_v15 = vld [vmem:[#allocation10 + $0x30c] ss:$48 sps:$4 sm:$0xff]  }
 0x5aa   : > { %3866 = vmatpush1.bf16.msra.mxu1 %v5901_v55  ;;  %3829 = vmatpush1.bf16.msra.mxu0 %v5916_v63  ;;  %v5958_v55 = vld [vmem:[#allocation10 + $0x3c0] ss:$48 sps:$4 sm:$0xff]   ;;  %v5981_v63 = vld [vmem:[#allocation10 + $0x2bc] ss:$48 sps:$4 sm:$0xff]  }
 0x5ab   : > { %3867 = vmatprep.subr.bf16.mxu1 %v5909_v11  ;;  %3830 = vmatprep.subr.bf16.mxu0 %v5924_v0  ;;  %v5966_v11 = vld [vmem:[#allocation10 + $0x364] ss:$48 sps:$4 sm:$0xff]  }
 0x5ae   : > { %3868 = vmatpush1.bf16.msra.mxu1 %v5907_v57  ;;  %3831 = vmatpush1.bf16.msra.mxu0 %v5922_v31  ;;  %v5964_v57 = vld [vmem:[#allocation10 + $0x360] ss:$48 sps:$4 sm:$0xff]  }
 0x5af   : > { %3869 = vmatprep.subr.bf16.mxu1 %v5915_v59  ;;  %3832 = vmatprep.subr.bf16.mxu0 %v5930_v1  ;;  %v5970_v59 = vld [vmem:[#allocation10 + $0x300] ss:$48 sps:$4 sm:$0xff]  }
 0x5b2   : > { %3870 = vmatpush1.bf16.msra.mxu1 %v5913_v60  ;;  %3833 = vmatpush2.bf16.msra.mxu0 %v5928_v4  ;;  %v5973_v60 = vld [vmem:[#allocation10 + $0x308] ss:$48 sps:$4 sm:$0xff]   ;;  %v2646_v4 = vld [vmem:[%s7315_s2] sm:$0x3] }
 0x5b3   : > { %3871 = vmatprep.subr.bf16.mxu1 %v5921_v62  ;;  %3834 = vmatprep.subr.bf16.mxu0 %v5936_v39  ;;  %v5978_v62 = vld [vmem:[#allocation10 + $0x2b4] ss:$48 sps:$4 sm:$0xff]   ;;  %v5991_v39 = vld [vmem:[#allocation10 + $0x1f8] ss:$48 sps:$4 sm:$0xff]  }
 0x5b6   : > { %3872 = vmatpush1.bf16.msra.mxu1 %v5919_v5  ;;  %3835 = vmatpush2.bf16.msra.mxu0 %v5934_v41  ;;  %v5999_v41 = vld [vmem:[#allocation10 + $0x19c] ss:$48 sps:$4 sm:$0xff]  }
 0x5b7   : > { %3873 = vmatprep.subr.bf16.mxu1 %v5927_v16  ;;  %3836 = vmatprep.subr.bf16.mxu0 %v5942_v13  ;;  %v5997_v13 = vld [vmem:[#allocation10 + $0x198] ss:$48 sps:$4 sm:$0xff]  }
 0x5ba   : > { %3874 = vmatpush1.bf16.msra.mxu1 %v5925_v7  ;;  %3837 = vmatpush2.bf16.msra.mxu0 %v5940_v44  ;;  %v6005_v44 = vld [vmem:[#allocation10 + $0x13c] ss:$48 sps:$4 sm:$0xff]  }
 0x5bb   : > { %3875 = vmatprep.subr.bf16.mxu1 %v5933_v2  ;;  %3838 = vmatprep.subr.bf16.mxu0 %v5948_v46  ;;  %v6003_v46 = vld [vmem:[#allocation10 + $0x138] ss:$48 sps:$4 sm:$0xff]  }
 0x5be   : > { %3876 = vmatpush2.bf16.msra.mxu1 %v5931_v6  ;;  %3839 = vmatpush2.bf16.msra.mxu0 %v5946_v24  ;;  %v2655_v6 = vrot.slane %v2646_v4, %v485_v20  ;;  %v5979_v20 = vld [vmem:[#allocation10 + $0x2b8] ss:$48 sps:$4 sm:$0xff]   ;;  %v6011_v24 = vld [vmem:[#allocation10 + $0xdc] ss:$48 sps:$4 sm:$0xff]  }
 0x5bf   : > { %3877 = vmatprep.subr.bf16.mxu1 %v5939_v40  ;;  %3840 = vmatprep.subr.bf16.mxu0 %v5954_v49  ;;  %v5996_v40 = vld [vmem:[#allocation10 + $0x194] ss:$48 sps:$4 sm:$0xff]   ;;  %v6009_v49 = vld [vmem:[#allocation10 + $0xd8] ss:$48 sps:$4 sm:$0xff]  }
 0x5c2   : > { %3878 = vmatpush2.bf16.msra.mxu1 %v5937_v42  ;;  %3841 = vmatpush2.bf16.msra.mxu0 %v5952_v51  ;;  %v5994_v42 = vld [vmem:[#allocation10 + $0x190] ss:$48 sps:$4 sm:$0xff]   ;;  %v6017_v51 = vld [vmem:[#allocation10 + $0x7c] ss:$48 sps:$4 sm:$0xff]  }
 0x5c3   : > { %3879 = vmatprep.subr.bf16.mxu1 %v5945_v43  ;;  %3842 = vmatprep.subr.bf16.mxu0 %v5960_v53  ;;  %v6002_v43 = vld [vmem:[#allocation10 + $0x134] ss:$48 sps:$4 sm:$0xff]   ;;  %v6015_v53 = vld [vmem:[#allocation10 + $0x78] ss:$48 sps:$4 sm:$0xff]  }
 0x5c6   : > { %3880 = vmatpush2.bf16.msra.mxu1 %v5943_v45  ;;  %3843 = vmatpush2.bf16.msra.mxu0 %v5958_v55  ;;  %v6000_v45 = vld [vmem:[#allocation10 + $0x130] ss:$48 sps:$4 sm:$0xff]   ;;  %v6023_v55 = vld [vmem:[#allocation10 + $0x1c] ss:$48 sps:$4 sm:$0xff]  }
 0x5c7   : > { %3881 = vmatprep.subr.bf16.mxu1 %v5951_v47  ;;  %3844 = vmatprep.subr.bf16.mxu0 %v5966_v11  ;;  %v6008_v47 = vld [vmem:[#allocation10 + $0xd4] ss:$48 sps:$4 sm:$0xff]   ;;  %v6021_v11 = vld [vmem:[#allocation10 + $0x18] ss:$48 sps:$4 sm:$0xff]  }
 0x5ca   : > { %3882 = vmatpush2.bf16.msra.mxu1 %v5949_v48  ;;  %3845 = vmatpush2.bf16.msra.mxu0 %v5964_v57  ;;  %v6006_v48 = vld [vmem:[#allocation10 + $0xd0] ss:$48 sps:$4 sm:$0xff]   ;;  %v6029_v57 = vld [vmem:[#allocation10 + $0x5bc] ss:$48 sps:$4 sm:$0xff]  }
 0x5cb   : > { %3883 = vmatprep.subr.bf16.mxu1 %v5957_v50  ;;  %3846 = vmatprep.subr.bf16.mxu0 %v5972_v3  ;;  %v6014_v50 = vld [vmem:[#allocation10 + $0x74] ss:$48 sps:$4 sm:$0xff]  }
 0x5cc   : > { %v6032_v3 = vld [vmem:[#allocation10 + $0x554] ss:$48 sps:$4 sm:$0xff]  }
 0x5ce   : > { %3884 = vmatpush2.bf16.msra.mxu1 %v5955_v52  ;;  %3847 = vmatpush2.bf16.msra.mxu0 %v5970_v59  ;;  %v6012_v52 = vld [vmem:[#allocation10 + $0x70] ss:$48 sps:$4 sm:$0xff]   ;;  %v6027_v59 = vld [vmem:[#allocation10 + $0x5b8] ss:$48 sps:$4 sm:$0xff]  }
 0x5cf   : > { %3885 = vmatprep.subr.bf16.mxu1 %v5963_v54  ;;  %3902 = vmatprep.subr.bf16.mxu0 %v5978_v62  ;;  %v6020_v54 = vld [vmem:[#allocation10 + $0x14] ss:$48 sps:$4 sm:$0xff]   ;;  %v6033_v62 = vld [vmem:[#allocation10 + $0x558] ss:$48 sps:$4 sm:$0xff]  }
 0x5d2   : > { %3886 = vmatpush2.bf16.msra.mxu1 %v5961_v61  ;;  %v6018_v61 = vld [vmem:[#allocation10 + $0x10] ss:$48 sps:$4 sm:$0xff]  }
 0x5d3   : > { %3887 = vmatprep.subr.bf16.mxu1 %v5969_v56  ;;  %v6026_v56 = vld [vmem:[#allocation10 + $0x5b4] ss:$48 sps:$4 sm:$0xff]  }
 0x5d6   : > { %3888 = vmatpush2.bf16.msra.mxu1 %v5967_v58  ;;  %v6024_v58 = vld [vmem:[#allocation10 + $0x5b0] ss:$48 sps:$4 sm:$0xff]  }
 0x5d7   : > { %3889 = vmatprep.subr.bf16.mxu1 %v5975_v15  ;;  %v6030_v15 = vld [vmem:[#allocation10 + $0x550] ss:$48 sps:$4 sm:$0xff]  }
 0x5da   : > { %3890 = vmatpush2.bf16.msra.mxu1 %v5973_v60  ;;  %v6035_v60 = vld [vmem:[#allocation10 + $0x55c] ss:$48 sps:$4 sm:$0xff]  }
 0x5db   : > { %3945 = vmatprep.subr.bf16.mxu1 %v5981_v63  ;;  %v6038_v63 = vld [vmem:[#allocation10 + $0x4f4] ss:$48 sps:$4 sm:$0xff]  }
 0x65d   : > { %v2609_v8 = vpop.f32.mrf.mxu1 }
 0x65e   : > { %v2618_v9 = vmul.f32 0.5, %v2609_v8  ;;  %v2651_v8 = vrot.slane %v2646_v4, %v481_v21  ;;  %v5987_v21 = vld [vmem:[#allocation10 + $0x25c] ss:$48 sps:$4 sm:$0xff]   ;;  %v6050_v4 = vld [vmem:[#allocation10 + $0x434] ss:$48 sps:$4 sm:$0xff]  }
 0x65f   : > { %v2611_v17 = vpop.f32.mrf.mxu1 }
 0x660   : > { %v7180_v10 = vadd.f32 %v6388_v19, %v2618_v9  ;;  %v2619_v22 = vmul.f32 0.5, %v2611_v17 }
 0x661   : > { %v2613_v12 = vpop.f32.mrf.mxu1 }
 0x662   : > { %v7183_v23 = vadd.f32 %v6389_v14, %v2619_v22  ;;  %v2620_v25 = vmul.f32 0.5, %v2613_v12  ;;  %v2626_v30 = vmul.f32 %v7180_v10, %v7180_v10 }
 0x663   : > { %v2615_v26 = vpop.f32.mrf.mxu1 }
 0x664   : > { %v7186_v28 = vadd.f32 %v6390_v27, %v2620_v25  ;;  %v2621_v29 = vmul.f32 0.5, %v2615_v26  ;;  %v2627_v32 = vmul.f32 %v7183_v23, %v7183_v23 }
 0x666   : > { %v7193_v34 = vadd.f32 %v6391_v33, %v2621_v29  ;;  %v2630_v35 = vadd.f32 %v2627_v32, %v2626_v30  ;;  %v2628_v36 = vmul.f32 %v7186_v28, %v7186_v28  ;;  %v5976_v30 = vld [vmem:[#allocation10 + $0x2b0] ss:$48 sps:$4 sm:$0xff]  }
 0x667   : > { %v5982_v33 = vld [vmem:[#allocation10 + $0x250] ss:$48 sps:$4 sm:$0xff]  }
 0x668   : > { %2631 = vadd.xlane.f32.xlu0 %v2630_v35  ;;  %v2629_v37 = vmul.f32 %v7193_v34, %v7193_v34  ;;  %v5985_v35 = vld [vmem:[#allocation10 + $0x258] ss:$48 sps:$4 sm:$0xff]  }
 0x66a   : > { %v2633_v38 = vadd.f32 %v2629_v37, %v2628_v36  ;;  %v5990_v36 = vld [vmem:[#allocation10 + $0x1f4] ss:$48 sps:$4 sm:$0xff]   ;;  %v5993_v37 = vld [vmem:[#allocation10 + $0x1fc] ss:$48 sps:$4 sm:$0xff]  }
 0x66c   : > { %2634 = vadd.xlane.f32.xlu1 %v2633_v38  ;;  %v5988_v38 = vld [vmem:[#allocation10 + $0x1f0] ss:$48 sps:$4 sm:$0xff]  }
 0x6f1   : > { %v2632_v5 = vpop.xlane.xlu0 %2631 }
 0x6f2   : > { %v2636_v0 = vmul.f32 0.00390625, %v2632_v5  ;;  %v6041_v5 = vld [vmem:[#allocation10 + $0x4fc] ss:$48 sps:$4 sm:$0xff]  }
 0x6f4   : > { %v2638_v16 = vadd.f32 1e-05, %v2636_v0  ;;  %v6036_v0 = vld [vmem:[#allocation10 + $0x4f0] ss:$48 sps:$4 sm:$0xff]  }
 0x6f5   : > { %v2635_v31 = vpop.xlane.xlu1 %2634 }
 0x6f6   : > { %6332 = vrsqrt.f32 %v2638_v16  ;;  %v2637_v7 = vmul.f32 0.00390625, %v2635_v31  ;;  %v6039_v16 = vld [vmem:[#allocation10 + $0x4f8] ss:$48 sps:$4 sm:$0xff]   ;;  %v6044_v31 = vld [vmem:[#allocation10 + $0x494] ss:$48 sps:$4 sm:$0xff]  }
 0x6f8   : > { %v2639_v1 = vadd.f32 1e-05, %v2637_v7  ;;  %v6047_v7 = vld [vmem:[#allocation10 + $0x49c] ss:$48 sps:$4 sm:$0xff]  }
 0x6fa   : > { %6334 = vrsqrt.f32 %v2639_v1  ;;  %v6042_v1 = vld [vmem:[#allocation10 + $0x490] ss:$48 sps:$4 sm:$0xff]  }
 0x703   : > { %v6333_v2 = vpop.eup %6332 }
 0x704   : > { %v2642_v9 = vmul.f32 %v6333_v2, %v7180_v10  ;;  %v2643_v17 = vmul.f32 %v6333_v2, %v7183_v23  ;;  %v6045_v2 = vld [vmem:[#allocation10 + $0x498] ss:$48 sps:$4 sm:$0xff]  }
 0x706   : > { %v2658_v14 = vmul.f32 %v2651_v8, %v2642_v9  ;;  %v2659_v25 = vmul.f32 %v2655_v6, %v2643_v17  ;;  %v6051_v9 = vld [vmem:[#allocation10 + $0x438] ss:$48 sps:$4 sm:$0xff]   ;;  %v6056_v17 = vld [vmem:[#allocation10 + $0x3d4] ss:$48 sps:$4 sm:$0xff]  }
 0x707   : > { %v6335_v19 = vpop.eup %6334 }
 0x708   : > { %v2644_v22 = vmul.f32 %v6335_v19, %v7186_v28  ;;  %v2645_v12 = vmul.f32 %v6335_v19, %v7193_v34  ;;  %v6059_v19 = vld [vmem:[#allocation10 + $0x3dc] ss:$48 sps:$4 sm:$0xff]  }
 0x70a   : > { %v2660_v26 = vmul.f32 %v2651_v8, %v2644_v22  ;;  %v2661_v27 = vmul.f32 %v2655_v6, %v2645_v12  ;;  %v6053_v6 = vld [vmem:[#allocation10 + $0x43c] ss:$48 sps:$4 sm:$0xff]   ;;  %v6048_v8 = vld [vmem:[#allocation10 + $0x430] ss:$48 sps:$4 sm:$0xff]   ;;  %v6057_v12 = vld [vmem:[#allocation10 + $0x3d8] ss:$48 sps:$4 sm:$0xff]  }
 0x70b   : > { %v6054_v22 = vld [vmem:[#allocation10 + $0x3d0] ss:$48 sps:$4 sm:$0xff]  }
 0x70c   : > { %v7210_v29 = vpack.c.bf16 %v2661_v27, %v2659_v25  ;;  %v7212_v32 = vpack.c.bf16 %v2660_v26, %v2658_v14  ;;  %v6062_v14 = vld [vmem:[#allocation10 + $0x374] ss:$48 sps:$4 sm:$0xff]   ;;  %v6065_v25 = vld [vmem:[#allocation10 + $0x37c] ss:$48 sps:$4 sm:$0xff]   ;;  %v6060_v26 = vld [vmem:[#allocation10 + $0x370] ss:$48 sps:$4 sm:$0xff]  }
 0x70d   : > { %v6063_v27 = vld [vmem:[#allocation10 + $0x378] ss:$48 sps:$4 sm:$0xff]  }
 0x70e   : > { %3848 = vmatprep.mubr.bf16.mxu0 %v7210_v29  ;;  %3891 = vmatprep.mubr.bf16.mxu1 %v7210_v29 }
 0x70f   : > { %3849 = vmatmul.mubr.bf16.vlgmr.msra.gmra.mxu0 %v7212_v32  ;;  %3892 = vmatmul.mubr.bf16.vlgmr.msra.gmra.mxu1 %v7212_v32 }
 0x710   : > { %3903 = vmatpush1.bf16.msra.mxu0 %v5976_v30  ;;  %3946 = vmatpush1.bf16.msra.mxu1 %v5979_v20  ;;  %v6068_v30 = vld [vmem:[#allocation10 + $0x314] ss:$48 sps:$4 sm:$0xff]   ;;  %v6071_v20 = vld [vmem:[#allocation10 + $0x31c] ss:$48 sps:$4 sm:$0xff]  }
 0x711   : > { %3934 = vmatprep.mubr.bf16.mxu0 %v7210_v29  ;;  %3977 = vmatprep.mubr.bf16.mxu1 %v7210_v29 }
 0x712   : > { %3904 = vmatprep.subr.bf16.mxu0 %v5984_v18  ;;  %3947 = vmatprep.subr.bf16.mxu1 %v5987_v21  ;;  %v6066_v18 = vld [vmem:[#allocation10 + $0x310] ss:$48 sps:$4 sm:$0xff]   ;;  %v6069_v21 = vld [vmem:[#allocation10 + $0x318] ss:$48 sps:$4 sm:$0xff]  }
 0x714   : > { %3905 = vmatpush1.bf16.msra.mxu0 %v5982_v33  ;;  %3948 = vmatpush1.bf16.msra.mxu1 %v5985_v35  ;;  %v6074_v33 = vld [vmem:[#allocation10 + $0x2c4] ss:$48 sps:$4 sm:$0xff]   ;;  %v6077_v35 = vld [vmem:[#allocation10 + $0x2cc] ss:$48 sps:$4 sm:$0xff]  }
 0x715   : > { %3906 = vmatprep.subr.bf16.mxu0 %v5990_v36  ;;  %3949 = vmatprep.subr.bf16.mxu1 %v5993_v37  ;;  %v6072_v36 = vld [vmem:[#allocation10 + $0x2c0] ss:$48 sps:$4 sm:$0xff]   ;;  %v6075_v37 = vld [vmem:[#allocation10 + $0x2c8] ss:$48 sps:$4 sm:$0xff]  }
 0x718   : > { %3907 = vmatpush1.bf16.msra.mxu0 %v5988_v38  ;;  %3950 = vmatpush1.bf16.msra.mxu1 %v5991_v39  ;;  %v6080_v38 = vld [vmem:[#allocation10 + $0x264] ss:$48 sps:$4 sm:$0xff]   ;;  %v6083_v39 = vld [vmem:[#allocation10 + $0x26c] ss:$48 sps:$4 sm:$0xff]  }
 0x719   : > { %3908 = vmatprep.subr.bf16.mxu0 %v5996_v40  ;;  %3951 = vmatprep.subr.bf16.mxu1 %v5999_v41  ;;  %v6078_v40 = vld [vmem:[#allocation10 + $0x260] ss:$48 sps:$4 sm:$0xff]   ;;  %v6081_v41 = vld [vmem:[#allocation10 + $0x268] ss:$48 sps:$4 sm:$0xff]  }
 0x71c   : > { %3909 = vmatpush1.bf16.msra.mxu0 %v5994_v42  ;;  %3952 = vmatpush1.bf16.msra.mxu1 %v5997_v13  ;;  %v6086_v42 = vld [vmem:[#allocation10 + $0x204] ss:$48 sps:$4 sm:$0xff]   ;;  %v6089_v13 = vld [vmem:[#allocation10 + $0x20c] ss:$48 sps:$4 sm:$0xff]  }
 0x71d   : > { %3910 = vmatprep.subr.bf16.mxu0 %v6002_v43  ;;  %3953 = vmatprep.subr.bf16.mxu1 %v6005_v44  ;;  %v6084_v43 = vld [vmem:[#allocation10 + $0x200] ss:$48 sps:$4 sm:$0xff]   ;;  %v6087_v44 = vld [vmem:[#allocation10 + $0x208] ss:$48 sps:$4 sm:$0xff]  }
 0x720   : > { %3911 = vmatpush1.bf16.msra.mxu0 %v6000_v45  ;;  %3954 = vmatpush1.bf16.msra.mxu1 %v6003_v46  ;;  %v6092_v45 = vld [vmem:[#allocation10 + $0x1a4] ss:$48 sps:$4 sm:$0xff]   ;;  %v6095_v46 = vld [vmem:[#allocation10 + $0x1ac] ss:$48 sps:$4 sm:$0xff]  }
 0x721   : > { %3912 = vmatprep.subr.bf16.mxu0 %v6008_v47  ;;  %3955 = vmatprep.subr.bf16.mxu1 %v6011_v24  ;;  %v6090_v47 = vld [vmem:[#allocation10 + $0x1a0] ss:$48 sps:$4 sm:$0xff]   ;;  %v6093_v24 = vld [vmem:[#allocation10 + $0x1a8] ss:$48 sps:$4 sm:$0xff]  }
 0x724   : > { %3913 = vmatpush1.bf16.msra.mxu0 %v6006_v48  ;;  %3956 = vmatpush1.bf16.msra.mxu1 %v6009_v49  ;;  %v6098_v48 = vld [vmem:[#allocation10 + $0x144] ss:$48 sps:$4 sm:$0xff]   ;;  %v6096_v49 = vld [vmem:[#allocation10 + $0x140] ss:$48 sps:$4 sm:$0xff]  }
 0x725   : > { %3914 = vmatprep.subr.bf16.mxu0 %v6014_v50  ;;  %3957 = vmatprep.subr.bf16.mxu1 %v6017_v51  ;;  %v6099_v50 = vld [vmem:[#allocation10 + $0x148] ss:$48 sps:$4 sm:$0xff]   ;;  %v6104_v51 = vld [vmem:[#allocation10 + $0xe4] ss:$48 sps:$4 sm:$0xff]  }
 0x728   : > { %3915 = vmatpush1.bf16.msra.mxu0 %v6012_v52  ;;  %3958 = vmatpush1.bf16.msra.mxu1 %v6015_v53  ;;  %v6107_v52 = vld [vmem:[#allocation10 + $0xec] ss:$48 sps:$4 sm:$0xff]   ;;  %v6102_v53 = vld [vmem:[#allocation10 + $0xe0] ss:$48 sps:$4 sm:$0xff]  }
 0x729   : > { %3916 = vmatprep.subr.bf16.mxu0 %v6020_v54  ;;  %3959 = vmatprep.subr.bf16.mxu1 %v6023_v55  ;;  %v6105_v54 = vld [vmem:[#allocation10 + $0xe8] ss:$48 sps:$4 sm:$0xff]   ;;  %v6110_v55 = vld [vmem:[#allocation10 + $0x84] ss:$48 sps:$4 sm:$0xff]  }
 0x72c   : > { %3917 = vmatpush1.bf16.msra.mxu0 %v6018_v61  ;;  %3960 = vmatpush1.bf16.msra.mxu1 %v6021_v11  ;;  %v6113_v61 = vld [vmem:[#allocation10 + $0x8c] ss:$48 sps:$4 sm:$0xff]   ;;  %v6108_v11 = vld [vmem:[#allocation10 + $0x80] ss:$48 sps:$4 sm:$0xff]  }
 0x72d   : > { %3918 = vmatprep.subr.bf16.mxu0 %v6026_v56  ;;  %3961 = vmatprep.subr.bf16.mxu1 %v6029_v57  ;;  %v6111_v56 = vld [vmem:[#allocation10 + $0x88] ss:$48 sps:$4 sm:$0xff]   ;;  %v6116_v57 = vld [vmem:[#allocation10 + $0x24] ss:$48 sps:$4 sm:$0xff]  }
 0x730   : > { %3919 = vmatpush2.bf16.msra.mxu0 %v6024_v58  ;;  %3962 = vmatpush2.bf16.msra.mxu1 %v6027_v59  ;;  %v6119_v58 = vld [vmem:[#allocation10 + $0x2c] ss:$48 sps:$4 sm:$0xff]   ;;  %v6114_v59 = vld [vmem:[#allocation10 + $0x20] ss:$48 sps:$4 sm:$0xff]  }
 0x731   : > { %3920 = vmatprep.subr.bf16.mxu0 %v6032_v3  ;;  %3963 = vmatprep.subr.bf16.mxu1 %v6035_v60  ;;  %v6117_v3 = vld [vmem:[#allocation10 + $0x28] ss:$48 sps:$4 sm:$0xff]   ;;  %v6122_v60 = vld [vmem:[#allocation10 + $0x5c4] ss:$48 sps:$4 sm:$0xff]  }
 0x734   : > { %3921 = vmatpush2.bf16.msra.mxu0 %v6030_v15  ;;  %3964 = vmatpush2.bf16.msra.mxu1 %v6033_v62  ;;  %v6125_v15 = vld [vmem:[#allocation10 + $0x5cc] ss:$48 sps:$4 sm:$0xff]   ;;  %v6120_v62 = vld [vmem:[#allocation10 + $0x5c0] ss:$48 sps:$4 sm:$0xff]  }
 0x735   : > { %3922 = vmatprep.subr.bf16.mxu0 %v6038_v63  ;;  %3965 = vmatprep.subr.bf16.mxu1 %v6041_v5  ;;  %v6123_v63 = vld [vmem:[#allocation10 + $0x5c8] ss:$48 sps:$4 sm:$0xff]   ;;  %v6128_v5 = vld [vmem:[#allocation10 + $0x564] ss:$48 sps:$4 sm:$0xff]  }
 0x738   : > { %3923 = vmatpush2.bf16.msra.mxu0 %v6036_v0  ;;  %3966 = vmatpush2.bf16.msra.mxu1 %v6039_v16  ;;  %v6131_v0 = vld [vmem:[#allocation10 + $0x56c] ss:$48 sps:$4 sm:$0xff]   ;;  %v6126_v16 = vld [vmem:[#allocation10 + $0x560] ss:$48 sps:$4 sm:$0xff]  }
 0x739   : > { %3924 = vmatprep.subr.bf16.mxu0 %v6044_v31  ;;  %3967 = vmatprep.subr.bf16.mxu1 %v6047_v7  ;;  %v6129_v31 = vld [vmem:[#allocation10 + $0x568] ss:$48 sps:$4 sm:$0xff]   ;;  %v6134_v7 = vld [vmem:[#allocation10 + $0x504] ss:$48 sps:$4 sm:$0xff]  }
 0x73c   : > { %3925 = vmatpush2.bf16.msra.mxu0 %v6042_v1  ;;  %3968 = vmatpush2.bf16.msra.mxu1 %v6045_v2  ;;  %v6137_v1 = vld [vmem:[#allocation10 + $0x50c] ss:$48 sps:$4 sm:$0xff]   ;;  %v6132_v2 = vld [vmem:[#allocation10 + $0x500] ss:$48 sps:$4 sm:$0xff]  }
 0x73d   : > { %3926 = vmatprep.subr.bf16.mxu0 %v6050_v4  ;;  %3969 = vmatprep.subr.bf16.mxu1 %v6053_v6  ;;  %v6135_v4 = vld [vmem:[#allocation10 + $0x508] ss:$48 sps:$4 sm:$0xff]   ;;  %v6140_v6 = vld [vmem:[#allocation10 + $0x4a4] ss:$48 sps:$4 sm:$0xff]  }
 0x740   : > { %3927 = vmatpush2.bf16.msra.mxu0 %v6048_v8  ;;  %3970 = vmatpush2.bf16.msra.mxu1 %v6051_v9  ;;  %v6143_v8 = vld [vmem:[#allocation10 + $0x4ac] ss:$48 sps:$4 sm:$0xff]   ;;  %v6138_v9 = vld [vmem:[#allocation10 + $0x4a0] ss:$48 sps:$4 sm:$0xff]  }
 0x741   : > { %3928 = vmatprep.subr.bf16.mxu0 %v6056_v17  ;;  %3971 = vmatprep.subr.bf16.mxu1 %v6059_v19  ;;  %v6141_v17 = vld [vmem:[#allocation10 + $0x4a8] ss:$48 sps:$4 sm:$0xff]   ;;  %v6146_v19 = vld [vmem:[#allocation10 + $0x444] ss:$48 sps:$4 sm:$0xff]  }
 0x744   : > { %3929 = vmatpush2.bf16.msra.mxu0 %v6054_v22  ;;  %3972 = vmatpush2.bf16.msra.mxu1 %v6057_v12  ;;  %v6149_v22 = vld [vmem:[#allocation10 + $0x44c] ss:$48 sps:$4 sm:$0xff]   ;;  %v6144_v12 = vld [vmem:[#allocation10 + $0x440] ss:$48 sps:$4 sm:$0xff]  }
 0x745   : > { %3930 = vmatprep.subr.bf16.mxu0 %v6062_v14  ;;  %3973 = vmatprep.subr.bf16.mxu1 %v6065_v25  ;;  %v6147_v14 = vld [vmem:[#allocation10 + $0x448] ss:$48 sps:$4 sm:$0xff]   ;;  %v6152_v25 = vld [vmem:[#allocation10 + $0x3e4] ss:$48 sps:$4 sm:$0xff]  }
 0x748   : > { %3931 = vmatpush2.bf16.msra.mxu0 %v6060_v26  ;;  %3974 = vmatpush2.bf16.msra.mxu1 %v6063_v27  ;;  %v6155_v26 = vld [vmem:[#allocation10 + $0x3ec] ss:$48 sps:$4 sm:$0xff]   ;;  %v6150_v27 = vld [vmem:[#allocation10 + $0x3e0] ss:$48 sps:$4 sm:$0xff]  }
 0x749   : > { %3932 = vmatprep.subr.bf16.mxu0 %v6068_v30  ;;  %3975 = vmatprep.subr.bf16.mxu1 %v6071_v20  ;;  %v6153_v30 = vld [vmem:[#allocation10 + $0x3e8] ss:$48 sps:$4 sm:$0xff]   ;;  %v6158_v20 = vld [vmem:[#allocation10 + $0x384] ss:$48 sps:$4 sm:$0xff]  }
 0x74c   : > { %3933 = vmatpush2.bf16.msra.mxu0 %v6066_v18  ;;  %3976 = vmatpush2.bf16.msra.mxu1 %v6069_v21  ;;  %v6161_v18 = vld [vmem:[#allocation10 + $0x38c] ss:$48 sps:$4 sm:$0xff]   ;;  %v6156_v21 = vld [vmem:[#allocation10 + $0x380] ss:$48 sps:$4 sm:$0xff]  }
 0x74d   : > { %3988 = vmatprep.subr.bf16.mxu0 %v6074_v33  ;;  %4031 = vmatprep.subr.bf16.mxu1 %v6077_v35  ;;  %v6159_v33 = vld [vmem:[#allocation10 + $0x388] ss:$48 sps:$4 sm:$0xff]   ;;  %v6164_v35 = vld [vmem:[#allocation10 + $0x324] ss:$48 sps:$4 sm:$0xff]  }
 0x74f   : > { %3935 = vmatmul.mubr.bf16.vlgmr.msra.gmra.mxu0 %v7212_v32  ;;  %3978 = vmatmul.mubr.bf16.vlgmr.msra.gmra.mxu1 %v7212_v32 }
 0x750   : > { %3989 = vmatpush1.bf16.msra.mxu0 %v6072_v36  ;;  %4020 = vmatprep.mubr.bf16.mxu0 %v7210_v29  ;;  %v6167_v36 = vld [vmem:[#allocation10 + $0x32c] ss:$48 sps:$4 sm:$0xff]  }
 0x751   : > { %4032 = vmatpush1.bf16.msra.mxu1 %v6075_v37  ;;  %4063 = vmatprep.mubr.bf16.mxu1 %v7210_v29  ;;  %v6101_v29 = vld [vmem:[#allocation10 + $0x14c] ss:$48 sps:$4 sm:$0xff]   ;;  %v6162_v37 = vld [vmem:[#allocation10 + $0x320] ss:$48 sps:$4 sm:$0xff]  }
 0x752   : > { %3990 = vmatprep.subr.bf16.mxu0 %v6080_v38  ;;  %4033 = vmatprep.subr.bf16.mxu1 %v6083_v39  ;;  %v6165_v38 = vld [vmem:[#allocation10 + $0x328] ss:$48 sps:$4 sm:$0xff]   ;;  %v6170_v39 = vld [vmem:[#allocation11 + $0x74] ss:$8 sps:$4 sm:$0xff]  }
 0x754   : > { %3991 = vmatpush1.bf16.msra.mxu0 %v6078_v40  ;;  %v6168_v40 = vld [vmem:[#allocation11 + $0x70] ss:$8 sps:$4 sm:$0xff]  }
 0x755   : > { %4034 = vmatpush1.bf16.msra.mxu1 %v6081_v41  ;;  %3992 = vmatprep.subr.bf16.mxu0 %v6086_v42  ;;  %v6173_v41 = vld [vmem:[#allocation11 + $0x64] ss:$8 sps:$4 sm:$0xff]   ;;  %v6171_v42 = vld [vmem:[#allocation11 + $0x60] ss:$8 sps:$4 sm:$0xff]  }
 0x756   : > { %4035 = vmatprep.subr.bf16.mxu1 %v6089_v13  ;;  %v6176_v13 = vld [vmem:[#allocation11 + $0x54] ss:$8 sps:$4 sm:$0xff]  }
 0x758   : > { %3993 = vmatpush1.bf16.msra.mxu0 %v6084_v43  ;;  %v6174_v43 = vld [vmem:[#allocation11 + $0x50] ss:$8 sps:$4 sm:$0xff]  }
 0x759   : > { %4036 = vmatpush1.bf16.msra.mxu1 %v6087_v44  ;;  %3994 = vmatprep.subr.bf16.mxu0 %v6092_v45  ;;  %v6179_v44 = vld [vmem:[#allocation11 + $0x44] ss:$8 sps:$4 sm:$0xff]   ;;  %v6177_v45 = vld [vmem:[#allocation11 + $0x40] ss:$8 sps:$4 sm:$0xff]  }
 0x75a   : > { %4037 = vmatprep.subr.bf16.mxu1 %v6095_v46  ;;  %v6182_v46 = vld [vmem:[#allocation11 + $0x34] ss:$8 sps:$4 sm:$0xff]  }
 0x75c   : > { %3995 = vmatpush1.bf16.msra.mxu0 %v6090_v47  ;;  %v6218_v47 = vld [vmem:[#allocation11 + $0x174] ss:$8 sps:$4 sm:$0xff]  }
 0x75d   : > { %4038 = vmatpush1.bf16.msra.mxu1 %v6093_v24  ;;  %3996 = vmatprep.subr.bf16.mxu0 %v6098_v48  ;;  %v6180_v24 = vld [vmem:[#allocation11 + $0x30] ss:$8 sps:$4 sm:$0xff]  }
 0x75e   : > { %4039 = vmatprep.subr.bf16.mxu1 %v6101_v29  ;;  %v6216_v48 = vld [vmem:[#allocation11 + $0x170] ss:$8 sps:$4 sm:$0xff]   ;;  %v6185_v29 = vld [vmem:[#allocation11 + $0x24] ss:$8 sps:$4 sm:$0xff]  }
 0x760   : > { %3997 = vmatpush1.bf16.msra.mxu0 %v6096_v49  ;;  %v6183_v49 = vld [vmem:[#allocation11 + $0x20] ss:$8 sps:$4 sm:$0xff]  }
 0x761   : > { %4040 = vmatpush1.bf16.msra.mxu1 %v6099_v50  ;;  %3998 = vmatprep.subr.bf16.mxu0 %v6104_v51  ;;  %v6222_v50 = vld [vmem:[#allocation11 + $0x160] ss:$8 sps:$4 sm:$0xff]   ;;  %v6188_v51 = vld [vmem:[#allocation11 + $0x14] ss:$8 sps:$4 sm:$0xff]  }
 0x762   : > { %4041 = vmatprep.subr.bf16.mxu1 %v6107_v52  ;;  %v6230_v52 = vld [vmem:[#allocation11 + $0x154] ss:$8 sps:$4 sm:$0xff]  }
 0x764   : > { %3999 = vmatpush1.bf16.msra.mxu0 %v6102_v53  ;;  %v6186_v53 = vld [vmem:[#allocation11 + $0x10] ss:$8 sps:$4 sm:$0xff]  }
 0x765   : > { %4042 = vmatpush1.bf16.msra.mxu1 %v6105_v54  ;;  %4000 = vmatprep.subr.bf16.mxu0 %v6110_v55  ;;  %v6228_v54 = vld [vmem:[#allocation11 + $0x150] ss:$8 sps:$4 sm:$0xff]   ;;  %v6191_v55 = vld [vmem:[#allocation11 + $0x4] ss:$8 sps:$4 sm:$0xff]  }
 0x766   : > { %4043 = vmatprep.subr.bf16.mxu1 %v6113_v61  ;;  %v6236_v61 = vld [vmem:[#allocation11 + $0x144] ss:$8 sps:$4 sm:$0xff]  }
 0x768   : > { %4001 = vmatpush1.bf16.msra.mxu0 %v6108_v11  ;;  %v6189_v11 = vld [vmem:[#allocation11] ss:$8 sps:$4 sm:$0xff]  }
 0x769   : > { %4044 = vmatpush1.bf16.msra.mxu1 %v6111_v56  ;;  %4002 = vmatprep.subr.bf16.mxu0 %v6116_v57  ;;  %v6234_v56 = vld [vmem:[#allocation11 + $0x140] ss:$8 sps:$4 sm:$0xff]   ;;  %v6194_v57 = vld [vmem:[#allocation11 + $0xf4] ss:$8 sps:$4 sm:$0xff]  }
 0x76a   : > { %4045 = vmatprep.subr.bf16.mxu1 %v6119_v58  ;;  %v6242_v58 = vld [vmem:[#allocation11 + $0x134] ss:$8 sps:$4 sm:$0xff]  }
 0x76c   : > { %4003 = vmatpush1.bf16.msra.mxu0 %v6114_v59  ;;  %v6192_v59 = vld [vmem:[#allocation11 + $0xf0] ss:$8 sps:$4 sm:$0xff]  }
 0x76d   : > { %4046 = vmatpush1.bf16.msra.mxu1 %v6117_v3  ;;  %4004 = vmatprep.subr.bf16.mxu0 %v6122_v60  ;;  %v6240_v3 = vld [vmem:[#allocation11 + $0x130] ss:$8 sps:$4 sm:$0xff]   ;;  %v6197_v60 = vld [vmem:[#allocation11 + $0xe4] ss:$8 sps:$4 sm:$0xff]  }
 0x76e   : > { %4047 = vmatprep.subr.bf16.mxu1 %v6125_v15  ;;  %v6248_v15 = vld [vmem:[#allocation11 + $0x124] ss:$8 sps:$4 sm:$0xff]  }
 0x770   : > { %4005 = vmatpush2.bf16.msra.mxu0 %v6120_v62  ;;  %v6195_v62 = vld [vmem:[#allocation11 + $0xe0] ss:$8 sps:$4 sm:$0xff]  }
 0x771   : > { %4048 = vmatpush2.bf16.msra.mxu1 %v6123_v63  ;;  %4006 = vmatprep.subr.bf16.mxu0 %v6128_v5  ;;  %v6246_v63 = vld [vmem:[#allocation11 + $0x120] ss:$8 sps:$4 sm:$0xff]   ;;  %v6200_v5 = vld [vmem:[#allocation11 + $0xd4] ss:$8 sps:$4 sm:$0xff]  }
 0x772   : > { %4049 = vmatprep.subr.bf16.mxu1 %v6131_v0  ;;  %v6254_v0 = vld [vmem:[#allocation11 + $0x114] ss:$8 sps:$4 sm:$0xff]  }
 0x774   : > { %4007 = vmatpush2.bf16.msra.mxu0 %v6126_v16  ;;  %v6198_v16 = vld [vmem:[#allocation11 + $0xd0] ss:$8 sps:$4 sm:$0xff]  }
 0x775   : > { %4050 = vmatpush2.bf16.msra.mxu1 %v6129_v31  ;;  %4008 = vmatprep.subr.bf16.mxu0 %v6134_v7  ;;  %v6252_v31 = vld [vmem:[#allocation11 + $0x110] ss:$8 sps:$4 sm:$0xff]   ;;  %v6203_v7 = vld [vmem:[#allocation11 + $0xc4] ss:$8 sps:$4 sm:$0xff]  }
 0x776   : > { %4051 = vmatprep.subr.bf16.mxu1 %v6137_v1  ;;  %v6258_v1 = vld [vmem:[#allocation11 + $0x100] ss:$8 sps:$4 sm:$0xff]  }
 0x778   : > { %4009 = vmatpush2.bf16.msra.mxu0 %v6132_v2  ;;  %v6260_v2 = vld [vmem:[#allocation11 + $0x104] ss:$8 sps:$4 sm:$0xff]  }
 0x779   : > { %4052 = vmatpush2.bf16.msra.mxu1 %v6135_v4  ;;  %4010 = vmatprep.subr.bf16.mxu0 %v6140_v6  ;;  %v6201_v4 = vld [vmem:[#allocation11 + $0xc0] ss:$8 sps:$4 sm:$0xff]   ;;  %v6266_v6 = vld [vmem:[#allocation11 + $0x1f4] ss:$8 sps:$4 sm:$0xff]  }
 0x77a   : > { %4053 = vmatprep.subr.bf16.mxu1 %v6143_v8  ;;  %v6206_v8 = vld [vmem:[#allocation11 + $0xb4] ss:$8 sps:$4 sm:$0xff]  }
 0x77c   : > { %4011 = vmatpush2.bf16.msra.mxu0 %v6138_v9  ;;  %v6264_v9 = vld [vmem:[#allocation11 + $0x1f0] ss:$8 sps:$4 sm:$0xff]  }
 0x77d   : > { %4054 = vmatpush2.bf16.msra.mxu1 %v6141_v17  ;;  %4012 = vmatprep.subr.bf16.mxu0 %v6146_v19  ;;  %v6204_v17 = vld [vmem:[#allocation11 + $0xb0] ss:$8 sps:$4 sm:$0xff]   ;;  %v6272_v19 = vld [vmem:[#allocation11 + $0x1e4] ss:$8 sps:$4 sm:$0xff]  }
 0x77e   : > { %4055 = vmatprep.subr.bf16.mxu1 %v6149_v22  ;;  %v6209_v22 = vld [vmem:[#allocation11 + $0xa4] ss:$8 sps:$4 sm:$0xff]  }
 0x780   : > { %4013 = vmatpush2.bf16.msra.mxu0 %v6144_v12  ;;  %v6270_v12 = vld [vmem:[#allocation11 + $0x1e0] ss:$8 sps:$4 sm:$0xff]  }
 0x781   : > { %4056 = vmatpush2.bf16.msra.mxu1 %v6147_v14  ;;  %4014 = vmatprep.subr.bf16.mxu0 %v6152_v25  ;;  %v6207_v14 = vld [vmem:[#allocation11 + $0xa0] ss:$8 sps:$4 sm:$0xff]   ;;  %v6278_v25 = vld [vmem:[#allocation11 + $0x1d4] ss:$8 sps:$4 sm:$0xff]  }
 0x782   : > { %4057 = vmatprep.subr.bf16.mxu1 %v6155_v26  ;;  %v6212_v26 = vld [vmem:[#allocation11 + $0x94] ss:$8 sps:$4 sm:$0xff]  }
 0x784   : > { %4015 = vmatpush2.bf16.msra.mxu0 %v6150_v27  ;;  %v6276_v27 = vld [vmem:[#allocation11 + $0x1d0] ss:$8 sps:$4 sm:$0xff]  }
 0x785   : > { %4058 = vmatpush2.bf16.msra.mxu1 %v6153_v30  ;;  %4016 = vmatprep.subr.bf16.mxu0 %v6158_v20  ;;  %v6210_v30 = vld [vmem:[#allocation11 + $0x90] ss:$8 sps:$4 sm:$0xff]   ;;  %v6284_v20 = vld [vmem:[#allocation11 + $0x1c4] ss:$8 sps:$4 sm:$0xff]  }
 0x786   : > { %4059 = vmatprep.subr.bf16.mxu1 %v6161_v18  ;;  %v6215_v18 = vld [vmem:[#allocation11 + $0x84] ss:$8 sps:$4 sm:$0xff]  }
 0x788   : > { %4017 = vmatpush2.bf16.msra.mxu0 %v6156_v21  ;;  %v6282_v21 = vld [vmem:[#allocation11 + $0x1c0] ss:$8 sps:$4 sm:$0xff]  }
 0x789   : > { %4060 = vmatpush2.bf16.msra.mxu1 %v6159_v33  ;;  %4018 = vmatprep.subr.bf16.mxu0 %v6164_v35  ;;  %v6213_v33 = vld [vmem:[#allocation11 + $0x80] ss:$8 sps:$4 sm:$0xff]   ;;  %v6290_v35 = vld [vmem:[#allocation11 + $0x1b4] ss:$8 sps:$4 sm:$0xff]  }
 0x78a   : > { %4061 = vmatprep.subr.bf16.mxu1 %v6167_v36  ;;  %v6221_v36 = vld [vmem:[#allocation11 + $0x274] ss:$8 sps:$4 sm:$0xff]  }
 0x78c   : > { %4019 = vmatpush2.bf16.msra.mxu0 %v6162_v37  ;;  %v6288_v37 = vld [vmem:[#allocation11 + $0x1b0] ss:$8 sps:$4 sm:$0xff]  }
 0x78d   : > { %4062 = vmatpush2.bf16.msra.mxu1 %v6165_v38  ;;  %4752 = vmatprep.subr.bf16.mxu0 %v6170_v39  ;;  %v6296_v38 = vld [vmem:[#allocation11 + $0x1a4] ss:$8 sps:$4 sm:$0xff]   ;;  %v6294_v39 = vld [vmem:[#allocation11 + $0x1a0] ss:$8 sps:$4 sm:$0xff]  }
 0x78e   : > { %4795 = vmatprep.subr.bf16.mxu1 %v6218_v47 }
 0x78f   : > { %4021 = vmatmul.mubr.bf16.vlgmr.msra.gmra.mxu0 %v7212_v32 }
 0x790   : > { %4064 = vmatmul.mubr.bf16.vlgmr.msra.gmra.mxu1 %v7212_v32  ;;  %4753 = vmatpush1.bf16.msra.mxu0 %v6168_v40  ;;  %v6224_v32 = vld [vmem:[#allocation11 + $0x164] ss:$8 sps:$4 sm:$0xff]   ;;  %v6302_v40 = vld [vmem:[#allocation11 + $0x194] ss:$8 sps:$4 sm:$0xff]  }
 0x791   : > { %4754 = vmatprep.subr.bf16.mxu0 %v6173_v41  ;;  %4796 = vmatpush1.bf16.msra.mxu1 %v6216_v48  ;;  %v6300_v41 = vld [vmem:[#allocation11 + $0x190] ss:$8 sps:$4 sm:$0xff]  }
 0x792   : > { %4797 = vmatprep.subr.bf16.mxu1 %v6224_v32 }
 0x794   : > { %4755 = vmatpush1.bf16.msra.mxu0 %v6171_v42  ;;  %v6308_v42 = vld [vmem:[#allocation11 + $0x184] ss:$8 sps:$4 sm:$0xff]  }
 0x795   : > { %4756 = vmatprep.subr.bf16.mxu0 %v6176_v13  ;;  %4798 = vmatpush1.bf16.msra.mxu1 %v6222_v50  ;;  %v6306_v13 = vld [vmem:[#allocation11 + $0x180] ss:$8 sps:$4 sm:$0xff]  }
 0x796   : > { %4799 = vmatprep.subr.bf16.mxu1 %v6230_v52 }
 0x798   : > { %4757 = vmatpush1.bf16.msra.mxu0 %v6174_v43 }
 0x799   : > { %4758 = vmatprep.subr.bf16.mxu0 %v6179_v44  ;;  %4800 = vmatpush1.bf16.msra.mxu1 %v6228_v54 }
 0x79a   : > { %4801 = vmatprep.subr.bf16.mxu1 %v6236_v61 }
 0x79c   : > { %4759 = vmatpush1.bf16.msra.mxu0 %v6177_v45 }
 0x79d   : > { %4760 = vmatprep.subr.bf16.mxu0 %v6182_v46  ;;  %4802 = vmatpush1.bf16.msra.mxu1 %v6234_v56 }
 0x79e   : > { %4803 = vmatprep.subr.bf16.mxu1 %v6242_v58 }
 0x7a0   : > { %4761 = vmatpush1.bf16.msra.mxu0 %v6180_v24 }
 0x7a1   : > { %4762 = vmatprep.subr.bf16.mxu0 %v6185_v29  ;;  %4804 = vmatpush1.bf16.msra.mxu1 %v6240_v3 }
 0x7a2   : > { %4805 = vmatprep.subr.bf16.mxu1 %v6248_v15 }
 0x7a4   : > { %4763 = vmatpush1.bf16.msra.mxu0 %v6183_v49 }
 0x7a5   : > { %4764 = vmatprep.subr.bf16.mxu0 %v6188_v51  ;;  %4806 = vmatpush1.bf16.msra.mxu1 %v6246_v63 }
 0x7a6   : > { %4807 = vmatprep.subr.bf16.mxu1 %v6254_v0 }
 0x7a8   : > { %4765 = vmatpush1.bf16.msra.mxu0 %v6186_v53 }
 0x7a9   : > { %4766 = vmatprep.subr.bf16.mxu0 %v6191_v55  ;;  %4808 = vmatpush1.bf16.msra.mxu1 %v6252_v31 }
 0x7aa   : > { %4809 = vmatprep.subr.bf16.mxu1 %v6260_v2 }
 0x7ac   : > { %4767 = vmatpush1.bf16.msra.mxu0 %v6189_v11 }
 0x7ad   : > { %4768 = vmatprep.subr.bf16.mxu0 %v6194_v57  ;;  %4810 = vmatpush1.bf16.msra.mxu1 %v6258_v1 }
 0x7ae   : > { %4811 = vmatprep.subr.bf16.mxu1 %v6266_v6 }
 0x7b0   : > { %4769 = vmatpush2.bf16.msra.mxu0 %v6192_v59 }
 0x7b1   : > { %4770 = vmatprep.subr.bf16.mxu0 %v6197_v60  ;;  %4812 = vmatpush2.bf16.msra.mxu1 %v6264_v9  ;;  %v6219_v9 = vld [vmem:[#allocation11 + $0x270] ss:$8 sps:$4 sm:$0xff]  }
 0x7b2   : > { %4813 = vmatprep.subr.bf16.mxu1 %v6272_v19  ;;  %v6227_v19 = vld [vmem:[#allocation11 + $0x264] ss:$8 sps:$4 sm:$0xff]  }
 0x7b4   : > { %4771 = vmatpush2.bf16.msra.mxu0 %v6195_v62 }
 0x7b5   : > { %4772 = vmatprep.subr.bf16.mxu0 %v6200_v5  ;;  %4814 = vmatpush2.bf16.msra.mxu1 %v6270_v12  ;;  %v6233_v12 = vld [vmem:[#allocation11 + $0x254] ss:$8 sps:$4 sm:$0xff]  }
 0x7b6   : > { %4815 = vmatprep.subr.bf16.mxu1 %v6278_v25  ;;  %v6231_v25 = vld [vmem:[#allocation11 + $0x250] ss:$8 sps:$4 sm:$0xff]  }
 0x7b8   : > { %4773 = vmatpush2.bf16.msra.mxu0 %v6198_v16 }
 0x7b9   : > { %4774 = vmatprep.subr.bf16.mxu0 %v6203_v7  ;;  %4816 = vmatpush2.bf16.msra.mxu1 %v6276_v27 }
 0x7ba   : > { %4817 = vmatprep.subr.bf16.mxu1 %v6284_v20  ;;  %v6245_v20 = vld [vmem:[#allocation11 + $0x234] ss:$8 sps:$4 sm:$0xff]  }
 0x7bc   : > { %4775 = vmatpush2.bf16.msra.mxu0 %v6201_v4 }
 0x7bd   : > { %4776 = vmatprep.subr.bf16.mxu0 %v6206_v8  ;;  %4818 = vmatpush2.bf16.msra.mxu1 %v6282_v21 }
 0x7be   : > { %4819 = vmatprep.subr.bf16.mxu1 %v6290_v35 }
 0x7c0   : > { %4777 = vmatpush2.bf16.msra.mxu0 %v6204_v17 }
 0x7c1   : > { %4778 = vmatprep.subr.bf16.mxu0 %v6209_v22  ;;  %4820 = vmatpush2.bf16.msra.mxu1 %v6288_v37  ;;  %v6225_v22 = vld [vmem:[#allocation11 + $0x260] ss:$8 sps:$4 sm:$0xff]  }
 0x7c2   : > { %4821 = vmatprep.subr.bf16.mxu1 %v6296_v38  ;;  %v6251_v38 = vld [vmem:[#allocation11 + $0x224] ss:$8 sps:$4 sm:$0xff]  }
 0x7c4   : > { %4779 = vmatpush2.bf16.msra.mxu0 %v6207_v14 }
 0x7c5   : > { %4780 = vmatprep.subr.bf16.mxu0 %v6212_v26  ;;  %4822 = vmatpush2.bf16.msra.mxu1 %v6294_v39  ;;  %v6239_v26 = vld [vmem:[#allocation11 + $0x244] ss:$8 sps:$4 sm:$0xff]  }
 0x7c6   : > { %4823 = vmatprep.subr.bf16.mxu1 %v6302_v40 }
 0x7c8   : > { %4781 = vmatpush2.bf16.msra.mxu0 %v6210_v30  ;;  %v6237_v30 = vld [vmem:[#allocation11 + $0x240] ss:$8 sps:$4 sm:$0xff]  }
 0x7c9   : > { %4782 = vmatprep.subr.bf16.mxu0 %v6215_v18  ;;  %4824 = vmatpush2.bf16.msra.mxu1 %v6300_v41 }
 0x7ca   : > { %4825 = vmatprep.subr.bf16.mxu1 %v6308_v42 }
 0x7cc   : > { %4783 = vmatpush2.bf16.msra.mxu0 %v6213_v33 }
 0x7cd   : > { %4838 = vmatprep.subr.bf16.mxu0 %v6221_v36  ;;  %4826 = vmatpush2.bf16.msra.mxu1 %v6306_v13  ;;  %v6243_v36 = vld [vmem:[#allocation11 + $0x230] ss:$8 sps:$4 sm:$0xff]   ;;  %v6249_v13 = vld [vmem:[#allocation11 + $0x220] ss:$8 sps:$4 sm:$0xff]  }
 0x7cf   : > { %v3850_v43 = vpop.f32.mrf.mxu0  ;;  %v7226_v61 = vpop.f32.mrf.mxu1 }
 0x7d0   : > { %v5408_v29 = vmul.f32 -1.442695, %v3850_v43  ;;  %v5410_v18 = vmul.f32 -1.442695, %v7226_v61 }
 0x7d1   : > { %v3852_v44 = vpop.f32.mrf.mxu0  ;;  %v7228_v11 = vpop.f32.mrf.mxu1 }
 0x7d2   : > { %v5409_v47 = vmul.f32 -1.442695, %v3852_v44  ;;  %v5411_v33 = vmul.f32 -1.442695, %v7228_v11 }
 0x7d3   : > { %v3854_v45 = vpop.f32.mrf.mxu0  ;;  %v7230_v56 = vpop.f32.mrf.mxu1 }
 0x7d4   : > { %v5414_v24 = vmul.f32 -1.442695, %v3854_v45  ;;  %6336 = vpow2.f32 %v5409_v47  ;;  %v5416_v35 = vmul.f32 -1.442695, %v7230_v56  ;;  %v6261_v47 = vld [vmem:[#allocation11 + $0x200] ss:$8 sps:$4 sm:$0xff]  }
 0x7d5   : > { %v3856_v46 = vpop.f32.mrf.mxu0  ;;  %v7232_v57 = vpop.f32.mrf.mxu1 }
 0x7d6   : > { %v5415_v48 = vmul.f32 -1.442695, %v3856_v46  ;;  %6338 = vpow2.f32 %v5414_v24  ;;  %v5417_v37 = vmul.f32 -1.442695, %v7232_v57  ;;  %v6269_v24 = vld [vmem:[#allocation11 + $0x2f4] ss:$8 sps:$4 sm:$0xff]  }
 0x7d8   : > { %6340 = vpow2.f32 %v5415_v48 }
 0x7d9   : > { %6342 = vpow2.f32 %v5408_v29 }
 0x7e1   : > { %v6337_v32 = vpop.eup %6336 }
 0x7e2   : > { %v4111_v52 = vadd.f32 1.0, %v6337_v32  ;;  %v6267_v32 = vld [vmem:[#allocation11 + $0x2f0] ss:$8 sps:$4 sm:$0xff]  }
 0x7e3   : > { %v6339_v49 = vpop.eup %6338 }
 0x7e4   : > { %v4116_v53 = vadd.f32 1.0, %v6339_v49  ;;  %6344 = vrcp.f32 %v4111_v52 }
 0x7e5   : > { %v6341_v50 = vpop.eup %6340 }
 0x7e6   : > { %v6343_v51 = vpop.eup %6342  ;;  %v4117_v54 = vadd.f32 1.0, %v6341_v50  ;;  %6346 = vrcp.f32 %v4116_v53  ;;  %v6275_v50 = vld [vmem:[#allocation11 + $0x2e4] ss:$8 sps:$4 sm:$0xff]  }
 0x7e7   : > { %v4110_v55 = vadd.f32 1.0, %v6343_v51 }
 0x7e8   : > { %6348 = vrcp.f32 %v4117_v54 }
 0x7e9   : > { %6350 = vrcp.f32 %v4110_v55 }
 0x7ea   : > { %6352 = vpow2.f32 %v5410_v18  ;;  %v6303_v18 = vld [vmem:[#allocation11 + $0x290] ss:$8 sps:$4 sm:$0xff]  }
 0x7eb   : > { %6354 = vpow2.f32 %v5411_v33 }
 0x7ec   : > { %6356 = vpow2.f32 %v5416_v35 }
 0x7ed   : > { %6358 = vpow2.f32 %v5417_v37 }
 0x7f1   : > { %v6345_v58 = vpop.eup %6344 }
 0x7f2   : > { %v4147_v0 = vmul.f32 %v6345_v58, %v3852_v44  ;;  %v6257_v44 = vld [vmem:[#allocation11 + $0x214] ss:$8 sps:$4 sm:$0xff]  }
 0x7f3   : > { %v6347_v3 = vpop.eup %6346 }
 0x7f4   : > { %v4152_v63 = vmul.f32 %v6347_v3, %v3854_v45  ;;  %v6255_v45 = vld [vmem:[#allocation11 + $0x210] ss:$8 sps:$4 sm:$0xff]  }
 0x7f5   : > { %v6349_v60 = vpop.eup %6348 }
 0x7f6   : > { %v6351_v62 = vpop.eup %6350  ;;  %v4153_v16 = vmul.f32 %v6349_v60, %v3856_v46  ;;  %v6263_v46 = vld [vmem:[#allocation11 + $0x204] ss:$8 sps:$4 sm:$0xff]  }
 0x7f7   : > { %v4146_v31 = vmul.f32 %v6351_v62, %v3850_v43  ;;  %v6353_v48 = vpop.eup %6352 }
 0x7f8   : > { %v6355_v29 = vpop.eup %6354  ;;  %v4112_v52 = vadd.f32 1.0, %v6353_v48 }
 0x7f9   : > { %v6357_v49 = vpop.eup %6356  ;;  %v4113_v54 = vadd.f32 1.0, %v6355_v29 }
 0x7fa   : > { %v6359_v51 = vpop.eup %6358  ;;  %v4118_v58 = vadd.f32 1.0, %v6357_v49 }
 0x7fb   : > { %v4119_v60 = vadd.f32 1.0, %v6359_v51 }
 0x80f   : > { %v3979_v59 = vpop.f32.mrf.mxu1  ;;  %v7234_v14 = vpop.f32.mrf.mxu0 }
 0x810   : > { %v4158_v6 = vmul.f32 %v4146_v31, %v3979_v59  ;;  %v5412_v39 = vmul.f32 -1.442695, %v7234_v14  ;;  %v6273_v59 = vld [vmem:[#allocation11 + $0x2e0] ss:$8 sps:$4 sm:$0xff]  }
 0x811   : > { %v3981_v15 = vpop.f32.mrf.mxu1  ;;  %v7236_v27 = vpop.f32.mrf.mxu0 }
 0x812   : > { %v4159_v2 = vmul.f32 %v4147_v0, %v3981_v15  ;;  %v5413_v41 = vmul.f32 -1.442695, %v7236_v27  ;;  %6360 = vpow2.f32 %v5412_v39  ;;  %v6281_v15 = vld [vmem:[#allocation11 + $0x2d4] ss:$8 sps:$4 sm:$0xff]  }
 0x813   : > { %v3983_v5 = vpop.f32.mrf.mxu1  ;;  %v7239_v21 = vpop.f32.mrf.mxu0 }
 0x814   : > { %v4164_v7 = vmul.f32 %v4152_v63, %v3983_v5  ;;  %v5418_v42 = vmul.f32 -1.442695, %v7239_v21  ;;  %6362 = vpow2.f32 %v5413_v41 }
 0x815   : > { %v3985_v1 = vpop.f32.mrf.mxu1  ;;  %v7245_v40 = vpop.f32.mrf.mxu0 }
 0x816   : > { %v4165_v4 = vmul.f32 %v4153_v16, %v3985_v1  ;;  %v4170_v17 = vpack.c.bf16 %v4164_v7, %v4158_v6  ;;  %v5419_v43 = vmul.f32 -1.442695, %v7245_v40  ;;  %6364 = vpow2.f32 %v5418_v42  ;;  %v6279_v16 = vld [vmem:[#allocation11 + $0x2d0] ss:$8 sps:$4 sm:$0xff]   ;;  %v6287_v7 = vld [vmem:[#allocation11 + $0x2c4] ss:$8 sps:$4 sm:$0xff]  }
 0x817   : > { %v6285_v1 = vld [vmem:[#allocation11 + $0x2c0] ss:$8 sps:$4 sm:$0xff]   ;;  %v6299_v6 = vld [vmem:[#allocation11 + $0x2a4] ss:$8 sps:$4 sm:$0xff]  }
 0x818   : > { %v4171_v8 = vpack.c.bf16 %v4165_v4, %v4159_v2  ;;  %6366 = vpow2.f32 %v5419_v43  ;;  %v6293_v2 = vld [vmem:[#allocation11 + $0x2b4] ss:$8 sps:$4 sm:$0xff]   ;;  %v6291_v4 = vld [vmem:[#allocation11 + $0x2b0] ss:$8 sps:$4 sm:$0xff]  }
 0x819   : > { %6368 = vrcp.f32 %v4112_v52 }
 0x81a   : > { %4784 = vmatprep.mubr.bf16.mxu0 %v4171_v8  ;;  %6370 = vrcp.f32 %v4113_v54 }
 0x81b   : > { %4785 = vmatmul.mubr.bf16.vlgmr.msra.gmra.mxu0 %v4170_v17  ;;  %6372 = vrcp.f32 %v4118_v58  ;;  %v6297_v17 = vld [vmem:[#allocation11 + $0x2a0] ss:$8 sps:$4 sm:$0xff]  }
 0x81c   : > { %4839 = vmatpush1.bf16.msra.mxu0 %v6219_v9  ;;  %6374 = vrcp.f32 %v4119_v60 }
 0x81d   : > { %4840 = vmatprep.subr.bf16.mxu0 %v6227_v19 }
 0x81f   : > { %v6361_v53 = vpop.eup %6360 }
 0x820   : > { %4841 = vmatpush1.bf16.msra.mxu0 %v6225_v22  ;;  %v4114_v63 = vadd.f32 1.0, %v6361_v53  ;;  %v6305_v22 = vld [vmem:[#allocation11 + $0x294] ss:$8 sps:$4 sm:$0xff]  }
 0x821   : > { %4842 = vmatprep.subr.bf16.mxu0 %v6233_v12  ;;  %v6363_v55 = vpop.eup %6362 }
 0x822   : > { %v4115_v5 = vadd.f32 1.0, %v6363_v55  ;;  %6376 = vrcp.f32 %v4114_v63 }
 0x823   : > { %v6365_v3 = vpop.eup %6364 }
 0x824   : > { %4843 = vmatpush1.bf16.msra.mxu0 %v6231_v25  ;;  %v4120_v0 = vadd.f32 1.0, %v6365_v3  ;;  %6378 = vrcp.f32 %v4115_v5 }
 0x825   : > { %4844 = vmatprep.subr.bf16.mxu0 %v6239_v26  ;;  %v6367_v62 = vpop.eup %6366 }
 0x826   : > { %v4121_v31 = vadd.f32 1.0, %v6367_v62  ;;  %6380 = vrcp.f32 %v4120_v0  ;;  %v6369_v8 = vpop.eup %6368 }
 0x827   : > { %v6371_v9 = vpop.eup %6370 }
 0x828   : > { %4845 = vmatpush1.bf16.msra.mxu0 %v6237_v30  ;;  %6382 = vrcp.f32 %v4121_v31  ;;  %v6373_v19 = vpop.eup %6372  ;;  %v4149_v42 = vmul.f32 %v6371_v9, %v7228_v11 }
 0x829   : > { %4846 = vmatprep.subr.bf16.mxu0 %v6245_v20  ;;  %v6375_v12 = vpop.eup %6374  ;;  %v4154_v39 = vmul.f32 %v6373_v19, %v7230_v56 }
 0x82a   : > { %v4155_v43 = vmul.f32 %v6375_v12, %v7232_v57 }
 0x82c   : > { %4847 = vmatpush1.bf16.msra.mxu0 %v6243_v36  ;;  %v6311_v36 = vld [vmem:[#allocation11 + $0x284] ss:$8 sps:$4 sm:$0xff]  }
 0x82d   : > { %4848 = vmatprep.subr.bf16.mxu0 %v6251_v38  ;;  %v4148_v38 = vmul.f32 %v6369_v8, %v7226_v61 }
 0x82f   : > { %v6377_v25 = vpop.eup %6376 }
 0x830   : > { %4849 = vmatpush1.bf16.msra.mxu0 %v6249_v13  ;;  %v4150_v48 = vmul.f32 %v6377_v25, %v7234_v14 }
 0x831   : > { %4850 = vmatprep.subr.bf16.mxu0 %v6257_v44  ;;  %v6379_v30 = vpop.eup %6378 }
 0x832   : > { %v4151_v29 = vmul.f32 %v6379_v30, %v7236_v27 }
 0x833   : > { %v6381_v33 = vpop.eup %6380 }
 0x834   : > { %4851 = vmatpush1.bf16.msra.mxu0 %v6255_v45  ;;  %v4156_v44 = vmul.f32 %v6381_v33, %v7239_v21 }
 0x835   : > { %4852 = vmatprep.subr.bf16.mxu0 %v6263_v46  ;;  %v6383_v37 = vpop.eup %6382 }
 0x836   : > { %v4157_v61 = vmul.f32 %v6383_v37, %v7245_v40 }
 0x838   : > { %4853 = vmatpush1.bf16.msra.mxu0 %v6261_v47 }
 0x839   : > { %4854 = vmatprep.subr.bf16.mxu0 %v6269_v24  ;;  %v6309_v24 = vld [vmem:[#allocation11 + $0x280] ss:$8 sps:$4 sm:$0xff]  }
 0x83c   : > { %4855 = vmatpush2.bf16.msra.mxu0 %v6267_v32 }
 0x83d   : > { %4856 = vmatprep.subr.bf16.mxu0 %v6275_v50 }
 0x840   : > { %4857 = vmatpush2.bf16.msra.mxu0 %v6273_v59 }
 0x841   : > { %4858 = vmatprep.subr.bf16.mxu0 %v6281_v15 }
 0x844   : > { %4859 = vmatpush2.bf16.msra.mxu0 %v6279_v16 }
 0x845   : > { %4860 = vmatprep.subr.bf16.mxu0 %v6287_v7 }
 0x848   : > { %4861 = vmatpush2.bf16.msra.mxu0 %v6285_v1 }
 0x849   : > { %4862 = vmatprep.subr.bf16.mxu0 %v6293_v2 }
 0x84c   : > { %4863 = vmatpush2.bf16.msra.mxu0 %v6291_v4 }
 0x84d   : > { %4864 = vmatprep.subr.bf16.mxu0 %v6299_v6 }
 0x84f   : > { %v4022_v26 = vpop.f32.mrf.mxu0 }
 0x850   : > { %v4065_v20 = vpop.f32.mrf.mxu1  ;;  %4865 = vmatpush2.bf16.msra.mxu0 %v6297_v17  ;;  %v4160_v45 = vmul.f32 %v4148_v38, %v4022_v26 }
 0x851   : > { %v4024_v35 = vpop.f32.mrf.mxu0  ;;  %4866 = vmatprep.subr.bf16.mxu0 %v6305_v22  ;;  %v4162_v52 = vmul.f32 %v4150_v48, %v4065_v20 }
 0x852   : > { %v4067_v41 = vpop.f32.mrf.mxu1  ;;  %v4161_v32 = vmul.f32 %v4149_v42, %v4024_v35 }
 0x853   : > { %v4026_v13 = vpop.f32.mrf.mxu0  ;;  %v4163_v51 = vmul.f32 %v4151_v29, %v4067_v41 }
 0x854   : > { %v4166_v46 = vmul.f32 %v4154_v39, %v4026_v13  ;;  %v4069_v47 = vpop.f32.mrf.mxu1  ;;  %4867 = vmatpush2.bf16.msra.mxu0 %v6303_v18 }
 0x855   : > { %v4028_v56 = vpop.f32.mrf.mxu0  ;;  %4868 = vmatprep.subr.bf16.mxu0 %v6311_v36  ;;  %v4168_v49 = vmul.f32 %v4156_v44, %v4069_v47 }
 0x856   : > { %v4172_v11 = vpack.c.bf16 %v4166_v46, %v4160_v45  ;;  %v4167_v50 = vmul.f32 %v4155_v43, %v4028_v56  ;;  %v4071_v57 = vpop.f32.mrf.mxu1 }
 0x857   : > { %v4169_v21 = vmul.f32 %v4157_v61, %v4071_v57  ;;  %v4174_v55 = vpack.c.bf16 %v4168_v49, %v4162_v52 }
 0x858   : > { %v4173_v53 = vpack.c.bf16 %v4167_v50, %v4161_v32  ;;  %4869 = vmatpush2.bf16.msra.mxu0 %v6309_v24 }
 0x859   : > { %v4175_v54 = vpack.c.bf16 %v4169_v21, %v4163_v51 }
 0x85a   : > { %4827 = vmatprep.mubr.bf16.mxu1 %v4173_v53 }
 0x85b   : > { %4870 = vmatprep.mubr.bf16.mxu0 %v4175_v54  ;;  %4828 = vmatmul.mubr.bf16.vlgmr.msra.gmra.mxu1 %v4172_v11 }
 0x85c   : > { %4871 = vmatmul.mubr.bf16.vlgmr.msra.gmra.mxu0 %v4174_v55 }
 0x8db   : > { %v4786_v14 = vpop.f32.mrf.mxu0 }
 0x8dd   : > { %v4788_v27 = vpop.f32.mrf.mxu0 }
 0x8df   : > { %v4790_v40 = vpop.f32.mrf.mxu0 }
 0x8e1   : > { %v4792_v58 = vpop.f32.mrf.mxu0 }
 0x91b   : > { %v4829_v59 = vpop.f32.mrf.mxu1 }
 0x91c   : > { %v4830_v3 = vadd.f32 %v4829_v59, %v4786_v14  ;;  %v4872_v60 = vpop.f32.mrf.mxu0 }
 0x91d   : > { %v4831_v15 = vpop.f32.mrf.mxu1 }
 0x91e   : > { %v4873_v62 = vadd.f32 %v4872_v60, %v4830_v3  ;;  %v4832_v63 = vadd.f32 %v4831_v15, %v4788_v27  ;;  %v4874_v5 = vpop.f32.mrf.mxu0 }
 0x91f   : > { %v4833_v0 = vpop.f32.mrf.mxu1 }
 0x920   : > { %v4881_v16 = vmul.f32 0.5, %v4873_v62  ;;  %v4875_v31 = vadd.f32 %v4874_v5, %v4832_v63  ;;  %v4834_v7 = vadd.f32 %v4833_v0, %v4790_v40  ;;  %v4876_v1 = vpop.f32.mrf.mxu0 }
 0x921   : > { %v4835_v2 = vpop.f32.mrf.mxu1 }
 0x922   : > { %v4885_v4 = vadd.f32 %v4881_v16, %v7180_v10  ;;  %v4882_v6 = vmul.f32 0.5, %v4875_v31  ;;  %v4877_v8 = vadd.f32 %v4876_v1, %v4834_v7  ;;  %v4836_v9 = vadd.f32 %v4835_v2, %v4792_v58  ;;  %v4878_v17 = vpop.f32.mrf.mxu0 }
 0x924   : > { %4889 = vst [vmem:[%s450_s23] sm:$0xff] %v4885_v4  ;;  %v4886_v19 = vadd.f32 %v4882_v6, %v7183_v23  ;;  %v4883_v22 = vmul.f32 0.5, %v4877_v8  ;;  %v4879_v12 = vadd.f32 %v4878_v17, %v4836_v9 }
 0x926   : > { %4890 = vst [vmem:[%s450_s23 + $0x8] sm:$0xff] %v4886_v19  ;;  %v4887_v10 = vadd.f32 %v4883_v22, %v7186_v28  ;;  %v4884_v25 = vmul.f32 0.5, %v4879_v12 }
 0x928   : > { %4891 = vst [vmem:[%s450_s23 + $0x10] sm:$0xff] %v4887_v10  ;;  %v4888_v23 = vadd.f32 %v4884_v25, %v7193_v34 }
 0x92a   : > { %4892 = vst [vmem:[%s450_s23 + $0x18] sm:$0xff] %v4888_v23 }
 0x92b   : > { %6615 = shalt.err (!%p6612_p8)
}
 0x92c   : > { %s6616_s20 = scalar_lea.hbm %s7269_s14, 512  ;;  %s6620_s18 = scalar_lea.hbm %s7322_s9, 1024 }
 0x92d   : > { %p6617_p6 = scmp.ne.s32.totalorder %s7269_s14, %s6616_s20  ;;  %p6621_p13 = scmp.lt.s32.totalorder %s7269_s14, %s7322_s9 }
 0x92e   : > { %p6622_p2 = scmp.lt.s32.totalorder %s6620_s18, %s6616_s20 }
 0x92f   : > { %p6618_p10 = pnand %p6617_p6, %p7350_p9 }
 0x930   : > { %p6623_p5 = por %p6622_p2, %p6621_p13 }
 0x931   : > { %p6619_p7 = pneg %p6618_p10 }
 0x933   : > { %p6624_p11 = pnand %p6623_p5, %p6619_p7 }
 0x935   : > { %6627 = shalt.err (!%p6624_p11)
}
 0x936   : > { %s6707_s24 = smov 256   ;;  %s6708_s28 = smov 16  }
 0x937   : > { %5585 = dma.vmem_to_hbm [thread:$0]  (%p7350_p9), %s7263_s19, 512, %s7269_s14, %s4894_s1, %s6707_s24, %s6707_s24, %s6708_s28  }
 0x938 PF: > { %s4922_s15 = sand.u32 1, %s6670_s30   ;;  %p7351_p12 = scmp.ne.s32.totalorder %s7338_s21, 0 }
 0x939   : > { %p7352_p0 = scmp.ge.s32.totalorder %s6682_s12, 2  ;;  %s4923_s17 = scalar_lea.sflag [#allocation4], %s4922_s15 }
 0x93b   : > { %p5614_p1 = pnand %p7352_p0, %p7351_p12 }
 0x93d   : > { %p5615_p3 = pneg %p5614_p1 }
 0x93f   : > { %6665 = dma.done.wait (%p5615_p3), %s4923_s17, 512  }
 0x940   : > { %6667 = vsyncadd (%p5615_p3), %s4923_s17, 4294966784  ;;  %p26_p4 = scmp.ge.s32.totalorder %s6881_s22, 4   ;;  %s7353_s30 = smov %s6674_s10 }
 0x941   : > { %s7354_s10 = smov %s6678_s11  ;;  %s7355_s11 = smov %s6893_s26 }
 0x942   : > { %s7356_s12 = smov %s6881_s22  ;;  %28 = sbr.rel (!%p26_p4) target bundleno = 13 (0xd), region = 129 }
 0x947   :  { %4928 = vsyncpa [#allocation3], 1 }
 0x948   :  { %4930 = vsyncpa [#allocation3 + $0x1], 1 }
 0x949   :  { %4931 = vsyncpa [#allocation6], 1 }
 0x94a   :  { %4932 = vsyncpa [#allocation9], 1 }
 0x94b   :  { %4933 = vsyncpa [#allocation12], 1 }
 0x94c   :  { %4934 = vsyncpa [#allocation15], 1 }
 0x94d   :  { %4935 = vsyncpa [#allocation4], 1 }
 0x94e   :  { %4937 = vsyncpa [#allocation4 + $0x1], 1 }

</bundles_post_ra>
